<compile_context>
chip_gen: v6e
topology: v6e:2x2x1
jax: 0.10.0
libtpu: 0.0.40
codegen_flags: <defaults>
</compile_context>

<pallas_src>
import math

import jax
import jax.numpy as jnp
from jax import lax
from jax.experimental import pallas as pl
from jax.experimental.pallas import tpu as pltpu

_LN_EPS = 1e-5
_INV_SQRT2 = 1.0 / math.sqrt(2.0)
_MIB = 1024 * 1024


def _round_up(v, m):
    return ((v + m - 1) // m) * m


def _merger_kernel(x_ref, wproj_ref, ln_ref, wgate_ref, wup_ref, wdown_ref,
                   o_ref, g_scr, acc_scr):
    k = pl.program_id(1)

    # ---- once per row tile: proj -> LayerNorm -> exact (erf) GELU ----------
    @pl.when(k == 0)
    def _():
        h = jnp.dot(x_ref[...], wproj_ref[...],
                    preferred_element_type=jnp.float32)
        mu = jnp.mean(h, axis=-1, keepdims=True)
        d = h - mu
        var = jnp.mean(d * d, axis=-1, keepdims=True)
        hn = d * lax.rsqrt(var + _LN_EPS)
        hn = hn * ln_ref[0:1, :] + ln_ref[1:2, :]          # already f32
        g = 0.5 * hn * (1.0 + lax.erf(hn * _INV_SQRT2))
        g_scr[...] = g.astype(g_scr.dtype)                 # MXU-native dtype
        acc_scr[...] = jnp.zeros_like(acc_scr)

    # ---- per C-chunk: gate/up matmuls, SiluAndMul, down-proj accumulate ----
    g = g_scr[...]
    gate = jnp.dot(g, wgate_ref[...], preferred_element_type=jnp.float32)
    up = jnp.dot(g, wup_ref[...], preferred_element_type=jnp.float32)
    act = (gate * jax.nn.sigmoid(gate)) * up
    acc_scr[...] += jnp.dot(act.astype(wdown_ref.dtype), wdown_ref[...],
                            preferred_element_type=jnp.float32)

    # ---- writeback on the last C chunk -------------------------------------
    @pl.when(k == pl.num_programs(1) - 1)
    def _():
        o_ref[...] = acc_scr[...].astype(o_ref.dtype)


def glm4v_patch_merger(x, w_proj, ln_gamma, ln_beta, w_gate_up, w_down, *,
                       tile_m=512, tile_c=512, vmem_limit_bytes=None,
                       single_buffer_weights=True):
    """x: [S, H].  w_proj: [H, H], w_gate_up: [H, 2C], w_down: [C, H]
    (all [in, out]); ln_gamma/ln_beta: [H].  Returns [S, H]."""
    S, H = x.shape
    C2 = w_gate_up.shape[1]
    assert C2 % 2 == 0
    C = C2 // 2
    assert w_proj.shape == (H, H)
    assert w_down.shape == (C, H)

    # LN params pre-folded into a single f32 [2, H] array (no in-kernel casts).
    ln = jnp.stack([jnp.asarray(ln_gamma, jnp.float32).reshape(H),
                    jnp.asarray(ln_beta, jnp.float32).reshape(H)], axis=0)

    # ---- M (token) tiling: sublane-aligned, prefer >=2 steps (v7x megacore) -
    sub = 16 if x.dtype.itemsize == 2 else 8
    tm = max(sub, min(_round_up(tile_m, sub), _round_up(S, sub)))
    if pl.cdiv(S, tm) < 2 and S > sub:
        tm = _round_up(pl.cdiv(S, 2), sub)
    n_m = pl.cdiv(S, tm)

    # ---- C (context) tiling for the gate/up/down chain ---------------------
    tc = min(tile_c, C)
    if C % tc != 0:
        # TODO(synk): ragged C tiling needs masking of the out-of-range
        # gate/up columns and Wdown rows; fall back to a single chunk.
        tc = C
    n_k = C // tc
    gate_blocks = C // tc           # block-column offset of the "up" half

    wdtype = w_gate_up.dtype
    w_b = jnp.dtype(wdtype).itemsize
    x_b = x.dtype.itemsize

    if vmem_limit_bytes is None:
        need = (
            2 * (H * H * w_b + 2 * H * 4)      # Wproj + LN (worst case 2 bufs)
            + 2 * (2 * H * tc * w_b)           # gate & up chunks (double buf)
            + 2 * (tc * H * w_b)               # Wdown chunk (double buf)
            + 2 * (tm * H * x_b)               # x tile (double buf)
            + 2 * (tm * H * x_b)               # out tile (double buf)
            + tm * H * (w_b + 4)               # g scratch + f32 accumulator
            + 4 * tm * max(H, tc) * 4          # f32 elementwise temporaries
        )
        try:
            cap = int(0.75 * pltpu.get_tpu_info().vmem_capacity_bytes)
        except Exception:
            cap = 96 * _MIB
        vmem_limit_bytes = int(min(cap, max(32 * _MIB, int(need * 1.25) + 2 * _MIB)))

    def build(single_buffer):
        const_kw = {"pipeline_mode": pl.Buffered(1)} if single_buffer else {}
        in_specs = [
            pl.BlockSpec((tm, H), lambda i, k: (i, 0)),                 # x tile
            pl.BlockSpec((H, H), lambda i, k: (0, 0), **const_kw),      # Wproj
            pl.BlockSpec((2, H), lambda i, k: (0, 0), **const_kw),      # LN g/b
            pl.BlockSpec((H, tc), lambda i, k: (0, k)),                 # gate chunk
            pl.BlockSpec((H, tc), lambda i, k: (0, gate_blocks + k)),   # up chunk
            pl.BlockSpec((tc, H), lambda i, k: (k, 0)),                 # Wdown chunk
        ]
        return pl.pallas_call(
            _merger_kernel,
            out_shape=jax.ShapeDtypeStruct((S, H), x.dtype),
            grid_spec=pltpu.PrefetchScalarGridSpec(
                num_scalar_prefetch=0,
                grid=(n_m, n_k),
                in_specs=in_specs,
                out_specs=pl.BlockSpec((tm, H), lambda i, k: (i, 0)),
                scratch_shapes=[pltpu.VMEM((tm, H), wdtype),      # GELU(LN(proj))
                                pltpu.VMEM((tm, H), jnp.float32)],  # down-proj acc
            ),
            compiler_params=pltpu.CompilerParams(
                dimension_semantics=("parallel", "arbitrary"),
                vmem_limit_bytes=vmem_limit_bytes,
            ),
        )

    args = (x, w_proj, ln, w_gate_up, w_gate_up, w_down)
    if single_buffer_weights:
        try:
            return build(True)(*args)
        except Exception:
            # pipeline_mode single-buffering not supported by this Pallas
            # version -> fall back to default (double) buffering.
            pass
    return build(False)(*args)


def _reference(x, w_proj, ln_gamma, ln_beta, w_gate_up, w_down):
    hp = jax.lax.Precision.HIGHEST
    f = jnp.float32
    x = x.astype(f)
    w_proj = w_proj.astype(f)
    w_gate_up = w_gate_up.astype(f)
    w_down = w_down.astype(f)
    g_ = jnp.asarray(ln_gamma, f).reshape(-1)
    b_ = jnp.asarray(ln_beta, f).reshape(-1)
    h = jnp.dot(x, w_proj, precision=hp)
    mu = h.mean(-1, keepdims=True)
    var = ((h - mu) ** 2).mean(-1, keepdims=True)
    hn = (h - mu) / jnp.sqrt(var + _LN_EPS) * g_ + b_
    a = jax.nn.gelu(hn, approximate=False)
    gu = jnp.dot(a, w_gate_up, precision=hp)
    C = gu.shape[-1] // 2
    act = jax.nn.silu(gu[:, :C]) * gu[:, C:]
    return jnp.dot(act, w_down, precision=hp)


if __name__ == "__main__":
    # Small but TPU-aligned shapes: seq=256, hidden=128, context=256.
    S, H, C = 256, 128, 256
    key = jax.random.PRNGKey(0)
    kx, kp, kg, kb, kgu, kd = jax.random.split(key, 6)

    x = jax.random.normal(kx, (S, H), dtype=jnp.float32)

    # PyTorch Linear weights are [out, in]; build [in, out] for the kernel.
    proj_w_pt = jax.random.normal(kp, (H, H), dtype=jnp.float32) * 0.05
    gate_up_w_pt = jax.random.normal(kgu, (2 * C, H), dtype=jnp.float32) * 0.05
    down_w_pt = jax.random.normal(kd, (H, C), dtype=jnp.float32) * 0.05

    w_proj = proj_w_pt.T                                        # [H, H]
    w_gate_up = jnp.concatenate(                                # [H, 2C] fused
        [gate_up_w_pt[:C].T, gate_up_w_pt[C:].T], axis=1)
    w_down = down_w_pt.T                                        # [C, H]

    ln_gamma = 1.0 + 0.1 * jax.random.normal(kg, (H,), dtype=jnp.float32)
    ln_beta = 0.1 * jax.random.normal(kb, (H,), dtype=jnp.float32)

    ref = _reference(x, w_proj, ln_gamma, ln_beta, w_gate_up, w_down)

    # 1) defaults: tile_m auto-splits 256 -> 2x128 parallel M steps, 1 C chunk.
    out = jax.block_until_ready(
        glm4v_patch_merger(x, w_proj, ln_gamma, ln_beta, w_gate_up, w_down))
    assert out.shape == (S, H)
    assert jnp.allclose(out, ref, atol=1e-2, rtol=1e-2), "f32 default mismatch"

    # 2) column-tiled down-projection accumulator path (tile_c=128 -> 2 K steps).
    out_kt = jax.block_until_ready(
        glm4v_patch_merger(x, w_proj, ln_gamma, ln_beta, w_gate_up, w_down,
                           tile_m=64, tile_c=128))
    assert jnp.allclose(out_kt, ref, atol=1e-2, rtol=1e-2), "C-tiled mismatch"

    # 3) ragged sequence (no wrapper-side pad/slice; edge rows masked by Pallas).
    S_r = 100
    out_r = jax.block_until_ready(
        glm4v_patch_merger(x[:S_r], w_proj, ln_gamma, ln_beta, w_gate_up, w_down))
    assert out_r.shape == (S_r, H)
    assert jnp.allclose(out_r, ref[:S_r], atol=1e-2, rtol=1e-2), "ragged-S mismatch"

    # 4) bf16 production path (bf16 MXU inputs, f32 accumulation).
    xb = x.astype(jnp.bfloat16)
    wpb = w_proj.astype(jnp.bfloat16)
    wgub = w_gate_up.astype(jnp.bfloat16)
    wdb = w_down.astype(jnp.bfloat16)
    out_bf16 = jax.block_until_ready(
        glm4v_patch_merger(xb, wpb, ln_gamma, ln_beta, wgub, wdb))
    ref_bf16 = _reference(xb, wpb, ln_gamma, ln_beta, wgub, wdb)
    assert out_bf16.shape == (S, H)
    # bf16 operands vs an f32-internal reference: tolerance is doing real work.
    assert jnp.allclose(out_bf16.astype(jnp.float32), ref_bf16,
                        atol=4e-2, rtol=4e-2), "bf16 mismatch vs reference"

    print("KERNEL_OK")
</pallas_src>

<mosaic_0001>
module attributes {stable_mosaic.version = 11 : i64} {
  func.func @_merger_kernel(%arg0: i32, %arg1: i32, %arg2: memref<128x128xf32, #tpu.memory_space<vmem>>, %arg3: memref<128x128xf32, #tpu.memory_space<vmem>>, %arg4: memref<2x128xf32, #tpu.memory_space<vmem>>, %arg5: memref<128x256xf32, #tpu.memory_space<vmem>>, %arg6: memref<128x256xf32, #tpu.memory_space<vmem>>, %arg7: memref<256x128xf32, #tpu.memory_space<vmem>>, %arg8: memref<128x128xf32, #tpu.memory_space<vmem>>, %arg9: memref<128x128xf32, #tpu.memory_space<vmem>>, %arg10: memref<128x128xf32, #tpu.memory_space<vmem>>) attributes {dimension_semantics = [#tpu.dimension_semantics<parallel>, #tpu.dimension_semantics<arbitrary>], iteration_bounds = array<i64: 2, 1>, scalar_prefetch = 0 : i64, scratch_operands = 2 : i64, tpu.core_type = #tpu.core_type<tc>, window_params = [{transform_indices = @transform_0, window_bounds = array<i64: 128, 128>}, {pipeline_mode = #tpu.pipeline_mode<synchronous>, transform_indices = @transform_1, window_bounds = array<i64: 128, 128>}, {pipeline_mode = #tpu.pipeline_mode<synchronous>, transform_indices = @transform_2, window_bounds = array<i64: 2, 128>}, {transform_indices = @transform_3, window_bounds = array<i64: 128, 256>}, {transform_indices = @transform_4, window_bounds = array<i64: 128, 256>}, {transform_indices = @transform_5, window_bounds = array<i64: 256, 128>}, {transform_indices = @transform_6, window_bounds = array<i64: 128, 128>}]} {
    %c0_i32 = arith.constant 0 : i32
    %0 = arith.cmpi eq, %arg1, %c0_i32 : i32
    %1 = arith.extui %0 : i1 to i32
    %c0_i32_0 = arith.constant 0 : i32
    %2 = arith.cmpi ne, %1, %c0_i32_0 : i32
    scf.if %2 {
      %c0_17 = arith.constant 0 : index
      %c0_18 = arith.constant 0 : index
      %23 = vector.load %arg2[%c0_17, %c0_18] : memref<128x128xf32, #tpu.memory_space<vmem>>, vector<128x128xf32>
      %c0_19 = arith.constant 0 : index
      %c0_20 = arith.constant 0 : index
      %24 = vector.load %arg3[%c0_19, %c0_20] : memref<128x128xf32, #tpu.memory_space<vmem>>, vector<128x128xf32>
      %cst_21 = arith.constant dense<0.000000e+00> : vector<128x128xf32>
      %25 = tpu.matmul %23, %24, %cst_21 {dimension_numbers = #tpu.dot_dimension_numbers<[1], [0], [0], [1], [0, 0, 1, 1], [], []>} : vector<128x128xf32>, vector<128x128xf32>, vector<128x128xf32> -> vector<128x128xf32>
      %cst_22 = arith.constant dense<0.000000e+00> : vector<128xf32>
      %26 = vector.multi_reduction <add>, %25, %cst_22 [1] : vector<128x128xf32> to vector<128xf32>
      %27 = vector.shape_cast %26 : vector<128xf32> to vector<128x1xf32>
      %cst_23 = arith.constant 1.280000e+02 : f32
      %28 = vector.broadcast %cst_23 : f32 to vector<128x1xf32>
      %29 = arith.divf %27, %28 : vector<128x1xf32>
      %30 = vector.broadcast %29 : vector<128x1xf32> to vector<128x128xf32>
      %31 = arith.subf %25, %30 : vector<128x128xf32>
      %32 = arith.mulf %31, %31 : vector<128x128xf32>
      %cst_24 = arith.constant dense<0.000000e+00> : vector<128xf32>
      %33 = vector.multi_reduction <add>, %32, %cst_24 [1] : vector<128x128xf32> to vector<128xf32>
      %34 = vector.shape_cast %33 : vector<128xf32> to vector<128x1xf32>
      %cst_25 = arith.constant 1.280000e+02 : f32
      %35 = vector.broadcast %cst_25 : f32 to vector<128x1xf32>
      %36 = arith.divf %34, %35 : vector<128x1xf32>
      %cst_26 = arith.constant 9.99999974E-6 : f32
      %37 = vector.broadcast %cst_26 : f32 to vector<128x1xf32>
      %38 = arith.addf %36, %37 : vector<128x1xf32>
      %39 = math.rsqrt %38 : vector<128x1xf32>
      %40 = vector.broadcast %39 : vector<128x1xf32> to vector<128x128xf32>
      %41 = arith.mulf %31, %40 : vector<128x128xf32>
      %c0_27 = arith.constant 0 : index
      %c0_28 = arith.constant 0 : index
      %42 = vector.load %arg4[%c0_27, %c0_28] : memref<2x128xf32, #tpu.memory_space<vmem>>, vector<1x128xf32>
      %43 = vector.broadcast %42 : vector<1x128xf32> to vector<128x128xf32>
      %44 = arith.mulf %41, %43 : vector<128x128xf32>
      %c1 = arith.constant 1 : index
      %c0_29 = arith.constant 0 : index
      %45 = vector.load %arg4[%c1, %c0_29] : memref<2x128xf32, #tpu.memory_space<vmem>>, vector<1x128xf32>
      %46 = vector.broadcast %45 : vector<1x128xf32> to vector<128x128xf32>
      %47 = arith.addf %44, %46 : vector<128x128xf32>
      %cst_30 = arith.constant 5.000000e-01 : f32
      %48 = vector.broadcast %cst_30 : f32 to vector<128x128xf32>
      %49 = arith.mulf %48, %47 : vector<128x128xf32>
      %cst_31 = arith.constant 0.707106769 : f32
      %50 = vector.broadcast %cst_31 : f32 to vector<128x128xf32>
      %51 = arith.mulf %47, %50 : vector<128x128xf32>
      %52 = math.erf %51 : vector<128x128xf32>
      %cst_32 = arith.constant 1.000000e+00 : f32
      %53 = vector.broadcast %cst_32 : f32 to vector<128x128xf32>
      %54 = arith.addf %53, %52 : vector<128x128xf32>
      %55 = arith.mulf %49, %54 : vector<128x128xf32>
      %c0_33 = arith.constant 0 : index
      %c0_34 = arith.constant 0 : index
      %56 = vector.load %arg9[%c0_33, %c0_34] : memref<128x128xf32, #tpu.memory_space<vmem>>, vector<128x128xf32>
      tpu.vector_store %arg9[%c0_33, %c0_34], %55 {strides = array<i32>} : memref<128x128xf32, #tpu.memory_space<vmem>>, vector<128x128xf32>,
      %cst_35 = arith.constant 0.000000e+00 : f32
      %57 = vector.broadcast %cst_35 : f32 to vector<128x128xf32>
      %c0_36 = arith.constant 0 : index
      %c0_37 = arith.constant 0 : index
      %58 = vector.load %arg10[%c0_36, %c0_37] : memref<128x128xf32, #tpu.memory_space<vmem>>, vector<128x128xf32>
      tpu.vector_store %arg10[%c0_36, %c0_37], %57 {strides = array<i32>} : memref<128x128xf32, #tpu.memory_space<vmem>>, vector<128x128xf32>,
    } else {
    }
    %c0 = arith.constant 0 : index
    %c0_1 = arith.constant 0 : index
    %3 = vector.load %arg9[%c0, %c0_1] : memref<128x128xf32, #tpu.memory_space<vmem>>, vector<128x128xf32>
    %c0_2 = arith.constant 0 : index
    %c0_3 = arith.constant 0 : index
    %4 = vector.load %arg5[%c0_2, %c0_3] : memref<128x256xf32, #tpu.memory_space<vmem>>, vector<128x256xf32>
    %cst = arith.constant dense<0.000000e+00> : vector<128x256xf32>
    %5 = tpu.matmul %3, %4, %cst {dimension_numbers = #tpu.dot_dimension_numbers<[1], [0], [0], [1], [0, 0, 1, 1], [], []>} : vector<128x128xf32>, vector<128x256xf32>, vector<128x256xf32> -> vector<128x256xf32>
    %c0_4 = arith.constant 0 : index
    %c0_5 = arith.constant 0 : index
    %6 = vector.load %arg6[%c0_4, %c0_5] : memref<128x256xf32, #tpu.memory_space<vmem>>, vector<128x256xf32>
    %cst_6 = arith.constant dense<0.000000e+00> : vector<128x256xf32>
    %7 = tpu.matmul %3, %6, %cst_6 {dimension_numbers = #tpu.dot_dimension_numbers<[1], [0], [0], [1], [0, 0, 1, 1], [], []>} : vector<128x128xf32>, vector<128x256xf32>, vector<128x256xf32> -> vector<128x256xf32>
    %8 = arith.negf %5 : vector<128x256xf32>
    %9 = math.exp %8 : vector<128x256xf32>
    %cst_7 = arith.constant 1.000000e+00 : f32
    %10 = vector.broadcast %cst_7 : f32 to vector<128x256xf32>
    %11 = arith.addf %10, %9 : vector<128x256xf32>
    %12 = arith.divf %10, %11 : vector<128x256xf32>
    %13 = arith.mulf %5, %12 : vector<128x256xf32>
    %14 = arith.mulf %13, %7 : vector<128x256xf32>
    %c0_8 = arith.constant 0 : index
    %c0_9 = arith.constant 0 : index
    %15 = vector.load %arg10[%c0_8, %c0_9] : memref<128x128xf32, #tpu.memory_space<vmem>>, vector<128x128xf32>
    %c0_10 = arith.constant 0 : index
    %c0_11 = arith.constant 0 : index
    %16 = vector.load %arg7[%c0_10, %c0_11] : memref<256x128xf32, #tpu.memory_space<vmem>>, vector<256x128xf32>
    %cst_12 = arith.constant dense<0.000000e+00> : vector<128x128xf32>
    %17 = tpu.matmul %14, %16, %cst_12 {dimension_numbers = #tpu.dot_dimension_numbers<[1], [0], [0], [1], [0, 0, 1, 1], [], []>} : vector<128x256xf32>, vector<256x128xf32>, vector<128x128xf32> -> vector<128x128xf32>
    %18 = arith.addf %15, %17 : vector<128x128xf32>
    %c0_13 = arith.constant 0 : index
    %c0_14 = arith.constant 0 : index
    %19 = vector.load %arg10[%c0_13, %c0_14] : memref<128x128xf32, #tpu.memory_space<vmem>>, vector<128x128xf32>
    tpu.vector_store %arg10[%c0_13, %c0_14], %18 {strides = array<i32>} : memref<128x128xf32, #tpu.memory_space<vmem>>, vector<128x128xf32>,
    %c0_i32_15 = arith.constant 0 : i32
    %20 = arith.cmpi eq, %arg1, %c0_i32_15 : i32
    %21 = arith.extui %20 : i1 to i32
    %c0_i32_16 = arith.constant 0 : i32
    %22 = arith.cmpi ne, %21, %c0_i32_16 : i32
    scf.if %22 {
      %c0_17 = arith.constant 0 : index
      %c0_18 = arith.constant 0 : index
      %23 = vector.load %arg10[%c0_17, %c0_18] : memref<128x128xf32, #tpu.memory_space<vmem>>, vector<128x128xf32>
      %c0_19 = arith.constant 0 : index
      %c0_20 = arith.constant 0 : index
      %24 = vector.load %arg8[%c0_19, %c0_20] : memref<128x128xf32, #tpu.memory_space<vmem>>, vector<128x128xf32>
      tpu.vector_store %arg8[%c0_19, %c0_20], %23 {strides = array<i32>} : memref<128x128xf32, #tpu.memory_space<vmem>>, vector<128x128xf32>,
    } else {
    }
    return
  }
  func.func @transform_0(%arg0: i32, %arg1: i32) -> (i32, i32) {
    %c0_i32 = arith.constant 0 : i32
    %c0_i32_0 = arith.constant 0 : i32
    return %arg0, %c0_i32 : i32, i32
  }
  func.func @transform_1(%arg0: i32, %arg1: i32) -> (i32, i32) {
    %c0_i32 = arith.constant 0 : i32
    %c0_i32_0 = arith.constant 0 : i32
    %c0_i32_1 = arith.constant 0 : i32
    return %c0_i32, %c0_i32_0 : i32, i32
  }
  func.func @transform_2(%arg0: i32, %arg1: i32) -> (i32, i32) {
    %c0_i32 = arith.constant 0 : i32
    %c0_i32_0 = arith.constant 0 : i32
    %c0_i32_1 = arith.constant 0 : i32
    return %c0_i32, %c0_i32_0 : i32, i32
  }
  func.func @transform_3(%arg0: i32, %arg1: i32) -> (i32, i32) {
    %c0_i32 = arith.constant 0 : i32
    %c0_i32_0 = arith.constant 0 : i32
    return %c0_i32, %arg1 : i32, i32
  }
  func.func @transform_4(%arg0: i32, %arg1: i32) -> (i32, i32) {
    %c1_i32 = arith.constant 1 : i32
    %0 = arith.addi %c1_i32, %arg1 : i32
    %c0_i32 = arith.constant 0 : i32
    %c0_i32_0 = arith.constant 0 : i32
    return %c0_i32, %0 : i32, i32
  }
  func.func @transform_5(%arg0: i32, %arg1: i32) -> (i32, i32) {
    %c0_i32 = arith.constant 0 : i32
    %c0_i32_0 = arith.constant 0 : i32
    return %arg1, %c0_i32 : i32, i32
  }
  func.func @transform_6(%arg0: i32, %arg1: i32) -> (i32, i32) {
    %c0_i32 = arith.constant 0 : i32
    %c0_i32_0 = arith.constant 0 : i32
    return %arg0, %c0_i32 : i32, i32
  }
}

module attributes {stable_mosaic.version = 11 : i64} {
  func.func @_merger_kernel(%arg0: i32, %arg1: i32, %arg2: memref<128x128xf32, #tpu.memory_space<vmem>>, %arg3: memref<128x128xf32, #tpu.memory_space<vmem>>, %arg4: memref<2x128xf32, #tpu.memory_space<vmem>>, %arg5: memref<128x256xf32, #tpu.memory_space<vmem>>, %arg6: memref<128x256xf32, #tpu.memory_space<vmem>>, %arg7: memref<256x128xf32, #tpu.memory_space<vmem>>, %arg8: memref<128x128xf32, #tpu.memory_space<vmem>>, %arg9: memref<128x128xf32, #tpu.memory_space<vmem>>, %arg10: memref<128x128xf32, #tpu.memory_space<vmem>>) attributes {dimension_semantics = [#tpu.dimension_semantics<parallel>, #tpu.dimension_semantics<arbitrary>], iteration_bounds = array<i64: 2, 1>, scalar_prefetch = 0 : i64, scratch_operands = 2 : i64, tpu.core_type = #tpu.core_type<tc>, window_params = [{transform_indices = @transform_0, window_bounds = array<i64: 128, 128>}, {pipeline_mode = #tpu.pipeline_mode<synchronous>, transform_indices = @transform_1, window_bounds = array<i64: 128, 128>}, {pipeline_mode = #tpu.pipeline_mode<synchronous>, transform_indices = @transform_2, window_bounds = array<i64: 2, 128>}, {transform_indices = @transform_3, window_bounds = array<i64: 128, 256>}, {transform_indices = @transform_4, window_bounds = array<i64: 128, 256>}, {transform_indices = @transform_5, window_bounds = array<i64: 256, 128>}, {transform_indices = @transform_6, window_bounds = array<i64: 128, 128>}]} {
    %c0_i32 = arith.constant 0 : i32
    %0 = arith.cmpi eq, %arg1, %c0_i32 : i32
    %1 = arith.extui %0 : i1 to i32
    %c0_i32_0 = arith.constant 0 : i32
    %2 = arith.cmpi ne, %1, %c0_i32_0 : i32
    scf.if %2 {
      %c0_17 = arith.constant 0 : index
      %c0_18 = arith.constant 0 : index
      %23 = vector.load %arg2[%c0_17, %c0_18] : memref<128x128xf32, #tpu.memory_space<vmem>>, vector<128x128xf32>
      %c0_19 = arith.constant 0 : index
      %c0_20 = arith.constant 0 : index
      %24 = vector.load %arg3[%c0_19, %c0_20] : memref<128x128xf32, #tpu.memory_space<vmem>>, vector<128x128xf32>
      %cst_21 = arith.constant dense<0.000000e+00> : vector<128x128xf32>
      %25 = tpu.matmul %23, %24, %cst_21 {dimension_numbers = #tpu.dot_dimension_numbers<[1], [0], [0], [1], [0, 0, 1, 1], [], []>} : vector<128x128xf32>, vector<128x128xf32>, vector<128x128xf32> -> vector<128x128xf32>
      %cst_22 = arith.constant dense<0.000000e+00> : vector<128xf32>
      %26 = vector.multi_reduction <add>, %25, %cst_22 [1] : vector<128x128xf32> to vector<128xf32>
      %27 = vector.shape_cast %26 : vector<128xf32> to vector<128x1xf32>
      %cst_23 = arith.constant 1.280000e+02 : f32
      %28 = vector.broadcast %cst_23 : f32 to vector<128x1xf32>
      %29 = arith.divf %27, %28 : vector<128x1xf32>
      %30 = vector.broadcast %29 : vector<128x1xf32> to vector<128x128xf32>
      %31 = arith.subf %25, %30 : vector<128x128xf32>
      %32 = arith.mulf %31, %31 : vector<128x128xf32>
      %cst_24 = arith.constant dense<0.000000e+00> : vector<128xf32>
      %33 = vector.multi_reduction <add>, %32, %cst_24 [1] : vector<128x128xf32> to vector<128xf32>
      %34 = vector.shape_cast %33 : vector<128xf32> to vector<128x1xf32>
      %cst_25 = arith.constant 1.280000e+02 : f32
      %35 = vector.broadcast %cst_25 : f32 to vector<128x1xf32>
      %36 = arith.divf %34, %35 : vector<128x1xf32>
      %cst_26 = arith.constant 9.99999974E-6 : f32
      %37 = vector.broadcast %cst_26 : f32 to vector<128x1xf32>
      %38 = arith.addf %36, %37 : vector<128x1xf32>
      %39 = math.rsqrt %38 : vector<128x1xf32>
      %40 = vector.broadcast %39 : vector<128x1xf32> to vector<128x128xf32>
      %41 = arith.mulf %31, %40 : vector<128x128xf32>
      %c0_27 = arith.constant 0 : index
      %c0_28 = arith.constant 0 : index
      %42 = vector.load %arg4[%c0_27, %c0_28] : memref<2x128xf32, #tpu.memory_space<vmem>>, vector<1x128xf32>
      %43 = vector.broadcast %42 : vector<1x128xf32> to vector<128x128xf32>
      %44 = arith.mulf %41, %43 : vector<128x128xf32>
      %c1 = arith.constant 1 : index
      %c0_29 = arith.constant 0 : index
      %45 = vector.load %arg4[%c1, %c0_29] : memref<2x128xf32, #tpu.memory_space<vmem>>, vector<1x128xf32>
      %46 = vector.broadcast %45 : vector<1x128xf32> to vector<128x128xf32>
      %47 = arith.addf %44, %46 : vector<128x128xf32>
      %cst_30 = arith.constant 5.000000e-01 : f32
      %48 = vector.broadcast %cst_30 : f32 to vector<128x128xf32>
      %49 = arith.mulf %48, %47 : vector<128x128xf32>
      %cst_31 = arith.constant 0.707106769 : f32
      %50 = vector.broadcast %cst_31 : f32 to vector<128x128xf32>
      %51 = arith.mulf %47, %50 : vector<128x128xf32>
      %52 = math.erf %51 : vector<128x128xf32>
      %cst_32 = arith.constant 1.000000e+00 : f32
      %53 = vector.broadcast %cst_32 : f32 to vector<128x128xf32>
      %54 = arith.addf %53, %52 : vector<128x128xf32>
      %55 = arith.mulf %49, %54 : vector<128x128xf32>
      %c0_33 = arith.constant 0 : index
      %c0_34 = arith.constant 0 : index
      %56 = vector.load %arg9[%c0_33, %c0_34] : memref<128x128xf32, #tpu.memory_space<vmem>>, vector<128x128xf32>
      tpu.vector_store %arg9[%c0_33, %c0_34], %55 {strides = array<i32>} : memref<128x128xf32, #tpu.memory_space<vmem>>, vector<128x128xf32>,
      %cst_35 = arith.constant 0.000000e+00 : f32
      %57 = vector.broadcast %cst_35 : f32 to vector<128x128xf32>
      %c0_36 = arith.constant 0 : index
      %c0_37 = arith.constant 0 : index
      %58 = vector.load %arg10[%c0_36, %c0_37] : memref<128x128xf32, #tpu.memory_space<vmem>>, vector<128x128xf32>
      tpu.vector_store %arg10[%c0_36, %c0_37], %57 {strides = array<i32>} : memref<128x128xf32, #tpu.memory_space<vmem>>, vector<128x128xf32>,
    } else {
    }
    %c0 = arith.constant 0 : index
    %c0_1 = arith.constant 0 : index
    %3 = vector.load %arg9[%c0, %c0_1] : memref<128x128xf32, #tpu.memory_space<vmem>>, vector<128x128xf32>
    %c0_2 = arith.constant 0 : index
    %c0_3 = arith.constant 0 : index
    %4 = vector.load %arg5[%c0_2, %c0_3] : memref<128x256xf32, #tpu.memory_space<vmem>>, vector<128x256xf32>
    %cst = arith.constant dense<0.000000e+00> : vector<128x256xf32>
    %5 = tpu.matmul %3, %4, %cst {dimension_numbers = #tpu.dot_dimension_numbers<[1], [0], [0], [1], [0, 0, 1, 1], [], []>} : vector<128x128xf32>, vector<128x256xf32>, vector<128x256xf32> -> vector<128x256xf32>
    %c0_4 = arith.constant 0 : index
    %c0_5 = arith.constant 0 : index
    %6 = vector.load %arg6[%c0_4, %c0_5] : memref<128x256xf32, #tpu.memory_space<vmem>>, vector<128x256xf32>
    %cst_6 = arith.constant dense<0.000000e+00> : vector<128x256xf32>
    %7 = tpu.matmul %3, %6, %cst_6 {dimension_numbers = #tpu.dot_dimension_numbers<[1], [0], [0], [1], [0, 0, 1, 1], [], []>} : vector<128x128xf32>, vector<128x256xf32>, vector<128x256xf32> -> vector<128x256xf32>
    %8 = arith.negf %5 : vector<128x256xf32>
    %9 = math.exp %8 : vector<128x256xf32>
    %cst_7 = arith.constant 1.000000e+00 : f32
    %10 = vector.broadcast %cst_7 : f32 to vector<128x256xf32>
    %11 = arith.addf %10, %9 : vector<128x256xf32>
    %12 = arith.divf %10, %11 : vector<128x256xf32>
    %13 = arith.mulf %5, %12 : vector<128x256xf32>
    %14 = arith.mulf %13, %7 : vector<128x256xf32>
    %c0_8 = arith.constant 0 : index
    %c0_9 = arith.constant 0 : index
    %15 = vector.load %arg10[%c0_8, %c0_9] : memref<128x128xf32, #tpu.memory_space<vmem>>, vector<128x128xf32>
    %c0_10 = arith.constant 0 : index
    %c0_11 = arith.constant 0 : index
    %16 = vector.load %arg7[%c0_10, %c0_11] : memref<256x128xf32, #tpu.memory_space<vmem>>, vector<256x128xf32>
    %cst_12 = arith.constant dense<0.000000e+00> : vector<128x128xf32>
    %17 = tpu.matmul %14, %16, %cst_12 {dimension_numbers = #tpu.dot_dimension_numbers<[1], [0], [0], [1], [0, 0, 1, 1], [], []>} : vector<128x256xf32>, vector<256x128xf32>, vector<128x128xf32> -> vector<128x128xf32>
    %18 = arith.addf %15, %17 : vector<128x128xf32>
    %c0_13 = arith.constant 0 : index
    %c0_14 = arith.constant 0 : index
    %19 = vector.load %arg10[%c0_13, %c0_14] : memref<128x128xf32, #tpu.memory_space<vmem>>, vector<128x128xf32>
    tpu.vector_store %arg10[%c0_13, %c0_14], %18 {strides = array<i32>} : memref<128x128xf32, #tpu.memory_space<vmem>>, vector<128x128xf32>,
    %c0_i32_15 = arith.constant 0 : i32
    %20 = arith.cmpi eq, %arg1, %c0_i32_15 : i32
    %21 = arith.extui %20 : i1 to i32
    %c0_i32_16 = arith.constant 0 : i32
    %22 = arith.cmpi ne, %21, %c0_i32_16 : i32
    scf.if %22 {
      %c0_17 = arith.constant 0 : index
      %c0_18 = arith.constant 0 : index
      %23 = vector.load %arg10[%c0_17, %c0_18] : memref<128x128xf32, #tpu.memory_space<vmem>>, vector<128x128xf32>
      %c0_19 = arith.constant 0 : index
      %c0_20 = arith.constant 0 : index
      %24 = vector.load %arg8[%c0_19, %c0_20] : memref<128x128xf32, #tpu.memory_space<vmem>>, vector<128x128xf32>
      tpu.vector_store %arg8[%c0_19, %c0_20], %23 {strides = array<i32>} : memref<128x128xf32, #tpu.memory_space<vmem>>, vector<128x128xf32>,
    } else {
    }
    return
  }
  func.func @transform_0(%arg0: i32, %arg1: i32) -> (i32, i32) {
    %c0_i32 = arith.constant 0 : i32
    %c0_i32_0 = arith.constant 0 : i32
    return %arg0, %c0_i32 : i32, i32
  }
  func.func @transform_1(%arg0: i32, %arg1: i32) -> (i32, i32) {
    %c0_i32 = arith.constant 0 : i32
    %c0_i32_0 = arith.constant 0 : i32
    %c0_i32_1 = arith.constant 0 : i32
    return %c0_i32, %c0_i32_0 : i32, i32
  }
  func.func @transform_2(%arg0: i32, %arg1: i32) -> (i32, i32) {
    %c0_i32 = arith.constant 0 : i32
    %c0_i32_0 = arith.constant 0 : i32
    %c0_i32_1 = arith.constant 0 : i32
    return %c0_i32, %c0_i32_0 : i32, i32
  }
  func.func @transform_3(%arg0: i32, %arg1: i32) -> (i32, i32) {
    %c0_i32 = arith.constant 0 : i32
    %c0_i32_0 = arith.constant 0 : i32
    return %c0_i32, %arg1 : i32, i32
  }
  func.func @transform_4(%arg0: i32, %arg1: i32) -> (i32, i32) {
    %c1_i32 = arith.constant 1 : i32
    %0 = arith.addi %c1_i32, %arg1 : i32
    %c0_i32 = arith.constant 0 : i32
    %c0_i32_0 = arith.constant 0 : i32
    return %c0_i32, %0 : i32, i32
  }
  func.func @transform_5(%arg0: i32, %arg1: i32) -> (i32, i32) {
    %c0_i32 = arith.constant 0 : i32
    %c0_i32_0 = arith.constant 0 : i32
    return %arg1, %c0_i32 : i32, i32
  }
  func.func @transform_6(%arg0: i32, %arg1: i32) -> (i32, i32) {
    %c0_i32 = arith.constant 0 : i32
    %c0_i32_0 = arith.constant 0 : i32
    return %arg0, %c0_i32 : i32, i32
  }
}

</mosaic_0001>

<bundles_post_ra>
// kernel: tpu_custom_call.1
= control target key start
LH: loop header
LB: loop body
LE: loop exit
PB: predicated region body
PF: predicated region fallthrough
CT: control target
= control target key end

     0   :  { %s3460_s0 = inlined_call_operand.hbm [shape: f32[256,128], index: 0, kind: input, shape index: {}]   ;;  %s3461_s1 = inlined_call_operand.hbm [shape: f32[128,128], index: 1, kind: input, shape index: {}]   ;;  %s3462_s2 = inlined_call_operand.vmem [shape: f32[2,128], index: 2, kind: input, shape index: {}]   ;;  %s3463_s3 = inlined_call_operand.hbm [shape: f32[128,512], index: 3, kind: input, shape index: {}]   ;;  %s3464_s4 = inlined_call_operand.hbm [shape: f32[128,512], index: 4, kind: input, shape index: {}]   ;;  %s3465_s5 = inlined_call_operand.hbm [shape: f32[256,128], index: 5, kind: input, shape index: {}]   ;;  %s3466_s6 = inlined_call_operand.hbm [shape: f32[256,128], index: 6, kind: output, shape index: {}]  }
   0x1   :  { %3472 = sst [smem:[#allocation18_spill]] %s3461_s1 }
   0x2   :  { %3473 = sst [smem:[#allocation19_spill]] %s3463_s3 }
   0x3   :  { %3474 = sst [smem:[#allocation20_spill]] %s3464_s4 }
   0x4   :  { %11 = vsyncpa [#allocation5], 0 }
   0x5   :  { %13 = vsyncpa [#allocation5 + $0x1], 0 }
   0x6   :  { %14 = vsyncpa [#allocation8], 0 }
   0x7   :  { %15 = vsyncpa [#allocation11], 0 }
   0x8   :  { %16 = vsyncpa [#allocation6], 0 }
   0x9   :  { %18 = vsyncpa [#allocation6 + $0x1], 0  ;;  %s2779_s21 = smov 0   ;;  %s2781_s22 = smov 0  }
   0xa   :  { %s2783_s23 = smov 0   ;;  %s2785_s24 = smov 0  }
   0xb   :  { %s2787_s25 = smov 0   ;;  %s2789_s26 = smov 0  }
   0xc LB: > { %s1943_s27 = sadd.s32 4294967295, %s2728_s26   ;;  %s1944_s28 = sadd.s32 4294967294, %s2728_s26   ;;  %s2728_s26 = sphi %s2789_s26, %s24_s26   ;;  %s2724_s25 = sphi %s2787_s25, %s3495_s25   ;;  %s2720_s24 = sphi %s2785_s24, %s3494_s24   ;;  %s2716_s23 = sphi %s2783_s23, %s3493_s23   ;;  %s2712_s22 = sphi %s2781_s22, %s3492_s22   ;;  %s2708_s21 = sphi %s2779_s21, %s3491_s21  }
   0xd   : > { %p56_p0 = scmp.ne.s32.totalorder %s2712_s22, %s2708_s21  ;;  %p2813_p1 = scmp.eq.s32.totalorder %s1943_s27, 0 }
   0xe   : > { %p2817_p2 = scmp.eq.s32.totalorder %s1943_s27, 1  ;;  %p208_p3 = scmp.eq.s32.totalorder %s1944_s28, 1 }
   0xf   : > { %s3475_s29 = scalar_select %p2813_p1, 1, 0 }
  0x10   : > { %p2823_p4 = por %p2813_p1, %p56_p0  ;;  %p1945_p5 = scmp.ge.s32.totalorder %s2728_s26, 1 }
  0x11   : > { %p2828_p6 = por %p208_p3, %p56_p0  ;;  %p215_p7 = scmp.lt.s32.totalorder %s2728_s26, 3 }
  0x12   : > { %s2730_s10 = smov [#allocation7]   ;;  %s3481_s4 = sld [smem:[#allocation20_spill]] }
  0x13   : > { %s3478_s8 = scalar_select %p2828_p6, 1, 0 }
  0x14   : > { %p2833_p8 = pnand %p1945_p5, %p215_p7  ;;  %s227_s11 = sshll.u32 %s2730_s10, 4  ;;  %s228_s11 = int_to_ptr.vmem [resolvable:$true] %s227_s11 }
  0x15   : > { %s2516_s16 = scalar_lea.vmem %s228_s11, 2048  ;;  %p2524_p5 = scmp.lt.s32.totalorder %s228_s11, %s228_s11 }
  0x16   : > { %p2222_p9 = pneg %p2833_p8  ;;  %p2517_p13 = scmp.ne.s32.totalorder %s228_s11, %s2516_s16 }
  0x17   : > { %p2525_p7 = scmp.lt.s32.totalorder %s2516_s16, %s2516_s16 }
  0x18   : > { %p2842_p11 = pnand %p2222_p9, %p2813_p1  ;;  %s1850_s15 = scalar_lea.hbm %s3481_s4, 256 }
  0x19   : > { %p2526_p9 = por %p2525_p7, %p2524_p5 }
  0x1a   : > { %p2507_p12 = pneg %p2842_p11 }
  0x1c   : > { %p2519_p0 = pnand %p2517_p13, %p2507_p12 }
  0x1e   : > { %p2520_p3 = pneg %p2519_p0 }
  0x20   : > { %p2527_p10 = pnand %p2526_p9, %p2520_p3 }
  0x22   : > { %2530 = shalt.err (!%p2527_p10)
}
  0x23   : > { %s3467_s17 = smov 128   ;;  %s3471_s18 = smov 8  }
  0x24   : > { %s3482_s1 = sld [smem:[#allocation18_spill]]  ;;  %s2733_s27 = smov [#allocation10]  }
  0x25   : > { %s263_s28 = sshll.u32 %s2733_s27, 4  ;;  %s2734_s10 = smov [#allocation9]   ;;  %s264_s28 = int_to_ptr.vmem [resolvable:$true] %s263_s28 }
  0x26   : > { %s246_s13 = sshll.u32 %s2734_s10, 4  ;;  %s2544_s14 = scalar_lea.vmem %s264_s28, 4096  ;;  %s247_s13 = int_to_ptr.vmem [resolvable:$true] %s246_s13 }
  0x27   : > { %p2545_p13 = scmp.ne.s32.totalorder %s264_s28, %s2544_s14  ;;  %p2552_p3 = scmp.lt.s32.totalorder %s264_s28, %s264_s28 }
  0x28   : > { %p2553_p5 = scmp.lt.s32.totalorder %s2544_s14, %s2544_s14 }
  0x29   : > { %p2547_p10 = pnand %p2545_p13, %p2507_p12 }
  0x2a   : > { %2225 = dma.hbm_to_vmem [thread:$0]  (!%p2842_p11), %s3482_s1, 2048, %s228_s11, [#allocation8], %s3467_s17, %s3467_s17, %s3471_s18  }
  0x2b   : > { %p2548_p0 = pneg %p2547_p10  ;;  %p2554_p7 = por %p2553_p5, %p2552_p3 }
  0x2d   : > { %p2555_p9 = pnand %p2554_p7, %p2548_p0 }
  0x2f   : > { %2558 = shalt.err (!%p2555_p9)
}
  0x30   : > { %s2735_s16 = smov 512   ;;  %s2736_s11 = smov 256  }
  0x31   : > { %s2737_s19 = smov 16   ;;  %s2571_s10 = scalar_lea.vmem %s247_s13, 4096 }
  0x32   : > { %2231 = dma.hbm_to_vmem [thread:$0]  (!%p2842_p11), %s1850_s15, 4096, %s264_s28, [#allocation11], %s2735_s16, %s2736_s11, %s2737_s19  }
  0x33   : > { %p2572_p13 = scmp.ne.s32.totalorder %s247_s13, %s2571_s10  ;;  %p2579_p0 = scmp.lt.s32.totalorder %s247_s13, %s247_s13 }
  0x34   : > { %p2580_p5 = scmp.lt.s32.totalorder %s2571_s10, %s2571_s10 }
  0x35   : > { %p2574_p10 = pnand %p2572_p13, %p2507_p12 }
  0x36   : > { %p2581_p7 = por %p2580_p5, %p2579_p0 }
  0x37   : > { %p2575_p3 = pneg %p2574_p10 }
  0x39   : > { %p2582_p9 = pnand %p2581_p7, %p2575_p3 }
  0x3b   : > { %2585 = shalt.err (!%p2582_p9)
}
  0x3c   : > { %s3483_s3 = sld [smem:[#allocation19_spill]]  ;;  %s2738_s15 = smov [#allocation12]  }
  0x3d   : > { %s279_s28 = sshll.u32 %s2738_s15, 4  ;;  %s280_s28 = int_to_ptr.vmem [resolvable:$true] %s279_s28 }
  0x3e   : > { %s2597_s20 = scalar_lea.vmem %s280_s28, 4096  ;;  %p2605_p1 = scmp.lt.s32.totalorder %s280_s28, %s280_s28 }
  0x3f   : > { %p2598_p6 = scmp.ne.s32.totalorder %s280_s28, %s2597_s20  ;;  %p2606_p0 = scmp.lt.s32.totalorder %s2597_s20, %s2597_s20 }
  0x41   : > { %p2600_p13 = pnand %p2598_p6, %p2507_p12  ;;  %p2607_p3 = por %p2606_p0, %p2605_p1 }
  0x42   : > { %2228 = dma.hbm_to_vmem [thread:$0]  (!%p2842_p11), %s3483_s3, 4096, %s247_s13, [#allocation8], %s2735_s16, %s2736_s11, %s2737_s19  }
  0x43   : > { %p2601_p10 = pneg %p2600_p13 }
  0x45   : > { %p2608_p5 = pnand %p2607_p3, %p2601_p10 }
  0x47   : > { %2611 = shalt.err (!%p2608_p5)
}
  0x48   : > { %s3484_s17 = smov 128   ;;  %s36_s11 = sadd.s32 1, %s2724_s25 }
  0x49   : > { %2234 = dma.hbm_to_vmem [thread:$0]  (!%p2842_p11), %s3465_s5, 4096, %s280_s28, [#allocation11], %s3484_s17, %s3484_s17, %s3471_s18  }
  0x4a   : > { %s43_s12 = sadd.s32 1, %s2716_s23  ;;  %p38_p1 = scmp.ge.s32.totalorder %s36_s11, 2 }
  0x4b   : > { %p50_p6 = scmp.ne.s32.totalorder %s2716_s23, %s2712_s22  ;;  %p51_p12 = scmp.eq.s32.totalorder %s2728_s26, 0 }
  0x4c   : > { %p2247_p7 = scmp.lt.s32.totalorder %s2728_s26, 2  ;;  %s3497_s11 = smov (%p38_p1, %s36_s11), 0 }
  0x4d   : > { %p52_p9 = por %p51_p12, %p50_p6  ;;  %p2900_p13 = por %p2817_p2, %p50_p6 }
  0x4e   : > { %s40_s27 = ssub.s32 %s2724_s25, %s3497_s11  ;;  %s293_s10 = sand.u32 1, %s2716_s23  }
  0x4f   : > { %p41_p10 = scmp.eq.s32.totalorder %s40_s27, 0  ;;  %s1951_s14 = sshll.u32 %s293_s10, 7 }
  0x50   : > { %s2000_s15 = sshll.u32 %s2724_s25, 11  ;;  %s297_s18 = scalar_lea.vmem [#allocation4], %s1951_s14 }
  0x51   : > { %s2909_s28 = scalar_select %p41_p10, %s2716_s23, %s43_s12  }
  0x52   : > { %s303_s16 = scalar_lea.hbm %s3460_s0, %s2000_s15  ;;  %s304_s1 = sshll.u32 %s297_s18, 4  ;;  %s305_s1 = int_to_ptr.vmem [resolvable:$true] %s304_s1 }
  0x53   : > { %p2916_p11 = pnand %p2247_p7, %p52_p9  ;;  %s294_s3 = scalar_lea.sflag [#allocation5], %s293_s10 }
  0x54   : > { %s2625_s27 = scalar_lea.vmem %s305_s1, 2048  ;;  %s2739_s12 = smov [#allocation4]  }
  0x55   : > { %p2614_p2 = pneg %p2916_p11  ;;  %p2626_p0 = scmp.ne.s32.totalorder %s305_s1, %s2625_s27 }
  0x56   : > { %s2630_s4 = sshll.u32 %s2739_s12, 4  ;;  %s2631_s4 = int_to_ptr.vmem [resolvable:$false] %s2630_s4 }
  0x57   : > { %p2628_p3 = pnand %p2626_p0, %p2614_p2  ;;  %s2632_s15 = scalar_lea.vmem %s2631_s4, 4096 }
  0x58   : > { %p2633_p1 = scmp.lt.s32.totalorder %s305_s1, %s2631_s4  ;;  %p2634_p6 = scmp.lt.s32.totalorder %s2632_s15, %s2625_s27 }
  0x59   : > { %p2629_p5 = pneg %p2628_p3 }
  0x5a   : > { %p2635_p12 = por %p2634_p6, %p2633_p1 }
  0x5c   : > { %p2636_p7 = pnand %p2635_p12, %p2629_p5 }
  0x5e   : > { %2639 = shalt.err (!%p2636_p7)
}
  0x5f   : > { %s3487_s18 = smov 8   ;;  %316 = sbr.rel (%p2833_p8) target bundleno = 1164 (0x48c), region = 44 }
  0x60   : > { %2238 = dma.hbm_to_vmem [thread:$0]  (!%p2916_p11), %s303_s16, 2048, %s305_s1, %s294_s3, %s3484_s17, %s3484_s17, %s3487_s18  }
  0x61   : > { %s2930_s10 = sand.u32 (!%p2833_p8), 1, %s2712_s22  }
  0x62   : > { %s1955_s4 = sshll.u32 (!%p2833_p8), %s2930_s10, 7  ;;  %s319_s14 = scalar_lea.sflag (!%p2833_p8), [#allocation5], %s2930_s10 }
  0x63   : > { %s2936_s20 = scalar_lea.vmem (!%p2833_p8), [#allocation4], %s1955_s4 }
  0x64   : > { %2691 = dma.done.wait (%p2823_p4), %s319_s14, 2048  }
  0x65   : > { %2693 = vsyncadd (%p2823_p4), %s319_s14, 4294965248  ;;  %p3488_p9 = scmp.ne.s32.totalorder %s3475_s29, 0 }
  0x67   : > { %2695 = dma.done.wait (%p3488_p9), [#allocation8], 6144  }
  0x68   : > { %2697 = vsyncadd (%p3488_p9), [#allocation8], 4294961152 }
  0x69   : > { %2699 = dma.done.wait (%p3488_p9), [#allocation11], 8192  }
  0x6a   : > { %2701 = vsyncadd (%p3488_p9), [#allocation11], 4294959104  ;;  %v408_v0 = vld [vmem:[#allocation7 + $0x78] sm:$0xff]  ;;  %v407_v1 = vld [vmem:[#allocation7 + $0x70] sm:$0xff]  ;;  %s3387_s9 = scalar_lea.vmem [#allocation13], %s1955_s4  ;;  %s2001_s17 = sshll.u32 %s2720_s24, 11 }
  0x6b   : > { %2114 = vmatprep.subr.mxu0 %v408_v0  ;;  %v406_v2 = vld [vmem:[#allocation7 + $0x68] sm:$0xff]  ;;  %v405_v3 = vld [vmem:[#allocation7 + $0x60] sm:$0xff]  ;;  %v404_v5 = vld [vmem:[#allocation7 + $0x58] sm:$0xff]  ;;  %s1817_s13 = sshll.u32 %s3387_s9, 4  ;;  %s3409_s27 = scalar_lea.hbm %s3466_s6, %s2001_s17  ;;  %s3411_s13 = int_to_ptr.vmem [resolvable:$true] %s1817_s13 }
  0x6c   : > { %2115 = vmatpush3.msra.mxu0 %v408_v0  ;;  %v377_v4 = vld [vmem:[%s2936_s20] sm:$0xff]  ;;  %v403_v6 = vld [vmem:[#allocation7 + $0x50] sm:$0xff]  ;;  %v402_v7 = vld [vmem:[#allocation7 + $0x48] sm:$0xff]  ;;  %s1804_s12 = scalar_lea.sflag [#allocation6], %s2930_s10  ;;  %s2640_s15 = scalar_lea.vmem %s3411_s13, 2048 }
  0x6d   : > { %2116 = vmatprep.subr.mxu0 %v407_v1  ;;  %2146 = vmatprep.mubr.f32.mxu0 %v377_v4  ;;  %v401_v8 = vld [vmem:[#allocation7 + $0x40] sm:$0xff]  ;;  %v400_v9 = vld [vmem:[#allocation7 + $0x38] sm:$0xff]  ;;  %v399_v10 = vld [vmem:[#allocation7 + $0x30] sm:$0xff]  ;;  %p2641_p4 = scmp.ne.s32.totalorder %s3411_s13, %s2640_s15  ;;  %s2741_s24 = smov [#allocation13]  }
  0x6e   : > { %2117 = vmatpush3.msra.mxu0 %v407_v1  ;;  %v398_v11 = vld [vmem:[#allocation7 + $0x28] sm:$0xff]  ;;  %v397_v12 = vld [vmem:[#allocation7 + $0x20] sm:$0xff]  ;;  %v396_v13 = vld [vmem:[#allocation7 + $0x18] sm:$0xff]  ;;  %s2644_s18 = sshll.u32 %s2741_s24, 4  ;;  %s2645_s18 = int_to_ptr.vmem [resolvable:$false] %s2644_s18 }
  0x6f   : > { %2118 = vmatprep.subr.mxu0 %v406_v2  ;;  %v395_v14 = vld [vmem:[#allocation7 + $0x10] sm:$0xff]  ;;  %v394_v15 = vld [vmem:[#allocation7 + $0x8] sm:$0xff]  ;;  %v393_v16 = vld [vmem:[#allocation7] sm:$0xff]  ;;  %p2642_p8 = pnand %p2641_p4, %p2900_p13  ;;  %s2646_s4 = scalar_lea.vmem %s2645_s18, 4096 }
  0x70   : > { %2119 = vmatpush3.msra.mxu0 %v406_v2  ;;  %v378_v17 = vld [vmem:[%s2936_s20 + $0x8] sm:$0xff]  ;;  %v379_v18 = vld [vmem:[%s2936_s20 + $0x10] sm:$0xff]  ;;  %v380_v19 = vld [vmem:[%s2936_s20 + $0x18] sm:$0xff]  ;;  %p2647_p11 = scmp.lt.s32.totalorder %s3411_s13, %s2645_s18  ;;  %p2648_p2 = scmp.lt.s32.totalorder %s2646_s4, %s2640_s15 }
  0x71   : > { %2120 = vmatprep.subr.mxu0 %v405_v3  ;;  %v381_v20 = vld [vmem:[%s2936_s20 + $0x20] sm:$0xff]  ;;  %v382_v21 = vld [vmem:[%s2936_s20 + $0x28] sm:$0xff]  ;;  %v383_v22 = vld [vmem:[%s2936_s20 + $0x30] sm:$0xff]  ;;  %p2643_p10 = pneg %p2642_p8 }
  0x72   : > { %2121 = vmatpush3.msra.mxu0 %v405_v3  ;;  %v384_v23 = vld [vmem:[%s2936_s20 + $0x38] sm:$0xff]  ;;  %v385_v24 = vld [vmem:[%s2936_s20 + $0x40] sm:$0xff]  ;;  %v386_v25 = vld [vmem:[%s2936_s20 + $0x48] sm:$0xff]  ;;  %p2649_p0 = por %p2648_p2, %p2647_p11 }
  0x73   : > { %2122 = vmatprep.subr.mxu0 %v404_v5  ;;  %v387_v26 = vld [vmem:[%s2936_s20 + $0x50] sm:$0xff]  ;;  %v388_v27 = vld [vmem:[%s2936_s20 + $0x58] sm:$0xff]  ;;  %v389_v28 = vld [vmem:[%s2936_s20 + $0x60] sm:$0xff] }
  0x74   : > { %2123 = vmatpush3.msra.mxu0 %v404_v5  ;;  %v390_v29 = vld [vmem:[%s2936_s20 + $0x68] sm:$0xff]  ;;  %v391_v30 = vld [vmem:[%s2936_s20 + $0x70] sm:$0xff]  ;;  %v392_v31 = vld [vmem:[%s2936_s20 + $0x78] sm:$0xff]  ;;  %p2650_p3 = pnand %p2649_p0, %p2643_p10 }
  0x75   : > { %2124 = vmatprep.subr.mxu0 %v403_v6 }
  0x76   : > { %2125 = vmatpush3.msra.mxu0 %v403_v6 }
  0x77   : > { %2126 = vmatprep.subr.mxu0 %v402_v7 }
  0x78   : > { %2127 = vmatpush3.msra.mxu0 %v402_v7 }
  0x79   : > { %2128 = vmatprep.subr.mxu0 %v401_v8 }
  0x7a   : > { %2129 = vmatpush3.msra.mxu0 %v401_v8 }
  0x7b   : > { %2130 = vmatprep.subr.mxu0 %v400_v9 }
  0x7c   : > { %2131 = vmatpush3.msra.mxu0 %v400_v9 }
  0x7d   : > { %2132 = vmatprep.subr.mxu0 %v399_v10 }
  0x7e   : > { %2133 = vmatpush3.msra.mxu0 %v399_v10 }
  0x7f   : > { %2134 = vmatprep.subr.mxu0 %v398_v11 }
  0x80   : > { %2135 = vmatpush3.msra.mxu0 %v398_v11 }
  0x81   : > { %2136 = vmatprep.subr.mxu0 %v397_v12 }
  0x82   : > { %2137 = vmatpush3.msra.mxu0 %v397_v12 }
  0x83   : > { %2138 = vmatprep.subr.mxu0 %v396_v13 }
  0x84   : > { %2139 = vmatpush3.msra.mxu0 %v396_v13 }
  0x85   : > { %2140 = vmatprep.subr.mxu0 %v395_v14 }
  0x86   : > { %2141 = vmatpush3.msra.mxu0 %v395_v14 }
  0x87   : > { %2142 = vmatprep.subr.mxu0 %v394_v15 }
  0x88   : > { %2143 = vmatpush3.msra.mxu0 %v394_v15 }
  0x89   : > { %2144 = vmatprep.subr.mxu0 %v393_v16 }
  0x8a   : > { %2145 = vmatpush3.msra.mxu0 %v393_v16 }
  0x8b   : > { %2147 = vmatmul.mubr.f32.vlgmr.msra.gmra.mxu0 %v378_v17 }
  0x8c   : > { %2149 = vmatprep.mubr.f32.mxu0 %v379_v18 }
  0x8f   : > { %2150 = vmatmul.mubr.f32.gmra.mxu0 %v380_v19 }
  0x90   : > { %2152 = vmatprep.mubr.f32.mxu0 %v381_v20 }
  0x93   : > { %2153 = vmatmul.mubr.f32.gmra.mxu0 %v382_v21 }
  0x94   : > { %2155 = vmatprep.mubr.f32.mxu0 %v383_v22 }
  0x97   : > { %2156 = vmatmul.mubr.f32.gmra.mxu0 %v384_v23 }
  0x98   : > { %2158 = vmatprep.mubr.f32.mxu0 %v385_v24 }
  0x9b   : > { %2159 = vmatmul.mubr.f32.gmra.mxu0 %v386_v25 }
  0x9c   : > { %2161 = vmatprep.mubr.f32.mxu0 %v387_v26 }
  0x9f   : > { %2162 = vmatmul.mubr.f32.gmra.mxu0 %v388_v27 }
  0xa0   : > { %2164 = vmatprep.mubr.f32.mxu0 %v389_v28 }
  0xa3   : > { %2165 = vmatmul.mubr.f32.gmra.mxu0 %v390_v29 }
  0xa4   : > { %2167 = vmatprep.mubr.f32.mxu0 %v391_v30 }
  0xa7   : > { %2168 = vmatmul.mubr.f32.gmra.mxu0 %v392_v31 }
 0x14b   : > { %v2148_v32 = vpop.f32.mrf.mxu0 }
 0x14d   : > { %v475_v33 = vpop.f32.mrf.mxu0 }
 0x14e   : > { %554 = vadd.xlane.f32.xlu0 %v475_v33 }
 0x14f   : > { %v2151_v34 = vpop.f32.mrf.mxu0 }
 0x151   : > { %v485_v35 = vpop.f32.mrf.mxu0 }
 0x152   : > { %556 = vadd.xlane.f32.xlu0 %v2148_v32  ;;  %558 = vadd.xlane.f32.xlu1 %v485_v35 }
 0x153   : > { %v2154_v36 = vpop.f32.mrf.mxu0 }
 0x155   : > { %v495_v37 = vpop.f32.mrf.mxu0 }
 0x156   : > { %560 = vadd.xlane.f32.xlu1 %v2151_v34  ;;  %562 = vadd.xlane.f32.xlu0 %v495_v37 }
 0x157   : > { %v2157_v38 = vpop.f32.mrf.mxu0 }
 0x159   : > { %v505_v39 = vpop.f32.mrf.mxu0 }
 0x15a   : > { %564 = vadd.xlane.f32.xlu1 %v2154_v36  ;;  %566 = vadd.xlane.f32.xlu0 %v505_v39 }
 0x15b   : > { %v2966_v40 = vpop.f32.mrf.mxu0 }
 0x15d   : > { %v515_v41 = vpop.f32.mrf.mxu0 }
 0x15e   : > { %568 = vadd.xlane.f32.xlu1 %v2157_v38  ;;  %570 = vadd.xlane.f32.xlu0 %v515_v41 }
 0x15f   : > { %v2968_v42 = vpop.f32.mrf.mxu0 }
 0x161   : > { %v525_v43 = vpop.f32.mrf.mxu0 }
 0x162   : > { %572 = vadd.xlane.f32.xlu1 %v2966_v40  ;;  %574 = vadd.xlane.f32.xlu0 %v525_v43 }
 0x163   : > { %v2971_v44 = vpop.f32.mrf.mxu0 }
 0x165   : > { %v2973_v45 = vpop.f32.mrf.mxu0 }
 0x166   : > { %576 = vadd.xlane.f32.xlu1 %v2968_v42  ;;  %578 = vadd.xlane.f32.xlu0 %v2973_v45 }
 0x167   : > { %v2977_v46 = vpop.f32.mrf.mxu0 }
 0x169   : > { %v2979_v47 = vpop.f32.mrf.mxu0 }
 0x16a   : > { %580 = vadd.xlane.f32.xlu1 %v2971_v44  ;;  %582 = vadd.xlane.f32.xlu0 %v2979_v47 }
 0x16e   : > { %584 = vadd.xlane.f32.xlu1 %v2977_v46 }
 0x1d7   : > { %v555_v48 = vpop.xlane.xlu0 %554 }
 0x1d8   : > { %v587_v49 = vmul.f32 0.0078125, %v555_v48 }
 0x1da   : > { %v2984_v50 = vsub.f32 %v475_v33, %v587_v49  ;;  %v930_v49 = vld [vmem:[#allocation9 + $0xe8] sm:$0xff] }
 0x1db   : > { %v557_v51 = vpop.xlane.xlu0 %556  ;;  %v559_v52 = vpop.xlane.xlu1 %558 }
 0x1dc   : > { %v588_v53 = vmul.f32 0.0078125, %v557_v51  ;;  %v589_v54 = vmul.f32 0.0078125, %v559_v52  ;;  %v619_v55 = vmul.f32 %v2984_v50, %v2984_v50  ;;  %v1123_v51 = vld [vmem:[#allocation10 + $0xe8] sm:$0xff] }
 0x1de   : > { %v2988_v56 = vsub.f32 %v2148_v32, %v588_v53  ;;  %v2990_v57 = vsub.f32 %v485_v35, %v589_v54  ;;  %635 = vadd.xlane.f32.xlu0 %v619_v55  ;;  %v929_v53 = vld [vmem:[#allocation9 + $0xe0] sm:$0xff] }
 0x1df   : > { %v561_v58 = vpop.xlane.xlu1 %560  ;;  %v563_v59 = vpop.xlane.xlu0 %562  ;;  %v1122_v54 = vld [vmem:[#allocation10 + $0xe0] sm:$0xff] }
 0x1e0   : > { %v590_v60 = vmul.f32 0.0078125, %v561_v58  ;;  %v591_v61 = vmul.f32 0.0078125, %v563_v59  ;;  %v620_v62 = vmul.f32 %v2988_v56, %v2988_v56  ;;  %v621_v63 = vmul.f32 %v2990_v57, %v2990_v57  ;;  %v1121_v59 = vld [vmem:[#allocation10 + $0xd8] sm:$0xff] }
 0x1e2   : > { %v2996_v0 = vsub.f32 %v2151_v34, %v590_v60  ;;  %v2998_v1 = vsub.f32 %v495_v37, %v591_v61  ;;  %637 = vadd.xlane.f32.xlu1 %v620_v62  ;;  %639 = vadd.xlane.f32.xlu0 %v621_v63  ;;  %v927_v60 = vld [vmem:[#allocation9 + $0xd0] sm:$0xff]  ;;  %v926_v63 = vld [vmem:[#allocation9 + $0xc8] sm:$0xff] }
 0x1e3   : > { %v565_v2 = vpop.xlane.xlu1 %564  ;;  %v567_v3 = vpop.xlane.xlu0 %566  ;;  %v1120_v61 = vld [vmem:[#allocation10 + $0xd0] sm:$0xff] }
 0x1e4   : > { %v592_v4 = vmul.f32 0.0078125, %v565_v2  ;;  %v593_v5 = vmul.f32 0.0078125, %v567_v3  ;;  %v622_v6 = vmul.f32 %v2996_v0, %v2996_v0  ;;  %v623_v7 = vmul.f32 %v2998_v1, %v2998_v1  ;;  %v1119_v2 = vld [vmem:[#allocation10 + $0xc8] sm:$0xff]  ;;  %v925_v3 = vld [vmem:[#allocation9 + $0xc0] sm:$0xff] }
 0x1e6   : > { %v3004_v8 = vsub.f32 %v2154_v36, %v592_v4  ;;  %v3006_v9 = vsub.f32 %v505_v39, %v593_v5  ;;  %641 = vadd.xlane.f32.xlu1 %v622_v6  ;;  %643 = vadd.xlane.f32.xlu0 %v623_v7  ;;  %v1118_v5 = vld [vmem:[#allocation10 + $0xc0] sm:$0xff]  ;;  %v924_v6 = vld [vmem:[#allocation9 + $0xb8] sm:$0xff] }
 0x1e7   : > { %v569_v10 = vpop.xlane.xlu1 %568  ;;  %v571_v11 = vpop.xlane.xlu0 %570  ;;  %v1117_v7 = vld [vmem:[#allocation10 + $0xb8] sm:$0xff] }
 0x1e8   : > { %v594_v12 = vmul.f32 0.0078125, %v569_v10  ;;  %v595_v13 = vmul.f32 0.0078125, %v571_v11  ;;  %v624_v14 = vmul.f32 %v3004_v8, %v3004_v8  ;;  %v625_v15 = vmul.f32 %v3006_v9, %v3006_v9  ;;  %v923_v10 = vld [vmem:[#allocation9 + $0xb0] sm:$0xff]  ;;  %v922_v11 = vld [vmem:[#allocation9 + $0xa8] sm:$0xff] }
 0x1ea   : > { %v3012_v16 = vsub.f32 %v2157_v38, %v594_v12  ;;  %v3014_v17 = vsub.f32 %v515_v41, %v595_v13  ;;  %645 = vadd.xlane.f32.xlu1 %v624_v14  ;;  %647 = vadd.xlane.f32.xlu0 %v625_v15  ;;  %v1125_v41 = vld [vmem:[#allocation10 + $0xf8] sm:$0xff]  ;;  %v1115_v12 = vld [vmem:[#allocation10 + $0xa8] sm:$0xff]  ;;  %v921_v13 = vld [vmem:[#allocation9 + $0xa0] sm:$0xff] }
 0x1eb   : > { %v573_v18 = vpop.xlane.xlu1 %572  ;;  %v575_v19 = vpop.xlane.xlu0 %574  ;;  %1126 = vmatprep.subr.mxu0 %v1125_v41  ;;  %v1114_v14 = vld [vmem:[#allocation10 + $0xa0] sm:$0xff]  ;;  %v920_v15 = vld [vmem:[#allocation9 + $0x98] sm:$0xff]  ;;  %v910_v41 = vld [vmem:[#allocation9 + $0x48] sm:$0xff] }
 0x1ec   : > { %v596_v20 = vmul.f32 0.0078125, %v573_v18  ;;  %v597_v21 = vmul.f32 0.0078125, %v575_v19  ;;  %v626_v22 = vmul.f32 %v3012_v16, %v3012_v16  ;;  %v627_v23 = vmul.f32 %v3014_v17, %v3014_v17  ;;  %v1113_v18 = vld [vmem:[#allocation10 + $0x98] sm:$0xff]  ;;  %v919_v19 = vld [vmem:[#allocation9 + $0x90] sm:$0xff] }
 0x1ee   : > { %v3021_v24 = vsub.f32 %v2966_v40, %v596_v20  ;;  %v3023_v25 = vsub.f32 %v525_v43, %v597_v21  ;;  %649 = vadd.xlane.f32.xlu1 %v626_v22  ;;  %651 = vadd.xlane.f32.xlu0 %v627_v23  ;;  %v932_v40 = vld [vmem:[#allocation9 + $0xf8] sm:$0xff]  ;;  %v1124_v43 = vld [vmem:[#allocation10 + $0xf0] sm:$0xff]  ;;  %v918_v21 = vld [vmem:[#allocation9 + $0x88] sm:$0xff] }
 0x1ef   : > { %v577_v26 = vpop.xlane.xlu1 %576  ;;  %v579_v27 = vpop.xlane.xlu0 %578  ;;  %933 = vmatprep.subr.mxu1 %v932_v40  ;;  %1127 = vmatpush1.msra.mxu0 %v1124_v43  ;;  %v1112_v20 = vld [vmem:[#allocation10 + $0x90] sm:$0xff]  ;;  %v1111_v22 = vld [vmem:[#allocation10 + $0x88] sm:$0xff]  ;;  %v917_v23 = vld [vmem:[#allocation9 + $0x80] sm:$0xff] }
 0x1f0   : > { %v598_v28 = vmul.f32 0.0078125, %v577_v26  ;;  %v599_v29 = vmul.f32 0.0078125, %v579_v27  ;;  %v628_v30 = vmul.f32 %v3021_v24, %v3021_v24  ;;  %v629_v31 = vmul.f32 %v3023_v25, %v3023_v25  ;;  %1128 = vmatprep.subr.mxu0 %v1123_v51  ;;  %v1110_v26 = vld [vmem:[#allocation10 + $0x80] sm:$0xff]  ;;  %v916_v27 = vld [vmem:[#allocation9 + $0x78] sm:$0xff]  ;;  %v1104_v40 = vld [vmem:[#allocation10 + $0x50] sm:$0xff] }
 0x1f1   : > { %1129 = vmatpush1.msra.mxu0 %v1122_v54  ;;  %v909_v43 = vld [vmem:[#allocation9 + $0x40] sm:$0xff]  ;;  %v908_v51 = vld [vmem:[#allocation9 + $0x38] sm:$0xff]  ;;  %v1100_v54 = vld [vmem:[#allocation10 + $0x30] sm:$0xff] }
 0x1f2   : > { %v3030_v32 = vsub.f32 %v2968_v42, %v598_v28  ;;  %v3033_v33 = vsub.f32 %v2973_v45, %v599_v29  ;;  %653 = vadd.xlane.f32.xlu1 %v628_v30  ;;  %655 = vadd.xlane.f32.xlu0 %v629_v31  ;;  %v931_v42 = vld [vmem:[#allocation9 + $0xf0] sm:$0xff]  ;;  %v1109_v28 = vld [vmem:[#allocation10 + $0x78] sm:$0xff]  ;;  %v914_v31 = vld [vmem:[#allocation9 + $0x68] sm:$0xff] }
 0x1f3   : > { %v581_v34 = vpop.xlane.xlu1 %580  ;;  %v583_v35 = vpop.xlane.xlu0 %582  ;;  %934 = vmatpush1.msra.mxu1 %v931_v42  ;;  %1130 = vmatprep.subr.mxu0 %v1121_v59  ;;  %v915_v29 = vld [vmem:[#allocation9 + $0x70] sm:$0xff]  ;;  %v1103_v42 = vld [vmem:[#allocation10 + $0x48] sm:$0xff]  ;;  %v904_v59 = vld [vmem:[#allocation9 + $0x18] sm:$0xff] }
 0x1f4   : > { %v600_v36 = vmul.f32 0.0078125, %v581_v34  ;;  %v601_v37 = vmul.f32 0.0078125, %v583_v35  ;;  %v630_v38 = vmul.f32 %v3030_v32, %v3030_v32  ;;  %v631_v39 = vmul.f32 %v3033_v33, %v3033_v33  ;;  %935 = vmatprep.subr.mxu1 %v930_v49  ;;  %1131 = vmatpush1.msra.mxu0 %v1120_v61  ;;  %v1108_v30 = vld [vmem:[#allocation10 + $0x70] sm:$0xff]  ;;  %v1107_v34 = vld [vmem:[#allocation10 + $0x68] sm:$0xff]  ;;  %v913_v35 = vld [vmem:[#allocation9 + $0x60] sm:$0xff] }
 0x1f5   : > { %936 = vmatpush1.msra.mxu1 %v929_v53  ;;  %1132 = vmatprep.subr.mxu0 %v1119_v2  ;;  %v1102_v49 = vld [vmem:[#allocation10 + $0x40] sm:$0xff]  ;;  %v907_v53 = vld [vmem:[#allocation9 + $0x30] sm:$0xff]  ;;  %v902_v2 = vld [vmem:[#allocation9 + $0x8] sm:$0xff] }
 0x1f6   : > { %v3040_v45 = vsub.f32 %v2971_v44, %v600_v36  ;;  %v3043_v48 = vsub.f32 %v2979_v47, %v601_v37  ;;  %657 = vadd.xlane.f32.xlu1 %v630_v38  ;;  %659 = vadd.xlane.f32.xlu0 %v631_v39  ;;  %v928_v47 = vld [vmem:[#allocation9 + $0xd8] sm:$0xff]  ;;  %v1106_v36 = vld [vmem:[#allocation10 + $0x60] sm:$0xff]  ;;  %v911_v39 = vld [vmem:[#allocation9 + $0x50] sm:$0xff] }
 0x1f7   : > { %v585_v52 = vpop.xlane.xlu1 %584  ;;  %937 = vmatprep.subr.mxu1 %v928_v47  ;;  %1133 = vmatpush1.msra.mxu0 %v1118_v5  ;;  %v912_v37 = vld [vmem:[#allocation9 + $0x58] sm:$0xff]  ;;  %v1098_v47 = vld [vmem:[#allocation10 + $0x20] sm:$0xff]  ;;  %v903_v61 = vld [vmem:[#allocation9 + $0x10] sm:$0xff] }
 0x1f8   : > { %v602_v55 = vmul.f32 0.0078125, %v585_v52  ;;  %v632_v58 = vmul.f32 %v3040_v45, %v3040_v45  ;;  %v633_v44 = vmul.f32 %v3043_v48, %v3043_v48  ;;  %938 = vmatpush1.msra.mxu1 %v927_v60  ;;  %1134 = vmatprep.subr.mxu0 %v1117_v7  ;;  %v1105_v38 = vld [vmem:[#allocation10 + $0x58] sm:$0xff]  ;;  %v1094_v5 = vld [vmem:[#allocation10] sm:$0xff] }
 0x1f9   : > { %939 = vmatprep.subr.mxu1 %v926_v63  ;;  %v1101_v52 = vld [vmem:[#allocation10 + $0x38] sm:$0xff]  ;;  %v1096_v63 = vld [vmem:[#allocation10 + $0x10] sm:$0xff] }
 0x1fa   : > { %v3050_v62 = vsub.f32 %v2977_v46, %v602_v55  ;;  %661 = vadd.xlane.f32.xlu1 %v632_v58  ;;  %663 = vadd.xlane.f32.xlu0 %v633_v44  ;;  %v1116_v46 = vld [vmem:[#allocation10 + $0xb0] sm:$0xff]  ;;  %v906_v55 = vld [vmem:[#allocation9 + $0x28] sm:$0xff]  ;;  %v905_v44 = vld [vmem:[#allocation9 + $0x20] sm:$0xff] }
 0x1fb   : > { %940 = vmatpush1.msra.mxu1 %v925_v3  ;;  %1135 = vmatpush1.msra.mxu0 %v1116_v46  ;;  %v1099_v58 = vld [vmem:[#allocation10 + $0x28] sm:$0xff]  ;;  %v1097_v60 = vld [vmem:[#allocation10 + $0x18] sm:$0xff] }
 0x1fc   : > { %v634_v4 = vmul.f32 %v3050_v62, %v3050_v62  ;;  %941 = vmatprep.subr.mxu1 %v924_v6  ;;  %1136 = vmatprep.subr.mxu0 %v1115_v12  ;;  %v1095_v3 = vld [vmem:[#allocation10 + $0x8] sm:$0xff]  ;;  %v2740_v6 = vmov 0.0   ;;  %v1590_v7 = vld [vmem:[#allocation12 + $0xf8] sm:$0xff] }
 0x1fd   : > { %942 = vmatpush1.msra.mxu1 %v923_v10  ;;  %1137 = vmatpush1.msra.mxu0 %v1114_v14 }
 0x1fe   : > { %665 = vadd.xlane.f32.xlu1 %v634_v4  ;;  %943 = vmatprep.subr.mxu1 %v922_v11  ;;  %v901_v4 = vld [vmem:[#allocation9] sm:$0xff] }
 0x1ff   : > { %944 = vmatpush1.msra.mxu1 %v921_v13  ;;  %1138 = vmatprep.subr.mxu0 %v1113_v18 }
 0x200   : > { %945 = vmatprep.subr.mxu1 %v920_v15  ;;  %1139 = vmatpush1.msra.mxu0 %v1112_v20 }
 0x201   : > { %946 = vmatpush1.msra.mxu1 %v919_v19  ;;  %1140 = vmatprep.subr.mxu0 %v1111_v22 }
 0x202   : > { %947 = vmatprep.subr.mxu1 %v918_v21  ;;  %1141 = vmatpush1.msra.mxu0 %v1110_v26 }
 0x203   : > { %948 = vmatpush1.msra.mxu1 %v917_v23  ;;  %1142 = vmatprep.subr.mxu0 %v1109_v28 }
 0x204   : > { %949 = vmatprep.subr.mxu1 %v916_v27  ;;  %1143 = vmatpush1.msra.mxu0 %v1108_v30 }
 0x205   : > { %950 = vmatpush1.msra.mxu1 %v915_v29  ;;  %1144 = vmatprep.subr.mxu0 %v1107_v34 }
 0x206   : > { %951 = vmatprep.subr.mxu1 %v914_v31  ;;  %1145 = vmatpush1.msra.mxu0 %v1106_v36 }
 0x207   : > { %952 = vmatpush1.msra.mxu1 %v913_v35  ;;  %1146 = vmatprep.subr.mxu0 %v1105_v38 }
 0x208   : > { %953 = vmatprep.subr.mxu1 %v912_v37  ;;  %1147 = vmatpush1.msra.mxu0 %v1104_v40 }
 0x209   : > { %954 = vmatpush1.msra.mxu1 %v911_v39  ;;  %1148 = vmatprep.subr.mxu0 %v1103_v42 }
 0x20a   : > { %955 = vmatprep.subr.mxu1 %v910_v41  ;;  %1149 = vmatpush1.msra.mxu0 %v1102_v49  ;;  %v3059_v41 = vld [vmem:[%s3462_s2] ss:$0 sm:$0xff] }
 0x20b   : > { %956 = vmatpush1.msra.mxu1 %v909_v43  ;;  %1150 = vmatprep.subr.mxu0 %v1101_v52 }
 0x20c   : > { %957 = vmatprep.subr.mxu1 %v908_v51  ;;  %1151 = vmatpush1.msra.mxu0 %v1100_v54 }
 0x20d   : > { %958 = vmatpush1.msra.mxu1 %v907_v53  ;;  %1152 = vmatprep.subr.mxu0 %v1099_v58  ;;  %v3065_v53 = vld [vmem:[%s3462_s2 + $0x1] ss:$0 sm:$0xff] }
 0x20e   : > { %959 = vmatprep.subr.mxu1 %v906_v55  ;;  %1153 = vmatpush1.msra.mxu0 %v1098_v47 }
 0x20f   : > { %960 = vmatpush1.msra.mxu1 %v905_v44  ;;  %1154 = vmatprep.subr.mxu0 %v1097_v60 }
 0x210   : > { %961 = vmatprep.subr.mxu1 %v904_v59  ;;  %1155 = vmatpush1.msra.mxu0 %v1096_v63 }
 0x211   : > { %962 = vmatpush1.msra.mxu1 %v903_v61  ;;  %1156 = vmatprep.subr.mxu0 %v1095_v3 }
 0x212   : > { %963 = vmatprep.subr.mxu1 %v902_v2  ;;  %997 = vmatprep.mubr.f32.mxu1 %v2740_v6 }
 0x213   : > { %964 = vmatpush1.msra.mxu1 %v901_v4  ;;  %1157 = vmatpush1.msra.mxu0 %v1094_v5 }
 0x214   : > { %1190 = vmatprep.mubr.f32.mxu0 %v2740_v6  ;;  %2170 = vmatprep.subr.mxu1 %v1590_v7 }
 0x215   : > { %2034 = vmatprep.subr.mxu0 %v1590_v7 }
 0x267   : > { %v636_v10 = vpop.xlane.xlu0 %635 }
 0x268   : > { %v667_v46 = vmul.f32 0.0078125, %v636_v10 }
 0x26a   : > { %v683_v11 = vadd.f32 1e-05, %v667_v46 }
 0x26b   : > { %v638_v12 = vpop.xlane.xlu1 %637  ;;  %v640_v13 = vpop.xlane.xlu0 %639 }
 0x26c   : > { %2313 = vrsqrt.f32 %v683_v11  ;;  %v668_v14 = vmul.f32 0.0078125, %v638_v12  ;;  %v669_v15 = vmul.f32 0.0078125, %v640_v13 }
 0x26e   : > { %v684_v18 = vadd.f32 1e-05, %v668_v14  ;;  %v685_v19 = vadd.f32 1e-05, %v669_v15 }
 0x26f   : > { %v642_v20 = vpop.xlane.xlu1 %641  ;;  %v644_v21 = vpop.xlane.xlu0 %643 }
 0x270   : > { %2315 = vrsqrt.f32 %v684_v18  ;;  %v670_v22 = vmul.f32 0.0078125, %v642_v20  ;;  %v671_v23 = vmul.f32 0.0078125, %v644_v21 }
 0x271   : > { %2317 = vrsqrt.f32 %v685_v19 }
 0x272   : > { %v686_v26 = vadd.f32 1e-05, %v670_v22  ;;  %v687_v27 = vadd.f32 1e-05, %v671_v23 }
 0x273   : > { %v646_v28 = vpop.xlane.xlu1 %645  ;;  %v648_v29 = vpop.xlane.xlu0 %647 }
 0x274   : > { %2319 = vrsqrt.f32 %v686_v26  ;;  %v672_v30 = vmul.f32 0.0078125, %v646_v28  ;;  %v673_v31 = vmul.f32 0.0078125, %v648_v29 }
 0x275   : > { %2321 = vrsqrt.f32 %v687_v27 }
 0x276   : > { %v688_v34 = vadd.f32 1e-05, %v672_v30  ;;  %v689_v35 = vadd.f32 1e-05, %v673_v31 }
 0x277   : > { %v650_v36 = vpop.xlane.xlu1 %649  ;;  %v652_v37 = vpop.xlane.xlu0 %651 }
 0x278   : > { %2323 = vrsqrt.f32 %v688_v34  ;;  %v674_v38 = vmul.f32 0.0078125, %v650_v36  ;;  %v675_v39 = vmul.f32 0.0078125, %v652_v37 }
 0x279   : > { %v2314_v40 = vpop.eup %2313  ;;  %2325 = vrsqrt.f32 %v689_v35 }
 0x27a   : > { %v690_v42 = vadd.f32 1e-05, %v674_v38  ;;  %v715_v43 = vmul.f32 %v2314_v40, %v2984_v50  ;;  %v691_v49 = vadd.f32 1e-05, %v675_v39 }
 0x27b   : > { %v654_v51 = vpop.xlane.xlu1 %653  ;;  %v656_v52 = vpop.xlane.xlu0 %655 }
 0x27c   : > { %2327 = vrsqrt.f32 %v690_v42  ;;  %v676_v54 = vmul.f32 0.0078125, %v654_v51  ;;  %v736_v55 = vmul.f32 %v3059_v41, %v715_v43  ;;  %v677_v59 = vmul.f32 0.0078125, %v656_v52 }
 0x27d   : > { %v2316_v58 = vpop.eup %2315  ;;  %2329 = vrsqrt.f32 %v691_v49 }
 0x27e   : > { %v2318_v44 = vpop.eup %2317  ;;  %v692_v47 = vadd.f32 1e-05, %v676_v54  ;;  %v757_v60 = vadd.f32 %v3065_v53, %v736_v55  ;;  %v716_v50 = vmul.f32 %v2316_v58, %v2988_v56  ;;  %v693_v46 = vadd.f32 1e-05, %v677_v59 }
 0x27f   : > { %v658_v61 = vpop.xlane.xlu1 %657  ;;  %v717_v63 = vmul.f32 %v2318_v44, %v2990_v57  ;;  %v660_v11 = vpop.xlane.xlu0 %659 }
 0x280   : > { %v678_v3 = vmul.f32 0.0078125, %v658_v61  ;;  %v789_v4 = vmul.f32 0.70710677, %v757_v60  ;;  %v737_v5 = vmul.f32 %v3059_v41, %v716_v50  ;;  %2331 = vrsqrt.f32 %v692_v47 }
 0x281   : > { %v2320_v2 = vpop.eup %2319  ;;  %v738_v7 = vmul.f32 %v3059_v41, %v717_v63  ;;  %v679_v19 = vmul.f32 0.0078125, %v660_v11  ;;  %v773_v44 = vmul.f32 0.5, %v757_v60 }
 0x282   : > { %v2322_v10 = vpop.eup %2321  ;;  %v718_v12 = vmul.f32 %v2320_v2, %v2996_v0  ;;  %2333 = verf.f32 %v789_v4  ;;  %v758_v56 = vadd.f32 %v3065_v53, %v737_v5  ;;  %v694_v18 = vadd.f32 1e-05, %v678_v3 }
 0x283   : > { %v3076_v13 = vadd.f32 %v3065_v53, %v738_v7  ;;  %v719_v57 = vmul.f32 %v2322_v10, %v2998_v1  ;;  %2335 = vrsqrt.f32 %v693_v46  ;;  %v662_v23 = vpop.xlane.xlu1 %661  ;;  %v695_v30 = vadd.f32 1e-05, %v679_v19  ;;  %v664_v36 = vpop.xlane.xlu0 %663  ;;  %v1589_v46 = vld [vmem:[#allocation12 + $0xf0] sm:$0xff] }
 0x284   : > { %v739_v14 = vmul.f32 %v3059_v41, %v718_v12  ;;  %v790_v20 = vmul.f32 0.70710677, %v758_v56  ;;  %v680_v35 = vmul.f32 0.0078125, %v662_v23  ;;  %v681_v40 = vmul.f32 0.0078125, %v664_v36 }
 0x285   : > { %v2324_v15 = vpop.eup %2323  ;;  %v791_v22 = vmul.f32 0.70710677, %v3076_v13  ;;  %v740_v26 = vmul.f32 %v3059_v41, %v719_v57  ;;  %v774_v60 = vmul.f32 0.5, %v758_v56 }
 0x286   : > { %v2326_v21 = vpop.eup %2325  ;;  %v3082_v0 = vadd.f32 %v3065_v53, %v739_v14  ;;  %2337 = verf.f32 %v790_v20  ;;  %v720_v27 = vmul.f32 %v2324_v15, %v3004_v8  ;;  %v696_v42 = vadd.f32 1e-05, %v680_v35  ;;  %v1573_v20 = vld [vmem:[#allocation12 + $0x70] sm:$0xff] }
 0x287   : > { %v721_v1 = vmul.f32 %v2326_v21, %v3006_v9  ;;  %2339 = vrsqrt.f32 %v694_v18  ;;  %v3089_v31 = vadd.f32 %v3065_v53, %v740_v26  ;;  %v666_v43 = vpop.xlane.xlu1 %665  ;;  %v697_v59 = vadd.f32 1e-05, %v681_v40  ;;  %v1588_v21 = vld [vmem:[#allocation12 + $0xe8] sm:$0xff] }
 0x288   : > { %v792_v28 = vmul.f32 0.70710677, %v3082_v0  ;;  %v741_v34 = vmul.f32 %v3059_v41, %v720_v27  ;;  %2341 = verf.f32 %v791_v22  ;;  %v682_v58 = vmul.f32 0.0078125, %v666_v43 }
 0x289   : > { %v2328_v29 = vpop.eup %2327  ;;  %v742_v37 = vmul.f32 %v3059_v41, %v721_v1  ;;  %v793_v8 = vmul.f32 0.70710677, %v3089_v31 }
 0x28a   : > { %v722_v38 = vmul.f32 %v2328_v29, %v3012_v16  ;;  %2343 = verf.f32 %v792_v28  ;;  %v3096_v9 = vadd.f32 %v3065_v53, %v741_v34  ;;  %v2330_v39 = vpop.eup %2329  ;;  %v698_v7 = vadd.f32 1e-05, %v682_v58 }
 0x28b   : > { %2345 = vrsqrt.f32 %v695_v30  ;;  %v3099_v49 = vadd.f32 %v3065_v53, %v742_v37  ;;  %v723_v54 = vmul.f32 %v2330_v39, %v3014_v17  ;;  %v1574_v17 = vld [vmem:[#allocation12 + $0x78] sm:$0xff]  ;;  %v776_v30 = vmul.f32 0.5, %v3082_v0 }
 0x28c   : > { %v743_v51 = vmul.f32 %v3059_v41, %v722_v38  ;;  %2347 = verf.f32 %v793_v8  ;;  %v794_v16 = vmul.f32 0.70710677, %v3096_v9  ;;  %v777_v0 = vmul.f32 0.5, %v3089_v31 }
 0x28d   : > { %v2332_v52 = vpop.eup %2331  ;;  %2349 = vrsqrt.f32 %v696_v42  ;;  %v795_v50 = vmul.f32 0.70710677, %v3099_v49  ;;  %v744_v3 = vmul.f32 %v3059_v41, %v723_v54  ;;  %v778_v31 = vmul.f32 0.5, %v3096_v9 }
 0x28e   : > { %v3106_v61 = vadd.f32 %v3065_v53, %v743_v51  ;;  %2351 = verf.f32 %v794_v16  ;;  %v724_v4 = vmul.f32 %v2332_v52, %v3021_v24  ;;  %v779_v9 = vmul.f32 0.5, %v3099_v49 }
 0x28f   : > { %v2334_v55 = vpop.eup %2333  ;;  %2353 = vrsqrt.f32 %v697_v59  ;;  %v3115_v15 = vadd.f32 %v3065_v53, %v744_v3 }
 0x290   : > { %v821_v47 = vadd.f32 1.0, %v2334_v55  ;;  %v2336_v63 = vpop.eup %2335  ;;  %v796_v12 = vmul.f32 0.70710677, %v3106_v61  ;;  %2355 = verf.f32 %v795_v50  ;;  %v745_v56 = vmul.f32 %v3059_v41, %v724_v4 }
 0x291   : > { %v725_v57 = vmul.f32 %v2336_v63, %v3023_v25  ;;  %2357 = vrsqrt.f32 %v698_v7  ;;  %v775_v25 = vmul.f32 0.5, %v3076_v13  ;;  %v797_v28 = vmul.f32 0.70710677, %v3115_v15 }
 0x292   : > { %v837_v2 = vmul.f32 %v821_v47, %v773_v44  ;;  %2359 = verf.f32 %v796_v12  ;;  %v3125_v29 = vadd.f32 %v3065_v53, %v745_v56  ;;  %v780_v49 = vmul.f32 0.5, %v3106_v61 }
 0x293   : > { %v2338_v5 = vpop.eup %2337  ;;  %v746_v22 = vmul.f32 %v3059_v41, %v725_v57  ;;  %2361 = verf.f32 %v797_v28  ;;  %v781_v57 = vmul.f32 0.5, %v3115_v15 }
 0x294   : > { %998 = vmatmul.mubr.f32.vlgmr.msra.gmra.mxu1 %v837_v2  ;;  %1191 = vmatmul.mubr.f32.vlgmr.msra.gmra.mxu0 %v837_v2  ;;  %v822_v10 = vadd.f32 1.0, %v2338_v5  ;;  %v2340_v11 = vpop.eup %2339  ;;  %v798_v8 = vmul.f32 0.70710677, %v3125_v29 }
 0x295   : > { %1003 = vmatprep.mubr.f32.mxu1 %v2740_v6  ;;  %1196 = vmatprep.mubr.f32.mxu0 %v2740_v6  ;;  %v2342_v14 = vpop.eup %2341  ;;  %v726_v23 = vmul.f32 %v2340_v11, %v3030_v32  ;;  %v3131_v32 = vadd.f32 %v3065_v53, %v746_v22 }
 0x296   : > { %v838_v24 = vmul.f32 %v822_v10, %v774_v60  ;;  %2186 = vmatpush3.msra.mxu1 %v1574_v17  ;;  %2035 = vmatpush3.msra.mxu0 %v1574_v17  ;;  %v823_v19 = vadd.f32 1.0, %v2342_v14  ;;  %2363 = verf.f32 %v798_v8 }
 0x297   : > { %v2344_v18 = vpop.eup %2343  ;;  %2171 = vmatprep.subr.mxu1 %v1589_v46  ;;  %2036 = vmatprep.subr.mxu0 %v1589_v46  ;;  %v747_v34 = vmul.f32 %v3059_v41, %v726_v23  ;;  %v799_v40 = vmul.f32 0.70710677, %v3131_v32 }
 0x298   : > { %1004 = vmatmul.mubr.f32.gmra.mxu1 %v838_v24  ;;  %1197 = vmatmul.mubr.f32.gmra.mxu0 %v838_v24  ;;  %v2346_v26 = vpop.eup %2345  ;;  %v839_v27 = vmul.f32 %v823_v19, %v775_v25  ;;  %v824_v1 = vadd.f32 1.0, %v2344_v18  ;;  %v782_v18 = vmul.f32 0.5, %v3125_v29 }
 0x299   : > { %1009 = vmatprep.mubr.f32.mxu1 %v2740_v6  ;;  %1202 = vmatprep.mubr.f32.mxu0 %v2740_v6  ;;  %v2348_v13 = vpop.eup %2347  ;;  %v727_v35 = vmul.f32 %v2346_v26, %v3033_v33  ;;  %v3141_v42 = vadd.f32 %v3065_v53, %v747_v34  ;;  %2365 = verf.f32 %v799_v40 }
 0x29a   : > { %2187 = vmatpush3.msra.mxu1 %v1573_v20  ;;  %2037 = vmatpush3.msra.mxu0 %v1573_v20  ;;  %v2350_v36 = vpop.eup %2349  ;;  %v840_v37 = vmul.f32 %v824_v1, %v776_v30  ;;  %v825_v38 = vadd.f32 1.0, %v2348_v13 }
 0x29b   : > { %2172 = vmatprep.subr.mxu1 %v1588_v21  ;;  %2038 = vmatprep.subr.mxu0 %v1588_v21  ;;  %v2352_v39 = vpop.eup %2351  ;;  %v748_v33 = vmul.f32 %v3059_v41, %v727_v35  ;;  %v728_v16 = vmul.f32 %v2350_v36, %v3040_v45  ;;  %v800_v58 = vmul.f32 0.70710677, %v3141_v42  ;;  %v783_v21 = vmul.f32 0.5, %v3131_v32 }
 0x29c   : > { %1010 = vmatmul.mubr.f32.gmra.mxu1 %v839_v27  ;;  %1203 = vmatmul.mubr.f32.gmra.mxu0 %v839_v27  ;;  %v2354_v43 = vpop.eup %2353  ;;  %v841_v51 = vmul.f32 %v825_v38, %v777_v0  ;;  %v826_v52 = vadd.f32 1.0, %v2352_v39  ;;  %v784_v26 = vmul.f32 0.5, %v3141_v42  ;;  %v1572_v42 = vld [vmem:[#allocation12 + $0x68] sm:$0xff] }
 0x29d   : > { %1015 = vmatprep.mubr.f32.mxu1 %v2740_v6  ;;  %1208 = vmatprep.mubr.f32.mxu0 %v2740_v6  ;;  %v2356_v54 = vpop.eup %2355  ;;  %v729_v44 = vmul.f32 %v2354_v43, %v3043_v48  ;;  %v3151_v45 = vadd.f32 %v3065_v53, %v748_v33  ;;  %v749_v63 = vmul.f32 %v3059_v41, %v728_v16  ;;  %2367 = verf.f32 %v800_v58  ;;  %v1587_v33 = vld [vmem:[#allocation12 + $0xe0] sm:$0xff]  ;;  %v1585_v16 = vld [vmem:[#allocation12 + $0xd0] sm:$0xff] }
 0x29e   : > { %v2358_v55 = vpop.eup %2357  ;;  %v842_v59 = vmul.f32 %v826_v52, %v778_v31  ;;  %v827_v50 = vadd.f32 1.0, %v2356_v54  ;;  %2188 = vmatpush3.msra.mxu1 %v1572_v42  ;;  %2039 = vmatpush3.msra.mxu0 %v1572_v42  ;;  %v1571_v43 = vld [vmem:[#allocation12 + $0x60] sm:$0xff]  ;;  %v1570_v52 = vld [vmem:[#allocation12 + $0x58] sm:$0xff]  ;;  %v1584_v54 = vld [vmem:[#allocation12 + $0xc8] sm:$0xff] }
 0x29f   : > { %v2360_v47 = vpop.eup %2359  ;;  %v750_v2 = vmul.f32 %v3059_v41, %v729_v44  ;;  %v730_v48 = vmul.f32 %v2358_v55, %v3050_v62  ;;  %v801_v5 = vmul.f32 0.70710677, %v3151_v45  ;;  %v770_v17 = vadd.f32 %v3065_v53, %v749_v63  ;;  %2173 = vmatprep.subr.mxu1 %v1587_v33  ;;  %2040 = vmatprep.subr.mxu0 %v1587_v33  ;;  %v1568_v31 = vld [vmem:[#allocation12 + $0x48] sm:$0xff]  ;;  %v1583_v55 = vld [vmem:[#allocation12 + $0xc0] sm:$0xff]  ;;  %v1582_v44 = vld [vmem:[#allocation12 + $0xb8] sm:$0xff] }
 0x2a0   : > { %1016 = vmatmul.mubr.f32.gmra.mxu1 %v840_v37  ;;  %1209 = vmatmul.mubr.f32.gmra.mxu0 %v840_v37  ;;  %v843_v3 = vmul.f32 %v827_v50, %v779_v9  ;;  %v828_v4 = vadd.f32 1.0, %v2360_v47  ;;  %v2362_v7 = vpop.eup %2361  ;;  %v785_v29 = vmul.f32 0.5, %v3151_v45  ;;  %v1567_v58 = vld [vmem:[#allocation12 + $0x40] sm:$0xff]  ;;  %v1566_v47 = vld [vmem:[#allocation12 + $0x38] sm:$0xff]  ;;  %v1565_v50 = vld [vmem:[#allocation12 + $0x30] sm:$0xff] }
 0x2a1   : > { %1021 = vmatprep.mubr.f32.mxu1 %v2740_v6  ;;  %1214 = vmatprep.mubr.f32.mxu0 %v2740_v6  ;;  %v771_v60 = vadd.f32 %v3065_v53, %v750_v2  ;;  %v751_v10 = vmul.f32 %v3059_v41, %v730_v48  ;;  %v829_v46 = vadd.f32 1.0, %v2362_v7  ;;  %2369 = verf.f32 %v801_v5  ;;  %v1580_v45 = vld [vmem:[#allocation12 + $0xa8] sm:$0xff]  ;;  %v1579_v9 = vld [vmem:[#allocation12 + $0xa0] sm:$0xff]  ;;  %v1578_v48 = vld [vmem:[#allocation12 + $0x98] sm:$0xff] }
 0x2a2   : > { %v844_v62 = vmul.f32 %v828_v4, %v780_v49  ;;  %v802_v11 = vmul.f32 0.70710677, %v770_v17  ;;  %v786_v34 = vmul.f32 0.5, %v770_v17  ;;  %2189 = vmatpush3.msra.mxu1 %v1571_v43  ;;  %2041 = vmatpush3.msra.mxu0 %v1571_v43  ;;  %v1564_v63 = vld [vmem:[#allocation12 + $0x28] sm:$0xff]  ;;  %v1563_v2 = vld [vmem:[#allocation12 + $0x20] sm:$0xff]  ;;  %v1577_v4 = vld [vmem:[#allocation12 + $0x90] sm:$0xff] }
 0x2a3   : > { %v2364_v12 = vpop.eup %2363  ;;  %v803_v61 = vmul.f32 0.70710677, %v771_v60  ;;  %v845_v24 = vmul.f32 %v829_v46, %v781_v57  ;;  %v772_v41 = vadd.f32 %v3065_v53, %v751_v10  ;;  %v787_v38 = vmul.f32 0.5, %v771_v60  ;;  %v1561_v5 = vld [vmem:[#allocation12 + $0x10] sm:$0xff]  ;;  %v1576_v17 = vld [vmem:[#allocation12 + $0x88] sm:$0xff]  ;;  %v1575_v49 = vld [vmem:[#allocation12 + $0x80] sm:$0xff] }
 0x2a4   : > { %1022 = vmatmul.mubr.f32.gmra.mxu1 %v841_v51  ;;  %1215 = vmatmul.mubr.f32.gmra.mxu0 %v841_v51  ;;  %v830_v56 = vadd.f32 1.0, %v2364_v12  ;;  %2371 = verf.f32 %v802_v11  ;;  %v1586_v51 = vld [vmem:[#allocation12 + $0xd8] sm:$0xff]  ;;  %v1560_v7 = vld [vmem:[#allocation12 + $0x8] sm:$0xff]  ;;  %v1559_v60 = vld [vmem:[#allocation12] sm:$0xff] }
 0x2a5   : > { %1027 = vmatprep.mubr.f32.mxu1 %v2740_v6  ;;  %1220 = vmatprep.mubr.f32.mxu0 %v2740_v6  ;;  %2373 = verf.f32 %v803_v61  ;;  %v804_v25 = vmul.f32 0.70710677, %v772_v41  ;;  %v788_v0 = vmul.f32 0.5, %v772_v41 }
 0x2a6   : > { %v2366_v14 = vpop.eup %2365  ;;  %v846_v19 = vmul.f32 %v830_v56, %v782_v18  ;;  %2174 = vmatprep.subr.mxu1 %v1586_v51  ;;  %2042 = vmatprep.subr.mxu0 %v1586_v51 }
 0x2a7   : > { %v831_v20 = vadd.f32 1.0, %v2366_v14  ;;  %2375 = verf.f32 %v804_v25  ;;  %2190 = vmatpush3.msra.mxu1 %v1570_v52  ;;  %2043 = vmatpush3.msra.mxu0 %v1570_v52 }
 0x2a8   : > { %1028 = vmatmul.mubr.f32.gmra.mxu1 %v842_v59  ;;  %1221 = vmatmul.mubr.f32.gmra.mxu0 %v842_v59  ;;  %v1581_v59 = vld [vmem:[#allocation12 + $0xb0] sm:$0xff] }
 0x2a9   : > { %1033 = vmatprep.mubr.f32.mxu1 %v2740_v6  ;;  %1226 = vmatprep.mubr.f32.mxu0 %v2740_v6  ;;  %v847_v53 = vmul.f32 %v831_v20, %v783_v21 }
 0x2aa   : > { %v2368_v15 = vpop.eup %2367  ;;  %2175 = vmatprep.subr.mxu1 %v1585_v16  ;;  %2044 = vmatprep.subr.mxu0 %v1585_v16 }
 0x2ab   : > { %v832_v22 = vadd.f32 1.0, %v2368_v15 }
 0x2ac   : > { %1034 = vmatmul.mubr.f32.gmra.mxu1 %v843_v3  ;;  %1227 = vmatmul.mubr.f32.gmra.mxu0 %v843_v3  ;;  %v1562_v3 = vld [vmem:[#allocation12 + $0x18] sm:$0xff] }
 0x2ad   : > { %1039 = vmatprep.mubr.f32.mxu1 %v2740_v6  ;;  %1232 = vmatprep.mubr.f32.mxu0 %v2740_v6  ;;  %v848_v27 = vmul.f32 %v832_v22, %v784_v26 }
 0x2ae   : > { %v2370_v23 = vpop.eup %2369 }
 0x2af   : > { %v833_v1 = vadd.f32 1.0, %v2370_v23 }
 0x2b0   : > { %1040 = vmatmul.mubr.f32.gmra.mxu1 %v844_v62  ;;  %1233 = vmatmul.mubr.f32.gmra.mxu0 %v844_v62 }
 0x2b1   : > { %1045 = vmatprep.mubr.f32.mxu1 %v2740_v6  ;;  %1238 = vmatprep.mubr.f32.mxu0 %v2740_v6  ;;  %v2372_v28 = vpop.eup %2371  ;;  %v849_v13 = vmul.f32 %v833_v1, %v785_v29 }
 0x2b2   : > { %v834_v30 = vadd.f32 1.0, %v2372_v28  ;;  %v2374_v32 = vpop.eup %2373 }
 0x2b3   : > { %v835_v36 = vadd.f32 1.0, %v2374_v32 }
 0x2b4   : > { %1046 = vmatmul.mubr.f32.gmra.mxu1 %v845_v24  ;;  %1239 = vmatmul.mubr.f32.gmra.mxu0 %v845_v24  ;;  %v850_v35 = vmul.f32 %v834_v30, %v786_v34  ;;  %v2376_v37 = vpop.eup %2375 }
 0x2b5   : > { %1051 = vmatprep.mubr.f32.mxu1 %v2740_v6  ;;  %1244 = vmatprep.mubr.f32.mxu0 %v2740_v6  ;;  %v851_v8 = vmul.f32 %v835_v36, %v787_v38  ;;  %v836_v39 = vadd.f32 1.0, %v2376_v37 }
 0x2b7   : > { %v852_v40 = vmul.f32 %v836_v39, %v788_v0 }
 0x2b8   : > { %1052 = vmatmul.mubr.f32.gmra.mxu1 %v846_v19  ;;  %1245 = vmatmul.mubr.f32.gmra.mxu0 %v846_v19 }
 0x2b9   : > { %1057 = vmatprep.mubr.f32.mxu1 %v2740_v6  ;;  %1250 = vmatprep.mubr.f32.mxu0 %v2740_v6 }
 0x2bc   : > { %1058 = vmatmul.mubr.f32.gmra.mxu1 %v847_v53  ;;  %1251 = vmatmul.mubr.f32.gmra.mxu0 %v847_v53 }
 0x2bd   : > { %1063 = vmatprep.mubr.f32.mxu1 %v2740_v6  ;;  %1256 = vmatprep.mubr.f32.mxu0 %v2740_v6 }
 0x2c0   : > { %1064 = vmatmul.mubr.f32.gmra.mxu1 %v848_v27  ;;  %1257 = vmatmul.mubr.f32.gmra.mxu0 %v848_v27 }
 0x2c1   : > { %1069 = vmatprep.mubr.f32.mxu1 %v2740_v6  ;;  %1262 = vmatprep.mubr.f32.mxu0 %v2740_v6 }
 0x2c4   : > { %1070 = vmatmul.mubr.f32.gmra.mxu1 %v849_v13  ;;  %1263 = vmatmul.mubr.f32.gmra.mxu0 %v849_v13 }
 0x2c5   : > { %1075 = vmatprep.mubr.f32.mxu1 %v2740_v6  ;;  %1268 = vmatprep.mubr.f32.mxu0 %v2740_v6 }
 0x2c8   : > { %1076 = vmatmul.mubr.f32.gmra.mxu1 %v850_v35  ;;  %1269 = vmatmul.mubr.f32.gmra.mxu0 %v850_v35 }
 0x2c9   : > { %1081 = vmatprep.mubr.f32.mxu1 %v2740_v6  ;;  %1274 = vmatprep.mubr.f32.mxu0 %v2740_v6 }
 0x2cc   : > { %1082 = vmatmul.mubr.f32.gmra.mxu1 %v851_v8  ;;  %1275 = vmatmul.mubr.f32.gmra.mxu0 %v851_v8 }
 0x2cd   : > { %1087 = vmatprep.mubr.f32.mxu1 %v2740_v6  ;;  %1280 = vmatprep.mubr.f32.mxu0 %v2740_v6  ;;  %v1569_v6 = vld [vmem:[#allocation12 + $0x50] sm:$0xff] }
 0x2ce   : > { %2191 = vmatpush3.msra.mxu1 %v1569_v6  ;;  %2045 = vmatpush3.msra.mxu0 %v1569_v6 }
 0x2cf   : > { %2176 = vmatprep.subr.mxu1 %v1584_v54  ;;  %2046 = vmatprep.subr.mxu0 %v1584_v54 }
 0x2d0   : > { %1088 = vmatmul.mubr.f32.gmra.mxu1 %v852_v40  ;;  %1281 = vmatmul.mubr.f32.gmra.mxu0 %v852_v40 }
 0x2d1   : > { %2192 = vmatpush3.msra.mxu1 %v1568_v31  ;;  %2047 = vmatpush3.msra.mxu0 %v1568_v31 }
 0x2d2   : > { %2177 = vmatprep.subr.mxu1 %v1583_v55  ;;  %2048 = vmatprep.subr.mxu0 %v1583_v55 }
 0x2d3   : > { %2193 = vmatpush3.msra.mxu1 %v1567_v58  ;;  %2049 = vmatpush3.msra.mxu0 %v1567_v58 }
 0x2d4   : > { %2178 = vmatprep.subr.mxu1 %v1582_v44  ;;  %2050 = vmatprep.subr.mxu0 %v1582_v44 }
 0x2d5   : > { %2194 = vmatpush3.msra.mxu1 %v1566_v47  ;;  %2051 = vmatpush3.msra.mxu0 %v1566_v47 }
 0x2d6   : > { %2052 = vmatprep.subr.mxu0 %v1581_v59  ;;  %2179 = vmatprep.subr.mxu1 %v1581_v59 }
 0x2d7   : > { %2053 = vmatpush3.msra.mxu0 %v1565_v50  ;;  %2195 = vmatpush3.msra.mxu1 %v1565_v50 }
 0x2d8   : > { %2054 = vmatprep.subr.mxu0 %v1580_v45  ;;  %2180 = vmatprep.subr.mxu1 %v1580_v45 }
 0x2d9   : > { %2055 = vmatpush3.msra.mxu0 %v1564_v63  ;;  %2196 = vmatpush3.msra.mxu1 %v1564_v63 }
 0x2da   : > { %2056 = vmatprep.subr.mxu0 %v1579_v9  ;;  %2181 = vmatprep.subr.mxu1 %v1579_v9 }
 0x2db   : > { %2057 = vmatpush3.msra.mxu0 %v1563_v2  ;;  %2197 = vmatpush3.msra.mxu1 %v1563_v2 }
 0x2dc   : > { %2058 = vmatprep.subr.mxu0 %v1578_v48  ;;  %2182 = vmatprep.subr.mxu1 %v1578_v48 }
 0x2dd   : > { %2059 = vmatpush3.msra.mxu0 %v1562_v3  ;;  %2198 = vmatpush3.msra.mxu1 %v1562_v3 }
 0x2de   : > { %2060 = vmatprep.subr.mxu0 %v1577_v4  ;;  %2183 = vmatprep.subr.mxu1 %v1577_v4 }
 0x2df   : > { %2061 = vmatpush3.msra.mxu0 %v1561_v5  ;;  %2199 = vmatpush3.msra.mxu1 %v1561_v5 }
 0x2e0   : > { %2062 = vmatprep.subr.mxu0 %v1576_v17  ;;  %2184 = vmatprep.subr.mxu1 %v1576_v17 }
 0x2e1   : > { %2063 = vmatpush3.msra.mxu0 %v1560_v7  ;;  %2200 = vmatpush3.msra.mxu1 %v1560_v7 }
 0x2e2   : > { %2064 = vmatprep.subr.mxu0 %v1575_v49  ;;  %2185 = vmatprep.subr.mxu1 %v1575_v49 }
 0x2e3   : > { %2065 = vmatpush3.msra.mxu0 %v1559_v60  ;;  %2201 = vmatpush3.msra.mxu1 %v1559_v60 }
 0x354   : > { %v3188_v10 = vpop.f32.mrf.mxu1  ;;  %v3190_v62 = vpop.f32.mrf.mxu0 }
 0x355   : > { %v1963_v46 = vmul.f32 -1.442695, %v3188_v10 }
 0x356   : > { %v3193_v11 = vpop.f32.mrf.mxu1  ;;  %v3195_v12 = vpop.f32.mrf.mxu0 }
 0x357   : > { %2377 = vpow2.f32 %v1963_v46  ;;  %v1964_v57 = vmul.f32 -1.442695, %v3193_v11 }
 0x358   : > { %v3198_v61 = vpop.f32.mrf.mxu1  ;;  %v3200_v14 = vpop.f32.mrf.mxu0 }
 0x359   : > { %2379 = vpow2.f32 %v1964_v57  ;;  %v1965_v24 = vmul.f32 -1.442695, %v3198_v61 }
 0x35a   : > { %v3203_v56 = vpop.f32.mrf.mxu1  ;;  %v3205_v41 = vpop.f32.mrf.mxu0 }
 0x35b   : > { %2381 = vpow2.f32 %v1965_v24  ;;  %v1966_v18 = vmul.f32 -1.442695, %v3203_v56 }
 0x35c   : > { %v3208_v15 = vpop.f32.mrf.mxu1  ;;  %v3210_v19 = vpop.f32.mrf.mxu0 }
 0x35d   : > { %2383 = vpow2.f32 %v1966_v18  ;;  %v1967_v20 = vmul.f32 -1.442695, %v3208_v15 }
 0x35e   : > { %v3213_v25 = vpop.f32.mrf.mxu1  ;;  %v3215_v21 = vpop.f32.mrf.mxu0 }
 0x35f   : > { %2385 = vpow2.f32 %v1967_v20  ;;  %v1968_v53 = vmul.f32 -1.442695, %v3213_v25 }
 0x360   : > { %v3218_v22 = vpop.f32.mrf.mxu1  ;;  %v3220_v23 = vpop.f32.mrf.mxu0 }
 0x361   : > { %2387 = vpow2.f32 %v1968_v53  ;;  %v1969_v26 = vmul.f32 -1.442695, %v3218_v22 }
 0x362   : > { %v3223_v27 = vpop.f32.mrf.mxu1  ;;  %v3225_v1 = vpop.f32.mrf.mxu0 }
 0x363   : > { %2389 = vpow2.f32 %v1969_v26  ;;  %v1970_v28 = vmul.f32 -1.442695, %v3223_v27 }
 0x364   : > { %v2378_v29 = vpop.eup %2377  ;;  %v3228_v13 = vpop.f32.mrf.mxu1 }
 0x365   : > { %v3230_v30 = vpop.f32.mrf.mxu0  ;;  %v1383_v32 = vadd.f32 1.0, %v2378_v29  ;;  %2391 = vpow2.f32 %v1970_v28  ;;  %v1971_v34 = vmul.f32 -1.442695, %v3228_v13 }
 0x366   : > { %v2380_v35 = vpop.eup %2379  ;;  %v3233_v36 = vpop.f32.mrf.mxu1 }
 0x367   : > { %v3235_v37 = vpop.f32.mrf.mxu0  ;;  %2393 = vrcp.f32 %v1383_v32  ;;  %v1384_v38 = vadd.f32 1.0, %v2380_v35  ;;  %v1972_v8 = vmul.f32 -1.442695, %v3233_v36 }
 0x368   : > { %v2382_v39 = vpop.eup %2381  ;;  %2395 = vpow2.f32 %v1971_v34  ;;  %v3238_v0 = vpop.f32.mrf.mxu1 }
 0x369   : > { %v3240_v40 = vpop.f32.mrf.mxu0  ;;  %2397 = vrcp.f32 %v1384_v38  ;;  %v1385_v42 = vadd.f32 1.0, %v2382_v39  ;;  %v1973_v33 = vmul.f32 -1.442695, %v3238_v0 }
 0x36a   : > { %v2384_v43 = vpop.eup %2383  ;;  %2399 = vpow2.f32 %v1972_v8  ;;  %v3243_v51 = vpop.f32.mrf.mxu1 }
 0x36b   : > { %v3245_v52 = vpop.f32.mrf.mxu0  ;;  %2401 = vrcp.f32 %v1385_v42  ;;  %v1386_v16 = vadd.f32 1.0, %v2384_v43  ;;  %v1974_v6 = vmul.f32 -1.442695, %v3243_v51 }
 0x36c   : > { %v2386_v54 = vpop.eup %2385  ;;  %2403 = vpow2.f32 %v1973_v33  ;;  %v3248_v31 = vpop.f32.mrf.mxu1 }
 0x36d   : > { %v3250_v55 = vpop.f32.mrf.mxu0  ;;  %2405 = vrcp.f32 %v1386_v16  ;;  %v1387_v58 = vadd.f32 1.0, %v2386_v54  ;;  %v1975_v44 = vmul.f32 -1.442695, %v3248_v31 }
 0x36e   : > { %v2388_v47 = vpop.eup %2387  ;;  %2407 = vpow2.f32 %v1974_v6  ;;  %v3253_v59 = vpop.f32.mrf.mxu1 }
 0x36f   : > { %v3255_v50 = vpop.f32.mrf.mxu0  ;;  %2409 = vrcp.f32 %v1387_v58  ;;  %v1388_v45 = vadd.f32 1.0, %v2388_v47  ;;  %v1976_v63 = vmul.f32 -1.442695, %v3253_v59 }
 0x370   : > { %v2390_v9 = vpop.eup %2389  ;;  %2411 = vpow2.f32 %v1975_v44  ;;  %v3258_v2 = vpop.f32.mrf.mxu1 }
 0x371   : > { %2413 = vrcp.f32 %v1388_v45  ;;  %v1389_v48 = vadd.f32 1.0, %v2390_v9  ;;  %v1977_v3 = vmul.f32 -1.442695, %v3258_v2  ;;  %v3261_v4 = vpop.f32.mrf.mxu0 }
 0x372   : > { %v2392_v5 = vpop.eup %2391  ;;  %2415 = vpow2.f32 %v1976_v63  ;;  %v3263_v17 = vpop.f32.mrf.mxu1 }
 0x373   : > { %2417 = vrcp.f32 %v1389_v48  ;;  %v1390_v7 = vadd.f32 1.0, %v2392_v5  ;;  %v1978_v49 = vmul.f32 -1.442695, %v3263_v17  ;;  %v3268_v24 = vpop.f32.mrf.mxu0 }
 0x374   : > { %v2394_v60 = vpop.eup %2393  ;;  %2419 = vpow2.f32 %v1977_v3  ;;  %v3266_v46 = vpop.f32.mrf.mxu1 }
 0x375   : > { %v2396_v57 = vpop.eup %2395  ;;  %2421 = vrcp.f32 %v1390_v7  ;;  %v1979_v18 = vmul.f32 -1.442695, %v3266_v46  ;;  %v1479_v53 = vmul.f32 %v2394_v60, %v3188_v10  ;;  %v3279_v33 = vpop.f32.mrf.mxu0 }
 0x376   : > { %v2398_v20 = vpop.eup %2397  ;;  %v1391_v26 = vadd.f32 1.0, %v2396_v57  ;;  %2423 = vpow2.f32 %v1978_v49  ;;  %v3272_v28 = vpop.f32.mrf.mxu1 }
 0x377   : > { %v2400_v29 = vpop.eup %2399  ;;  %v1480_v32 = vmul.f32 %v2398_v20, %v3193_v11  ;;  %2425 = vpow2.f32 %v1979_v18  ;;  %v1980_v34 = vmul.f32 -1.442695, %v3272_v28  ;;  %v1511_v16 = vmul.f32 %v1479_v53, %v3190_v62  ;;  %v3291_v9 = vpop.f32.mrf.mxu0 }
 0x378   : > { %v2402_v35 = vpop.eup %2401  ;;  %2427 = vrcp.f32 %v1391_v26  ;;  %v1392_v38 = vadd.f32 1.0, %v2400_v29  ;;  %v3276_v8 = vpop.f32.mrf.mxu1 }
 0x379   : > { %v2404_v39 = vpop.eup %2403  ;;  %v1512_v42 = vmul.f32 %v1480_v32, %v3195_v12  ;;  %2429 = vpow2.f32 %v1980_v34  ;;  %v1981_v10 = vmul.f32 -1.442695, %v3276_v8  ;;  %v1481_v11 = vmul.f32 %v2402_v35, %v3198_v61  ;;  %v3303_v26 = vpop.f32.mrf.mxu0 }
 0x37a   : > { %v2406_v43 = vpop.eup %2405  ;;  %2431 = vrcp.f32 %v1392_v38  ;;  %v1393_v6 = vadd.f32 1.0, %v2404_v39  ;;  %v3284_v54 = vpop.f32.mrf.mxu1 }
 0x37b   : > { %v2408_v58 = vpop.eup %2407  ;;  %v1482_v44 = vmul.f32 %v2406_v43, %v3203_v56  ;;  %2433 = vpow2.f32 %v1981_v10  ;;  %v1982_v12 = vmul.f32 -1.442695, %v3284_v54  ;;  %1655 = vmatprep.mubr.f32.mxu0 %v1512_v42  ;;  %v1513_v56 = vmul.f32 %v1481_v11, %v3200_v14 }
 0x37c   : > { %v2410_v47 = vpop.eup %2409  ;;  %2435 = vrcp.f32 %v1393_v6  ;;  %v1394_v45 = vadd.f32 1.0, %v2408_v58  ;;  %v3288_v63 = vpop.f32.mrf.mxu1  ;;  %1656 = vmatmul.mubr.f32.vlgmr.msra.gmra.mxu0 %v1511_v16 }
 0x37d   : > { %v2412_v62 = vpop.eup %2411  ;;  %v1514_v61 = vmul.f32 %v1482_v44, %v3205_v41  ;;  %2437 = vpow2.f32 %v1982_v12  ;;  %v1983_v48 = vmul.f32 -1.442695, %v3288_v63  ;;  %v1483_v5 = vmul.f32 %v2410_v47, %v3208_v15  ;;  %v3315_v6 = vpop.f32.mrf.mxu0 }
 0x37e   : > { %v2414_v3 = vpop.eup %2413  ;;  %2439 = vrcp.f32 %v1394_v45  ;;  %v1395_v7 = vadd.f32 1.0, %v2412_v62  ;;  %v3296_v49 = vpop.f32.mrf.mxu1 }
 0x37f   : > { %v2416_v60 = vpop.eup %2415  ;;  %v1484_v57 = vmul.f32 %v2414_v3, %v3213_v25  ;;  %2441 = vpow2.f32 %v1983_v48  ;;  %v1984_v41 = vmul.f32 -1.442695, %v3296_v49  ;;  %1660 = vmatprep.mubr.f32.mxu0 %v1514_v61  ;;  %v1515_v25 = vmul.f32 %v1483_v5, %v3210_v19 }
 0x380   : > { %v2418_v18 = vpop.eup %2417  ;;  %2443 = vrcp.f32 %v1395_v7  ;;  %v1396_v20 = vadd.f32 1.0, %v2416_v60  ;;  %v3300_v53 = vpop.f32.mrf.mxu1  ;;  %1661 = vmatmul.mubr.f32.gmra.mxu0 %v1513_v56 }
 0x381   : > { %v2420_v14 = vpop.eup %2419  ;;  %v1516_v15 = vmul.f32 %v1484_v57, %v3215_v21  ;;  %2445 = vpow2.f32 %v1984_v41  ;;  %v1985_v29 = vmul.f32 -1.442695, %v3300_v53  ;;  %v1485_v34 = vmul.f32 %v2418_v18, %v3218_v22 }
 0x382   : > { %v2422_v32 = vpop.eup %2421  ;;  %2447 = vrcp.f32 %v1396_v20  ;;  %v1397_v35 = vadd.f32 1.0, %v2420_v14  ;;  %v3308_v38 = vpop.f32.mrf.mxu1 }
 0x383   : > { %v2424_v39 = vpop.eup %2423  ;;  %v1486_v42 = vmul.f32 %v2422_v32, %v3223_v27  ;;  %2449 = vpow2.f32 %v1985_v29  ;;  %v1986_v21 = vmul.f32 -1.442695, %v3308_v38  ;;  %1665 = vmatprep.mubr.f32.mxu0 %v1516_v15  ;;  %v1517_v44 = vmul.f32 %v1485_v34, %v3220_v23 }
 0x384   : > { %v2426_v10 = vpop.eup %2425  ;;  %2451 = vrcp.f32 %v1397_v35  ;;  %v1398_v43 = vadd.f32 1.0, %v2424_v39  ;;  %v3312_v16 = vpop.f32.mrf.mxu1  ;;  %1666 = vmatmul.mubr.f32.gmra.mxu0 %v1515_v25 }
 0x385   : > { %v2428_v19 = vpop.eup %2427  ;;  %v1518_v22 = vmul.f32 %v1486_v42, %v3225_v1  ;;  %v1399_v11 = vadd.f32 1.0, %v2426_v10  ;;  %2453 = vpow2.f32 %v1986_v21  ;;  %v1987_v58 = vmul.f32 -1.442695, %v3312_v16 }
 0x386   : > { %v2430_v27 = vpop.eup %2429  ;;  %v1487_v12 = vmul.f32 %v2428_v19, %v3228_v13  ;;  %2455 = vrcp.f32 %v1398_v43  ;;  %v3320_v47 = vpop.f32.mrf.mxu1 }
 0x387   : > { %v2432_v45 = vpop.eup %2431  ;;  %2457 = vrcp.f32 %v1399_v11  ;;  %v1400_v62 = vadd.f32 1.0, %v2430_v27  ;;  %v1988_v61 = vmul.f32 -1.442695, %v3320_v47  ;;  %1670 = vmatprep.mubr.f32.mxu0 %v1518_v22  ;;  %v3326_v13 = vpop.f32.mrf.mxu0 }
 0x388   : > { %v2434_v1 = vpop.eup %2433  ;;  %v1488_v48 = vmul.f32 %v2432_v45, %v3233_v36  ;;  %2459 = vpow2.f32 %v1987_v58  ;;  %v3324_v3 = vpop.f32.mrf.mxu1  ;;  %1671 = vmatmul.mubr.f32.gmra.mxu0 %v1517_v44  ;;  %v1519_v60 = vmul.f32 %v1487_v12, %v3230_v30 }
 0x389   : > { %v2436_v56 = vpop.eup %2435  ;;  %2461 = vrcp.f32 %v1400_v62  ;;  %v1401_v23 = vadd.f32 1.0, %v2434_v1  ;;  %v1989_v5 = vmul.f32 -1.442695, %v3324_v3  ;;  %v3338_v25 = vpop.f32.mrf.mxu0 }
 0x38a   : > { %v2438_v7 = vpop.eup %2437  ;;  %v1520_v57 = vmul.f32 %v1488_v48, %v3235_v37  ;;  %2463 = vpow2.f32 %v1988_v61  ;;  %v3331_v41 = vpop.f32.mrf.mxu1  ;;  %v1489_v18 = vmul.f32 %v2436_v56, %v3238_v0 }
 0x38b   : > { %v2440_v36 = vpop.eup %2439  ;;  %2465 = vrcp.f32 %v1401_v23  ;;  %v1402_v20 = vadd.f32 1.0, %v2438_v7  ;;  %v1990_v14 = vmul.f32 -1.442695, %v3331_v41  ;;  %v3350_v58 = vpop.f32.mrf.mxu0 }
 0x38c   : > { %v2442_v15 = vpop.eup %2441  ;;  %v1490_v29 = vmul.f32 %v2440_v36, %v3243_v51  ;;  %2467 = vpow2.f32 %v1989_v5  ;;  %1675 = vmatprep.mubr.f32.mxu1 %v1520_v57  ;;  %v3336_v32 = vpop.f32.mrf.mxu1  ;;  %v1521_v21 = vmul.f32 %v1489_v18, %v3240_v40 }
 0x38d   : > { %v2444_v30 = vpop.eup %2443  ;;  %2469 = vrcp.f32 %v1402_v20  ;;  %v1403_v37 = vadd.f32 1.0, %v2442_v15  ;;  %v1991_v34 = vmul.f32 -1.442695, %v3336_v32  ;;  %1676 = vmatmul.mubr.f32.vlgmr.msra.gmra.mxu1 %v1519_v60 }
 0x38e   : > { %v2446_v0 = vpop.eup %2445  ;;  %v1522_v35 = vmul.f32 %v1490_v29, %v3245_v52  ;;  %v1491_v39 = vmul.f32 %v2444_v30, %v3248_v31  ;;  %2471 = vpow2.f32 %v1990_v14  ;;  %v3343_v42 = vpop.f32.mrf.mxu1 }
 0x38f   : > { %v2448_v51 = vpop.eup %2447  ;;  %2473 = vrcp.f32 %v1403_v37  ;;  %v1404_v10 = vadd.f32 1.0, %v2446_v0  ;;  %v1992_v43 = vmul.f32 -1.442695, %v3343_v42 }
 0x390   : > { %v2450_v19 = vpop.eup %2449  ;;  %v1492_v22 = vmul.f32 %v2448_v51, %v3253_v59  ;;  %2475 = vpow2.f32 %v1991_v34  ;;  %1680 = vmatprep.mubr.f32.mxu1 %v1522_v35  ;;  %v3348_v11 = vpop.f32.mrf.mxu1  ;;  %v1523_v44 = vmul.f32 %v1491_v39, %v3250_v55 }
 0x391   : > { %v2452_v52 = vpop.eup %2451  ;;  %2477 = vrcp.f32 %v1404_v10  ;;  %v1405_v31 = vadd.f32 1.0, %v2450_v19  ;;  %v1993_v27 = vmul.f32 -1.442695, %v3348_v11  ;;  %1681 = vmatmul.mubr.f32.gmra.mxu1 %v1521_v21  ;;  %v1260_v55 = vpop.f32.mrf.mxu0 }
 0x392   : > { %v2454_v40 = vpop.eup %2453  ;;  %v1524_v12 = vmul.f32 %v1492_v22, %v3255_v50  ;;  %2479 = vpow2.f32 %v1992_v43  ;;  %v3355_v45 = vpop.f32.mrf.mxu1  ;;  %v1493_v62 = vmul.f32 %v2452_v52, %v3258_v2 }
 0x393   : > { %v2456_v59 = vpop.eup %2455  ;;  %2481 = vrcp.f32 %v1405_v31  ;;  %v1406_v61 = vadd.f32 1.0, %v2454_v40  ;;  %v1994_v1 = vmul.f32 -1.442695, %v3355_v45  ;;  %v1264_v15 = vpop.f32.mrf.mxu0 }
 0x394   : > { %v2458_v48 = vpop.eup %2457  ;;  %v1494_v56 = vmul.f32 %v2456_v59, %v3263_v17  ;;  %2483 = vpow2.f32 %v1993_v27  ;;  %1685 = vmatprep.mubr.f32.mxu1 %v1524_v12  ;;  %v1525_v2 = vmul.f32 %v1493_v62, %v3261_v4 }
 0x395   : > { %v2460_v23 = vpop.eup %2459  ;;  %2485 = vrcp.f32 %v1406_v61  ;;  %1686 = vmatmul.mubr.f32.gmra.mxu1 %v1523_v44  ;;  %v1495_v57 = vmul.f32 %v2458_v48, %v3266_v46 }
 0x396   : > { %v2462_v50 = vpop.eup %2461  ;;  %v1526_v5 = vmul.f32 %v1494_v56, %v3268_v24  ;;  %v1407_v7 = vadd.f32 1.0, %v2460_v23  ;;  %2487 = vpow2.f32 %v1994_v1 }
 0x397   : > { %v2464_v60 = vpop.eup %2463  ;;  %v1496_v36 = vmul.f32 %v2462_v50, %v3272_v28  ;;  %v1527_v37 = vmul.f32 %v1495_v57, %v3279_v33 }
 0x398   : > { %v2466_v18 = vpop.eup %2465  ;;  %2489 = vrcp.f32 %v1407_v7  ;;  %v1408_v17 = vadd.f32 1.0, %v2464_v60  ;;  %1690 = vmatprep.mubr.f32.mxu1 %v1526_v5 }
 0x399   : > { %v2468_v20 = vpop.eup %2467  ;;  %v1528_v14 = vmul.f32 %v1496_v36, %v3291_v9  ;;  %1691 = vmatmul.mubr.f32.gmra.mxu1 %v1525_v2  ;;  %v1497_v4 = vmul.f32 %v2466_v18, %v3276_v8  ;;  %v1266_v9 = vpop.f32.mrf.mxu0 }
 0x39a   : > { %v2470_v29 = vpop.eup %2469  ;;  %2491 = vrcp.f32 %v1408_v17  ;;  %v1409_v24 = vadd.f32 1.0, %v2468_v20 }
 0x39b   : > { %v2472_v30 = vpop.eup %2471  ;;  %v1498_v46 = vmul.f32 %v2470_v29, %v3284_v54  ;;  %1695 = vmatprep.mubr.f32.mxu1 %v1528_v14  ;;  %v1529_v10 = vmul.f32 %v1497_v4, %v3303_v26 }
 0x39c   : > { %v2474_v28 = vpop.eup %2473  ;;  %2493 = vrcp.f32 %v1409_v24  ;;  %v1410_v34 = vadd.f32 1.0, %v2472_v30 }
 0x39d   : > { %v2476_v0 = vpop.eup %2475  ;;  %v1530_v35 = vmul.f32 %v1498_v46, %v3315_v6  ;;  %1696 = vmatmul.mubr.f32.gmra.mxu1 %v1527_v37  ;;  %v1499_v33 = vmul.f32 %v2474_v28, %v3288_v63  ;;  %v1270_v6 = vpop.f32.mrf.mxu0 }
 0x39e   : > { %v2478_v39 = vpop.eup %2477  ;;  %2495 = vrcp.f32 %v1410_v34  ;;  %v1411_v51 = vadd.f32 1.0, %v2476_v0 }
 0x39f   : > { %v2480_v21 = vpop.eup %2479  ;;  %v1500_v8 = vmul.f32 %v2478_v39, %v3296_v49  ;;  %1700 = vmatprep.mubr.f32.mxu1 %v1530_v35  ;;  %v1531_v40 = vmul.f32 %v1499_v33, %v3326_v13  ;;  %v1272_v59 = vpop.f32.mrf.mxu0 }
 0x3a0   : > { %v2482_v54 = vpop.eup %2481  ;;  %2497 = vrcp.f32 %v1411_v51  ;;  %v1412_v43 = vadd.f32 1.0, %v2480_v21 }
 0x3a1   : > { %v2484_v19 = vpop.eup %2483  ;;  %v1532_v22 = vmul.f32 %v1500_v8, %v3338_v25  ;;  %1701 = vmatmul.mubr.f32.gmra.mxu1 %v1529_v10  ;;  %v1501_v26 = vmul.f32 %v2482_v54, %v3300_v53  ;;  %v1276_v53 = vpop.f32.mrf.mxu0 }
 0x3a2   : > { %v2486_v52 = vpop.eup %2485  ;;  %2499 = vrcp.f32 %v1412_v43  ;;  %v1413_v31 = vadd.f32 1.0, %v2484_v19 }
 0x3a3   : > { %v2488_v27 = vpop.eup %2487  ;;  %v1502_v63 = vmul.f32 %v2486_v52, %v3308_v38  ;;  %1705 = vmatprep.mubr.f32.mxu1 %v1532_v22  ;;  %v1533_v62 = vmul.f32 %v1501_v26, %v3350_v58  ;;  %v1278_v5 = vpop.f32.mrf.mxu0 }
 0x3a4   : > { %2501 = vrcp.f32 %v1413_v31  ;;  %v1414_v49 = vadd.f32 1.0, %v2488_v27 }
 0x3a5   : > { %v2490_v44 = vpop.eup %2489  ;;  %v1534_v12 = vmul.f32 %v1502_v63, %v1260_v55  ;;  %1706 = vmatmul.mubr.f32.gmra.mxu1 %v1531_v40  ;;  %v1282_v57 = vpop.f32.mrf.mxu0 }
 0x3a6   : > { %2503 = vrcp.f32 %v1414_v49  ;;  %v1503_v61 = vmul.f32 %v2490_v44, %v3312_v16 }
 0x3a7   : > { %v2492_v25 = vpop.eup %2491  ;;  %1710 = vmatprep.mubr.f32.mxu1 %v1534_v12  ;;  %v1284_v20 = vpop.f32.mrf.mxu0 }
 0x3a8   : > { %v1504_v13 = vmul.f32 %v2492_v25, %v3320_v47  ;;  %v1535_v56 = vmul.f32 %v1503_v61, %v1264_v15 }
 0x3a9   : > { %v2494_v1 = vpop.eup %2493  ;;  %1711 = vmatmul.mubr.f32.gmra.mxu1 %v1533_v62 }
 0x3aa   : > { %v1536_v38 = vmul.f32 %v1504_v13, %v1266_v9  ;;  %v1505_v23 = vmul.f32 %v2494_v1, %v3324_v3 }
 0x3ab   : > { %v2496_v48 = vpop.eup %2495 }
 0x3ac   : > { %v1506_v55 = vmul.f32 %v2496_v48, %v3331_v41  ;;  %1715 = vmatprep.mubr.f32.mxu1 %v1536_v38  ;;  %v1537_v16 = vmul.f32 %v1505_v23, %v1270_v6 }
 0x3ad   : > { %v2498_v50 = vpop.eup %2497  ;;  %1716 = vmatmul.mubr.f32.gmra.mxu1 %v1535_v56 }
 0x3ae   : > { %v1538_v58 = vmul.f32 %v1506_v55, %v1272_v59  ;;  %v1507_v60 = vmul.f32 %v2498_v50, %v3336_v32 }
 0x3af   : > { %v2500_v7 = vpop.eup %2499 }
 0x3b0   : > { %v1508_v47 = vmul.f32 %v2500_v7, %v3343_v42  ;;  %1720 = vmatprep.mubr.f32.mxu1 %v1538_v58  ;;  %v1539_v18 = vmul.f32 %v1507_v60, %v1276_v53 }
 0x3b1   : > { %v2502_v2 = vpop.eup %2501  ;;  %1721 = vmatmul.mubr.f32.gmra.mxu1 %v1537_v16 }
 0x3b2   : > { %v1540_v36 = vmul.f32 %v1508_v47, %v1278_v5  ;;  %v1509_v41 = vmul.f32 %v2502_v2, %v3348_v11 }
 0x3b3   : > { %v2504_v3 = vpop.eup %2503 }
 0x3b4   : > { %v1510_v17 = vmul.f32 %v2504_v3, %v3355_v45  ;;  %1725 = vmatprep.mubr.f32.mxu1 %v1540_v36  ;;  %v1541_v15 = vmul.f32 %v1509_v41, %v1282_v57 }
 0x3b5   : > { %1726 = vmatmul.mubr.f32.gmra.mxu1 %v1539_v18 }
 0x3b6   : > { %v1542_v14 = vmul.f32 %v1510_v17, %v1284_v20 }
 0x3b8   : > { %1730 = vmatprep.mubr.f32.mxu1 %v1542_v14 }
 0x3b9   : > { %1731 = vmatmul.mubr.f32.gmra.mxu1 %v1541_v15 }
 0x43c   : > { %v2066_v32 = vpop.f32.mrf.mxu0 }
 0x43e   : > { %v2067_v42 = vpop.f32.mrf.mxu0 }
 0x43f   : > { %v2068_v29 = vadd.f32 %v2067_v42, %v2066_v32 }
 0x440   : > { %v2069_v24 = vpop.f32.mrf.mxu0 }
 0x441   : > { %1787 = vst [vmem:[%s3387_s9] sm:$0xff] %v2068_v29 }
 0x442   : > { %v2070_v11 = vpop.f32.mrf.mxu0 }
 0x443   : > { %v2071_v45 = vadd.f32 %v2070_v11, %v2069_v24 }
 0x444   : > { %v2072_v30 = vpop.f32.mrf.mxu0 }
 0x445   : > { %1788 = vst [vmem:[%s3387_s9 + $0x8] sm:$0xff] %v2071_v45 }
 0x446   : > { %v2073_v37 = vpop.f32.mrf.mxu0 }
 0x447   : > { %v2074_v4 = vadd.f32 %v2073_v37, %v2072_v30 }
 0x448   : > { %v2075_v46 = vpop.f32.mrf.mxu0 }
 0x449   : > { %1789 = vst [vmem:[%s3387_s9 + $0x10] sm:$0xff] %v2074_v4 }
 0x44a   : > { %v2076_v28 = vpop.f32.mrf.mxu0 }
 0x44b   : > { %v2077_v34 = vadd.f32 %v2076_v28, %v2075_v46 }
 0x44d   : > { %1790 = vst [vmem:[%s3387_s9 + $0x18] sm:$0xff] %v2077_v34  ;;  %v2078_v0 = vpop.f32.mrf.mxu1 }
 0x44f   : > { %v2079_v35 = vpop.f32.mrf.mxu1 }
 0x450   : > { %v2080_v9 = vadd.f32 %v2079_v35, %v2078_v0 }
 0x451   : > { %v2081_v39 = vpop.f32.mrf.mxu1 }
 0x452   : > { %1791 = vst [vmem:[%s3387_s9 + $0x20] sm:$0xff] %v2080_v9 }
 0x453   : > { %v2082_v51 = vpop.f32.mrf.mxu1 }
 0x454   : > { %v2083_v21 = vadd.f32 %v2082_v51, %v2081_v39 }
 0x455   : > { %v2084_v10 = vpop.f32.mrf.mxu1 }
 0x456   : > { %1792 = vst [vmem:[%s3387_s9 + $0x28] sm:$0xff] %v2083_v21 }
 0x457   : > { %v2085_v33 = vpop.f32.mrf.mxu1 }
 0x458   : > { %v2086_v8 = vadd.f32 %v2085_v33, %v2084_v10 }
 0x459   : > { %v2087_v54 = vpop.f32.mrf.mxu1 }
 0x45a   : > { %1793 = vst [vmem:[%s3387_s9 + $0x30] sm:$0xff] %v2086_v8 }
 0x45b   : > { %v2088_v43 = vpop.f32.mrf.mxu1 }
 0x45c   : > { %v2089_v19 = vadd.f32 %v2088_v43, %v2087_v54 }
 0x45d   : > { %v2090_v22 = vpop.f32.mrf.mxu1 }
 0x45e   : > { %1794 = vst [vmem:[%s3387_s9 + $0x38] sm:$0xff] %v2089_v19 }
 0x45f   : > { %v2091_v6 = vpop.f32.mrf.mxu1 }
 0x460   : > { %v2092_v52 = vadd.f32 %v2091_v6, %v2090_v22 }
 0x461   : > { %v2093_v31 = vpop.f32.mrf.mxu1 }
 0x462   : > { %1795 = vst [vmem:[%s3387_s9 + $0x40] sm:$0xff] %v2092_v52 }
 0x463   : > { %v2094_v27 = vpop.f32.mrf.mxu1 }
 0x464   : > { %v2095_v40 = vadd.f32 %v2094_v27, %v2093_v31 }
 0x465   : > { %v2096_v26 = vpop.f32.mrf.mxu1 }
 0x466   : > { %1796 = vst [vmem:[%s3387_s9 + $0x48] sm:$0xff] %v2095_v40 }
 0x467   : > { %v2097_v63 = vpop.f32.mrf.mxu1 }
 0x468   : > { %v2098_v49 = vadd.f32 %v2097_v63, %v2096_v26 }
 0x469   : > { %v2099_v44 = vpop.f32.mrf.mxu1 }
 0x46a   : > { %1797 = vst [vmem:[%s3387_s9 + $0x50] sm:$0xff] %v2098_v49 }
 0x46b   : > { %v2100_v12 = vpop.f32.mrf.mxu1 }
 0x46c   : > { %v2101_v59 = vadd.f32 %v2100_v12, %v2099_v44 }
 0x46d   : > { %v2102_v25 = vpop.f32.mrf.mxu1 }
 0x46e   : > { %1798 = vst [vmem:[%s3387_s9 + $0x58] sm:$0xff] %v2101_v59 }
 0x46f   : > { %v2103_v62 = vpop.f32.mrf.mxu1 }
 0x470   : > { %v2104_v61 = vadd.f32 %v2103_v62, %v2102_v25 }
 0x471   : > { %v2105_v13 = vpop.f32.mrf.mxu1 }
 0x472   : > { %1799 = vst [vmem:[%s3387_s9 + $0x60] sm:$0xff] %v2104_v61 }
 0x473   : > { %v2106_v1 = vpop.f32.mrf.mxu1 }
 0x474   : > { %v2107_v53 = vadd.f32 %v2106_v1, %v2105_v13 }
 0x475   : > { %v2108_v38 = vpop.f32.mrf.mxu1 }
 0x476   : > { %1800 = vst [vmem:[%s3387_s9 + $0x68] sm:$0xff] %v2107_v53 }
 0x477   : > { %v2109_v48 = vpop.f32.mrf.mxu1 }
 0x478   : > { %v2110_v56 = vadd.f32 %v2109_v48, %v2108_v38 }
 0x479   : > { %v2111_v23 = vpop.f32.mrf.mxu1 }
 0x47a   : > { %1801 = vst [vmem:[%s3387_s9 + $0x70] sm:$0xff] %v2110_v56 }
 0x47b   : > { %v2112_v55 = vpop.f32.mrf.mxu1 }
 0x47c   : > { %v2113_v50 = vadd.f32 %v2112_v55, %v2111_v23 }
 0x47e   : > { %1802 = vst [vmem:[%s3387_s9 + $0x78] sm:$0xff] %v2113_v50 }
 0x47f   : > { %2653 = shalt.err (!%p2650_p3)
}
 0x480   : > { %s2654_s14 = scalar_lea.hbm %s3409_s27, 2048  ;;  %s2658_s3 = scalar_lea.hbm %s3466_s6, 4096 }
 0x481   : > { %p2655_p5 = scmp.ne.s32.totalorder %s3409_s27, %s2654_s14  ;;  %p2659_p12 = scmp.lt.s32.totalorder %s3409_s27, %s3466_s6 }
 0x482   : > { %p2660_p7 = scmp.lt.s32.totalorder %s2658_s3, %s2654_s14 }
 0x483   : > { %p2656_p1 = pnand %p2655_p5, %p2900_p13 }
 0x484   : > { %p2661_p9 = por %p2660_p7, %p2659_p12 }
 0x485   : > { %p2657_p6 = pneg %p2656_p1 }
 0x487   : > { %p2662_p4 = pnand %p2661_p9, %p2657_p6 }
 0x489   : > { %2665 = shalt.err (!%p2662_p4)
}
 0x48a   : > { %s2742_s9 = smov 128   ;;  %s2743_s17 = smov 8  }
 0x48b   : > { %2220 = dma.vmem_to_hbm [thread:$0]  (%p2900_p13), %s3411_s13, 2048, %s3409_s27, %s1804_s12, %s2742_s9, %s2742_s9, %s2743_s17  }
 0x48c PF: > { %s1832_s16 = sand.u32 1, %s2708_s21   ;;  %p3489_p8 = scmp.ne.s32.totalorder %s3478_s8, 0 }
 0x48d   : > { %p3490_p10 = scmp.ge.s32.totalorder %s2728_s26, 2  ;;  %s1833_s30 = scalar_lea.sflag [#allocation6], %s1832_s16 }
 0x48f   : > { %p2240_p11 = pnand %p3490_p10, %p3489_p8 }
 0x491   : > { %p2241_p2 = pneg %p2240_p11 }
 0x493   : > { %2703 = dma.done.wait (%p2241_p2), %s1833_s30, 2048  }
 0x494   : > { %2705 = vsyncadd (%p2241_p2), %s1833_s30, 4294965248  ;;  %s24_s26 = sadd.s32 1, %s2728_s26   ;;  %s3491_s21 = smov %s2712_s22 }
 0x495   : > { %p21_p0 = scmp.ge.s32.totalorder %s24_s26, 4   ;;  %s3492_s22 = smov %s2716_s23 }
 0x496   : > { %s3493_s23 = smov %s2909_s28  ;;  %s3494_s24 = smov %s2724_s25 }
 0x497   : > { %s3495_s25 = smov %s3497_s11  ;;  %23 = sbr.rel (!%p21_p0) target bundleno = 12 (0xc), region = 116 }
 0x49c   :  { %1838 = vsyncpa [#allocation5], 1 }
 0x49d   :  { %1840 = vsyncpa [#allocation5 + $0x1], 1 }
 0x49e   :  { %1841 = vsyncpa [#allocation8], 1 }
 0x49f   :  { %1842 = vsyncpa [#allocation11], 1 }
 0x4a0   :  { %1843 = vsyncpa [#allocation6], 1 }
 0x4a1   :  { %1845 = vsyncpa [#allocation6 + $0x1], 1 }

// kernel: tpu_custom_call.1
= control target key start
LH: loop header
LB: loop body
LE: loop exit
PB: predicated region body
PF: predicated region fallthrough
CT: control target
= control target key end

     0   :  { %s3460_s0 = inlined_call_operand.hbm [shape: f32[256,128], index: 0, kind: input, shape index: {}]   ;;  %s3461_s1 = inlined_call_operand.hbm [shape: f32[128,128], index: 1, kind: input, shape index: {}]   ;;  %s3462_s2 = inlined_call_operand.vmem [shape: f32[2,128], index: 2, kind: input, shape index: {}]   ;;  %s3463_s3 = inlined_call_operand.hbm [shape: f32[128,512], index: 3, kind: input, shape index: {}]   ;;  %s3464_s4 = inlined_call_operand.hbm [shape: f32[128,512], index: 4, kind: input, shape index: {}]   ;;  %s3465_s5 = inlined_call_operand.hbm [shape: f32[256,128], index: 5, kind: input, shape index: {}]   ;;  %s3466_s6 = inlined_call_operand.hbm [shape: f32[256,128], index: 6, kind: output, shape index: {}]  }
   0x1   :  { %3472 = sst [smem:[#allocation18_spill]] %s3461_s1 }
   0x2   :  { %3473 = sst [smem:[#allocation19_spill]] %s3463_s3 }
   0x3   :  { %3474 = sst [smem:[#allocation20_spill]] %s3464_s4 }
   0x4   :  { %11 = vsyncpa [#allocation5], 0 }
   0x5   :  { %13 = vsyncpa [#allocation5 + $0x1], 0 }
   0x6   :  { %14 = vsyncpa [#allocation8], 0 }
   0x7   :  { %15 = vsyncpa [#allocation11], 0 }
   0x8   :  { %16 = vsyncpa [#allocation6], 0 }
   0x9   :  { %18 = vsyncpa [#allocation6 + $0x1], 0  ;;  %s2779_s21 = smov 0   ;;  %s2781_s22 = smov 0  }
   0xa   :  { %s2783_s23 = smov 0   ;;  %s2785_s24 = smov 0  }
   0xb   :  { %s2787_s25 = smov 0   ;;  %s2789_s26 = smov 0  }
   0xc LB: > { %s1943_s27 = sadd.s32 4294967295, %s2728_s26   ;;  %s1944_s28 = sadd.s32 4294967294, %s2728_s26   ;;  %s2728_s26 = sphi %s2789_s26, %s24_s26   ;;  %s2724_s25 = sphi %s2787_s25, %s3495_s25   ;;  %s2720_s24 = sphi %s2785_s24, %s3494_s24   ;;  %s2716_s23 = sphi %s2783_s23, %s3493_s23   ;;  %s2712_s22 = sphi %s2781_s22, %s3492_s22   ;;  %s2708_s21 = sphi %s2779_s21, %s3491_s21  }
   0xd   : > { %p56_p0 = scmp.ne.s32.totalorder %s2712_s22, %s2708_s21  ;;  %p2813_p1 = scmp.eq.s32.totalorder %s1943_s27, 0 }
   0xe   : > { %p2817_p2 = scmp.eq.s32.totalorder %s1943_s27, 1  ;;  %p208_p3 = scmp.eq.s32.totalorder %s1944_s28, 1 }
   0xf   : > { %s3475_s29 = scalar_select %p2813_p1, 1, 0 }
  0x10   : > { %p2823_p4 = por %p2813_p1, %p56_p0  ;;  %p1945_p5 = scmp.ge.s32.totalorder %s2728_s26, 1 }
  0x11   : > { %p2828_p6 = por %p208_p3, %p56_p0  ;;  %p215_p7 = scmp.lt.s32.totalorder %s2728_s26, 3 }
  0x12   : > { %s2730_s10 = smov [#allocation7]   ;;  %s3481_s4 = sld [smem:[#allocation20_spill]] }
  0x13   : > { %s3478_s8 = scalar_select %p2828_p6, 1, 0 }
  0x14   : > { %p2833_p8 = pnand %p1945_p5, %p215_p7  ;;  %s227_s11 = sshll.u32 %s2730_s10, 4  ;;  %s228_s11 = int_to_ptr.vmem [resolvable:$true] %s227_s11 }
  0x15   : > { %s2516_s16 = scalar_lea.vmem %s228_s11, 2048  ;;  %p2524_p5 = scmp.lt.s32.totalorder %s228_s11, %s228_s11 }
  0x16   : > { %p2222_p9 = pneg %p2833_p8  ;;  %p2517_p13 = scmp.ne.s32.totalorder %s228_s11, %s2516_s16 }
  0x17   : > { %p2525_p7 = scmp.lt.s32.totalorder %s2516_s16, %s2516_s16 }
  0x18   : > { %p2842_p11 = pnand %p2222_p9, %p2813_p1  ;;  %s1850_s15 = scalar_lea.hbm %s3481_s4, 256 }
  0x19   : > { %p2526_p9 = por %p2525_p7, %p2524_p5 }
  0x1a   : > { %p2507_p12 = pneg %p2842_p11 }
  0x1c   : > { %p2519_p0 = pnand %p2517_p13, %p2507_p12 }
  0x1e   : > { %p2520_p3 = pneg %p2519_p0 }
  0x20   : > { %p2527_p10 = pnand %p2526_p9, %p2520_p3 }
  0x22   : > { %2530 = shalt.err (!%p2527_p10)
}
  0x23   : > { %s3467_s17 = smov 128   ;;  %s3471_s18 = smov 8  }
  0x24   : > { %s3482_s1 = sld [smem:[#allocation18_spill]]  ;;  %s2733_s27 = smov [#allocation10]  }
  0x25   : > { %s263_s28 = sshll.u32 %s2733_s27, 4  ;;  %s2734_s10 = smov [#allocation9]   ;;  %s264_s28 = int_to_ptr.vmem [resolvable:$true] %s263_s28 }
  0x26   : > { %s246_s13 = sshll.u32 %s2734_s10, 4  ;;  %s2544_s14 = scalar_lea.vmem %s264_s28, 4096  ;;  %s247_s13 = int_to_ptr.vmem [resolvable:$true] %s246_s13 }
  0x27   : > { %p2545_p13 = scmp.ne.s32.totalorder %s264_s28, %s2544_s14  ;;  %p2552_p3 = scmp.lt.s32.totalorder %s264_s28, %s264_s28 }
  0x28   : > { %p2553_p5 = scmp.lt.s32.totalorder %s2544_s14, %s2544_s14 }
  0x29   : > { %p2547_p10 = pnand %p2545_p13, %p2507_p12 }
  0x2a   : > { %2225 = dma.hbm_to_vmem [thread:$0]  (!%p2842_p11), %s3482_s1, 2048, %s228_s11, [#allocation8], %s3467_s17, %s3467_s17, %s3471_s18  }
  0x2b   : > { %p2548_p0 = pneg %p2547_p10  ;;  %p2554_p7 = por %p2553_p5, %p2552_p3 }
  0x2d   : > { %p2555_p9 = pnand %p2554_p7, %p2548_p0 }
  0x2f   : > { %2558 = shalt.err (!%p2555_p9)
}
  0x30   : > { %s2735_s16 = smov 512   ;;  %s2736_s11 = smov 256  }
  0x31   : > { %s2737_s19 = smov 16   ;;  %s2571_s10 = scalar_lea.vmem %s247_s13, 4096 }
  0x32   : > { %2231 = dma.hbm_to_vmem [thread:$0]  (!%p2842_p11), %s1850_s15, 4096, %s264_s28, [#allocation11], %s2735_s16, %s2736_s11, %s2737_s19  }
  0x33   : > { %p2572_p13 = scmp.ne.s32.totalorder %s247_s13, %s2571_s10  ;;  %p2579_p0 = scmp.lt.s32.totalorder %s247_s13, %s247_s13 }
  0x34   : > { %p2580_p5 = scmp.lt.s32.totalorder %s2571_s10, %s2571_s10 }
  0x35   : > { %p2574_p10 = pnand %p2572_p13, %p2507_p12 }
  0x36   : > { %p2581_p7 = por %p2580_p5, %p2579_p0 }
  0x37   : > { %p2575_p3 = pneg %p2574_p10 }
  0x39   : > { %p2582_p9 = pnand %p2581_p7, %p2575_p3 }
  0x3b   : > { %2585 = shalt.err (!%p2582_p9)
}
  0x3c   : > { %s3483_s3 = sld [smem:[#allocation19_spill]]  ;;  %s2738_s15 = smov [#allocation12]  }
  0x3d   : > { %s279_s28 = sshll.u32 %s2738_s15, 4  ;;  %s280_s28 = int_to_ptr.vmem [resolvable:$true] %s279_s28 }
  0x3e   : > { %s2597_s20 = scalar_lea.vmem %s280_s28, 4096  ;;  %p2605_p1 = scmp.lt.s32.totalorder %s280_s28, %s280_s28 }
  0x3f   : > { %p2598_p6 = scmp.ne.s32.totalorder %s280_s28, %s2597_s20  ;;  %p2606_p0 = scmp.lt.s32.totalorder %s2597_s20, %s2597_s20 }
  0x41   : > { %p2600_p13 = pnand %p2598_p6, %p2507_p12  ;;  %p2607_p3 = por %p2606_p0, %p2605_p1 }
  0x42   : > { %2228 = dma.hbm_to_vmem [thread:$0]  (!%p2842_p11), %s3483_s3, 4096, %s247_s13, [#allocation8], %s2735_s16, %s2736_s11, %s2737_s19  }
  0x43   : > { %p2601_p10 = pneg %p2600_p13 }
  0x45   : > { %p2608_p5 = pnand %p2607_p3, %p2601_p10 }
  0x47   : > { %2611 = shalt.err (!%p2608_p5)
}
  0x48   : > { %s3484_s17 = smov 128   ;;  %s36_s11 = sadd.s32 1, %s2724_s25 }
  0x49   : > { %2234 = dma.hbm_to_vmem [thread:$0]  (!%p2842_p11), %s3465_s5, 4096, %s280_s28, [#allocation11], %s3484_s17, %s3484_s17, %s3471_s18  }
  0x4a   : > { %s43_s12 = sadd.s32 1, %s2716_s23  ;;  %p38_p1 = scmp.ge.s32.totalorder %s36_s11, 2 }
  0x4b   : > { %p50_p6 = scmp.ne.s32.totalorder %s2716_s23, %s2712_s22  ;;  %p51_p12 = scmp.eq.s32.totalorder %s2728_s26, 0 }
  0x4c   : > { %p2247_p7 = scmp.lt.s32.totalorder %s2728_s26, 2  ;;  %s3497_s11 = smov (%p38_p1, %s36_s11), 0 }
  0x4d   : > { %p52_p9 = por %p51_p12, %p50_p6  ;;  %p2900_p13 = por %p2817_p2, %p50_p6 }
  0x4e   : > { %s40_s27 = ssub.s32 %s2724_s25, %s3497_s11  ;;  %s293_s10 = sand.u32 1, %s2716_s23  }
  0x4f   : > { %p41_p10 = scmp.eq.s32.totalorder %s40_s27, 0  ;;  %s1951_s14 = sshll.u32 %s293_s10, 7 }
  0x50   : > { %s2000_s15 = sshll.u32 %s2724_s25, 11  ;;  %s297_s18 = scalar_lea.vmem [#allocation4], %s1951_s14 }
  0x51   : > { %s2909_s28 = scalar_select %p41_p10, %s2716_s23, %s43_s12  }
  0x52   : > { %s303_s16 = scalar_lea.hbm %s3460_s0, %s2000_s15  ;;  %s304_s1 = sshll.u32 %s297_s18, 4  ;;  %s305_s1 = int_to_ptr.vmem [resolvable:$true] %s304_s1 }
  0x53   : > { %p2916_p11 = pnand %p2247_p7, %p52_p9  ;;  %s294_s3 = scalar_lea.sflag [#allocation5], %s293_s10 }
  0x54   : > { %s2625_s27 = scalar_lea.vmem %s305_s1, 2048  ;;  %s2739_s12 = smov [#allocation4]  }
  0x55   : > { %p2614_p2 = pneg %p2916_p11  ;;  %p2626_p0 = scmp.ne.s32.totalorder %s305_s1, %s2625_s27 }
  0x56   : > { %s2630_s4 = sshll.u32 %s2739_s12, 4  ;;  %s2631_s4 = int_to_ptr.vmem [resolvable:$false] %s2630_s4 }
  0x57   : > { %p2628_p3 = pnand %p2626_p0, %p2614_p2  ;;  %s2632_s15 = scalar_lea.vmem %s2631_s4, 4096 }
  0x58   : > { %p2633_p1 = scmp.lt.s32.totalorder %s305_s1, %s2631_s4  ;;  %p2634_p6 = scmp.lt.s32.totalorder %s2632_s15, %s2625_s27 }
  0x59   : > { %p2629_p5 = pneg %p2628_p3 }
  0x5a   : > { %p2635_p12 = por %p2634_p6, %p2633_p1 }
  0x5c   : > { %p2636_p7 = pnand %p2635_p12, %p2629_p5 }
  0x5e   : > { %2639 = shalt.err (!%p2636_p7)
}
  0x5f   : > { %s3487_s18 = smov 8   ;;  %316 = sbr.rel (%p2833_p8) target bundleno = 1164 (0x48c), region = 44 }
  0x60   : > { %2238 = dma.hbm_to_vmem [thread:$0]  (!%p2916_p11), %s303_s16, 2048, %s305_s1, %s294_s3, %s3484_s17, %s3484_s17, %s3487_s18  }
  0x61   : > { %s2930_s10 = sand.u32 (!%p2833_p8), 1, %s2712_s22  }
  0x62   : > { %s1955_s4 = sshll.u32 (!%p2833_p8), %s2930_s10, 7  ;;  %s319_s14 = scalar_lea.sflag (!%p2833_p8), [#allocation5], %s2930_s10 }
  0x63   : > { %s2936_s20 = scalar_lea.vmem (!%p2833_p8), [#allocation4], %s1955_s4 }
  0x64   : > { %2691 = dma.done.wait (%p2823_p4), %s319_s14, 2048  }
  0x65   : > { %2693 = vsyncadd (%p2823_p4), %s319_s14, 4294965248  ;;  %p3488_p9 = scmp.ne.s32.totalorder %s3475_s29, 0 }
  0x67   : > { %2695 = dma.done.wait (%p3488_p9), [#allocation8], 6144  }
  0x68   : > { %2697 = vsyncadd (%p3488_p9), [#allocation8], 4294961152 }
  0x69   : > { %2699 = dma.done.wait (%p3488_p9), [#allocation11], 8192  }
  0x6a   : > { %2701 = vsyncadd (%p3488_p9), [#allocation11], 4294959104  ;;  %v408_v0 = vld [vmem:[#allocation7 + $0x78] sm:$0xff]  ;;  %v407_v1 = vld [vmem:[#allocation7 + $0x70] sm:$0xff]  ;;  %s3387_s9 = scalar_lea.vmem [#allocation13], %s1955_s4  ;;  %s2001_s17 = sshll.u32 %s2720_s24, 11 }
  0x6b   : > { %2114 = vmatprep.subr.mxu0 %v408_v0  ;;  %v406_v2 = vld [vmem:[#allocation7 + $0x68] sm:$0xff]  ;;  %v405_v3 = vld [vmem:[#allocation7 + $0x60] sm:$0xff]  ;;  %v404_v5 = vld [vmem:[#allocation7 + $0x58] sm:$0xff]  ;;  %s1817_s13 = sshll.u32 %s3387_s9, 4  ;;  %s3409_s27 = scalar_lea.hbm %s3466_s6, %s2001_s17  ;;  %s3411_s13 = int_to_ptr.vmem [resolvable:$true] %s1817_s13 }
  0x6c   : > { %2115 = vmatpush3.msra.mxu0 %v408_v0  ;;  %v377_v4 = vld [vmem:[%s2936_s20] sm:$0xff]  ;;  %v403_v6 = vld [vmem:[#allocation7 + $0x50] sm:$0xff]  ;;  %v402_v7 = vld [vmem:[#allocation7 + $0x48] sm:$0xff]  ;;  %s1804_s12 = scalar_lea.sflag [#allocation6], %s2930_s10  ;;  %s2640_s15 = scalar_lea.vmem %s3411_s13, 2048 }
  0x6d   : > { %2116 = vmatprep.subr.mxu0 %v407_v1  ;;  %2146 = vmatprep.mubr.f32.mxu0 %v377_v4  ;;  %v401_v8 = vld [vmem:[#allocation7 + $0x40] sm:$0xff]  ;;  %v400_v9 = vld [vmem:[#allocation7 + $0x38] sm:$0xff]  ;;  %v399_v10 = vld [vmem:[#allocation7 + $0x30] sm:$0xff]  ;;  %p2641_p4 = scmp.ne.s32.totalorder %s3411_s13, %s2640_s15  ;;  %s2741_s24 = smov [#allocation13]  }
  0x6e   : > { %2117 = vmatpush3.msra.mxu0 %v407_v1  ;;  %v398_v11 = vld [vmem:[#allocation7 + $0x28] sm:$0xff]  ;;  %v397_v12 = vld [vmem:[#allocation7 + $0x20] sm:$0xff]  ;;  %v396_v13 = vld [vmem:[#allocation7 + $0x18] sm:$0xff]  ;;  %s2644_s18 = sshll.u32 %s2741_s24, 4  ;;  %s2645_s18 = int_to_ptr.vmem [resolvable:$false] %s2644_s18 }
  0x6f   : > { %2118 = vmatprep.subr.mxu0 %v406_v2  ;;  %v395_v14 = vld [vmem:[#allocation7 + $0x10] sm:$0xff]  ;;  %v394_v15 = vld [vmem:[#allocation7 + $0x8] sm:$0xff]  ;;  %v393_v16 = vld [vmem:[#allocation7] sm:$0xff]  ;;  %p2642_p8 = pnand %p2641_p4, %p2900_p13  ;;  %s2646_s4 = scalar_lea.vmem %s2645_s18, 4096 }
  0x70   : > { %2119 = vmatpush3.msra.mxu0 %v406_v2  ;;  %v378_v17 = vld [vmem:[%s2936_s20 + $0x8] sm:$0xff]  ;;  %v379_v18 = vld [vmem:[%s2936_s20 + $0x10] sm:$0xff]  ;;  %v380_v19 = vld [vmem:[%s2936_s20 + $0x18] sm:$0xff]  ;;  %p2647_p11 = scmp.lt.s32.totalorder %s3411_s13, %s2645_s18  ;;  %p2648_p2 = scmp.lt.s32.totalorder %s2646_s4, %s2640_s15 }
  0x71   : > { %2120 = vmatprep.subr.mxu0 %v405_v3  ;;  %v381_v20 = vld [vmem:[%s2936_s20 + $0x20] sm:$0xff]  ;;  %v382_v21 = vld [vmem:[%s2936_s20 + $0x28] sm:$0xff]  ;;  %v383_v22 = vld [vmem:[%s2936_s20 + $0x30] sm:$0xff]  ;;  %p2643_p10 = pneg %p2642_p8 }
  0x72   : > { %2121 = vmatpush3.msra.mxu0 %v405_v3  ;;  %v384_v23 = vld [vmem:[%s2936_s20 + $0x38] sm:$0xff]  ;;  %v385_v24 = vld [vmem:[%s2936_s20 + $0x40] sm:$0xff]  ;;  %v386_v25 = vld [vmem:[%s2936_s20 + $0x48] sm:$0xff]  ;;  %p2649_p0 = por %p2648_p2, %p2647_p11 }
  0x73   : > { %2122 = vmatprep.subr.mxu0 %v404_v5  ;;  %v387_v26 = vld [vmem:[%s2936_s20 + $0x50] sm:$0xff]  ;;  %v388_v27 = vld [vmem:[%s2936_s20 + $0x58] sm:$0xff]  ;;  %v389_v28 = vld [vmem:[%s2936_s20 + $0x60] sm:$0xff] }
  0x74   : > { %2123 = vmatpush3.msra.mxu0 %v404_v5  ;;  %v390_v29 = vld [vmem:[%s2936_s20 + $0x68] sm:$0xff]  ;;  %v391_v30 = vld [vmem:[%s2936_s20 + $0x70] sm:$0xff]  ;;  %v392_v31 = vld [vmem:[%s2936_s20 + $0x78] sm:$0xff]  ;;  %p2650_p3 = pnand %p2649_p0, %p2643_p10 }
  0x75   : > { %2124 = vmatprep.subr.mxu0 %v403_v6 }
  0x76   : > { %2125 = vmatpush3.msra.mxu0 %v403_v6 }
  0x77   : > { %2126 = vmatprep.subr.mxu0 %v402_v7 }
  0x78   : > { %2127 = vmatpush3.msra.mxu0 %v402_v7 }
  0x79   : > { %2128 = vmatprep.subr.mxu0 %v401_v8 }
  0x7a   : > { %2129 = vmatpush3.msra.mxu0 %v401_v8 }
  0x7b   : > { %2130 = vmatprep.subr.mxu0 %v400_v9 }
  0x7c   : > { %2131 = vmatpush3.msra.mxu0 %v400_v9 }
  0x7d   : > { %2132 = vmatprep.subr.mxu0 %v399_v10 }
  0x7e   : > { %2133 = vmatpush3.msra.mxu0 %v399_v10 }
  0x7f   : > { %2134 = vmatprep.subr.mxu0 %v398_v11 }
  0x80   : > { %2135 = vmatpush3.msra.mxu0 %v398_v11 }
  0x81   : > { %2136 = vmatprep.subr.mxu0 %v397_v12 }
  0x82   : > { %2137 = vmatpush3.msra.mxu0 %v397_v12 }
  0x83   : > { %2138 = vmatprep.subr.mxu0 %v396_v13 }
  0x84   : > { %2139 = vmatpush3.msra.mxu0 %v396_v13 }
  0x85   : > { %2140 = vmatprep.subr.mxu0 %v395_v14 }
  0x86   : > { %2141 = vmatpush3.msra.mxu0 %v395_v14 }
  0x87   : > { %2142 = vmatprep.subr.mxu0 %v394_v15 }
  0x88   : > { %2143 = vmatpush3.msra.mxu0 %v394_v15 }
  0x89   : > { %2144 = vmatprep.subr.mxu0 %v393_v16 }
  0x8a   : > { %2145 = vmatpush3.msra.mxu0 %v393_v16 }
  0x8b   : > { %2147 = vmatmul.mubr.f32.vlgmr.msra.gmra.mxu0 %v378_v17 }
  0x8c   : > { %2149 = vmatprep.mubr.f32.mxu0 %v379_v18 }
  0x8f   : > { %2150 = vmatmul.mubr.f32.gmra.mxu0 %v380_v19 }
  0x90   : > { %2152 = vmatprep.mubr.f32.mxu0 %v381_v20 }
  0x93   : > { %2153 = vmatmul.mubr.f32.gmra.mxu0 %v382_v21 }
  0x94   : > { %2155 = vmatprep.mubr.f32.mxu0 %v383_v22 }
  0x97   : > { %2156 = vmatmul.mubr.f32.gmra.mxu0 %v384_v23 }
  0x98   : > { %2158 = vmatprep.mubr.f32.mxu0 %v385_v24 }
  0x9b   : > { %2159 = vmatmul.mubr.f32.gmra.mxu0 %v386_v25 }
  0x9c   : > { %2161 = vmatprep.mubr.f32.mxu0 %v387_v26 }
  0x9f   : > { %2162 = vmatmul.mubr.f32.gmra.mxu0 %v388_v27 }
  0xa0   : > { %2164 = vmatprep.mubr.f32.mxu0 %v389_v28 }
  0xa3   : > { %2165 = vmatmul.mubr.f32.gmra.mxu0 %v390_v29 }
  0xa4   : > { %2167 = vmatprep.mubr.f32.mxu0 %v391_v30 }
  0xa7   : > { %2168 = vmatmul.mubr.f32.gmra.mxu0 %v392_v31 }
 0x14b   : > { %v2148_v32 = vpop.f32.mrf.mxu0 }
 0x14d   : > { %v475_v33 = vpop.f32.mrf.mxu0 }
 0x14e   : > { %554 = vadd.xlane.f32.xlu0 %v475_v33 }
 0x14f   : > { %v2151_v34 = vpop.f32.mrf.mxu0 }
 0x151   : > { %v485_v35 = vpop.f32.mrf.mxu0 }
 0x152   : > { %556 = vadd.xlane.f32.xlu0 %v2148_v32  ;;  %558 = vadd.xlane.f32.xlu1 %v485_v35 }
 0x153   : > { %v2154_v36 = vpop.f32.mrf.mxu0 }
 0x155   : > { %v495_v37 = vpop.f32.mrf.mxu0 }
 0x156   : > { %560 = vadd.xlane.f32.xlu1 %v2151_v34  ;;  %562 = vadd.xlane.f32.xlu0 %v495_v37 }
 0x157   : > { %v2157_v38 = vpop.f32.mrf.mxu0 }
 0x159   : > { %v505_v39 = vpop.f32.mrf.mxu0 }
 0x15a   : > { %564 = vadd.xlane.f32.xlu1 %v2154_v36  ;;  %566 = vadd.xlane.f32.xlu0 %v505_v39 }
 0x15b   : > { %v2966_v40 = vpop.f32.mrf.mxu0 }
 0x15d   : > { %v515_v41 = vpop.f32.mrf.mxu0 }
 0x15e   : > { %568 = vadd.xlane.f32.xlu1 %v2157_v38  ;;  %570 = vadd.xlane.f32.xlu0 %v515_v41 }
 0x15f   : > { %v2968_v42 = vpop.f32.mrf.mxu0 }
 0x161   : > { %v525_v43 = vpop.f32.mrf.mxu0 }
 0x162   : > { %572 = vadd.xlane.f32.xlu1 %v2966_v40  ;;  %574 = vadd.xlane.f32.xlu0 %v525_v43 }
 0x163   : > { %v2971_v44 = vpop.f32.mrf.mxu0 }
 0x165   : > { %v2973_v45 = vpop.f32.mrf.mxu0 }
 0x166   : > { %576 = vadd.xlane.f32.xlu1 %v2968_v42  ;;  %578 = vadd.xlane.f32.xlu0 %v2973_v45 }
 0x167   : > { %v2977_v46 = vpop.f32.mrf.mxu0 }
 0x169   : > { %v2979_v47 = vpop.f32.mrf.mxu0 }
 0x16a   : > { %580 = vadd.xlane.f32.xlu1 %v2971_v44  ;;  %582 = vadd.xlane.f32.xlu0 %v2979_v47 }
 0x16e   : > { %584 = vadd.xlane.f32.xlu1 %v2977_v46 }
 0x1d7   : > { %v555_v48 = vpop.xlane.xlu0 %554 }
 0x1d8   : > { %v587_v49 = vmul.f32 0.0078125, %v555_v48 }
 0x1da   : > { %v2984_v50 = vsub.f32 %v475_v33, %v587_v49  ;;  %v930_v49 = vld [vmem:[#allocation9 + $0xe8] sm:$0xff] }
 0x1db   : > { %v557_v51 = vpop.xlane.xlu0 %556  ;;  %v559_v52 = vpop.xlane.xlu1 %558 }
 0x1dc   : > { %v588_v53 = vmul.f32 0.0078125, %v557_v51  ;;  %v589_v54 = vmul.f32 0.0078125, %v559_v52  ;;  %v619_v55 = vmul.f32 %v2984_v50, %v2984_v50  ;;  %v1123_v51 = vld [vmem:[#allocation10 + $0xe8] sm:$0xff] }
 0x1de   : > { %v2988_v56 = vsub.f32 %v2148_v32, %v588_v53  ;;  %v2990_v57 = vsub.f32 %v485_v35, %v589_v54  ;;  %635 = vadd.xlane.f32.xlu0 %v619_v55  ;;  %v929_v53 = vld [vmem:[#allocation9 + $0xe0] sm:$0xff] }
 0x1df   : > { %v561_v58 = vpop.xlane.xlu1 %560  ;;  %v563_v59 = vpop.xlane.xlu0 %562  ;;  %v1122_v54 = vld [vmem:[#allocation10 + $0xe0] sm:$0xff] }
 0x1e0   : > { %v590_v60 = vmul.f32 0.0078125, %v561_v58  ;;  %v591_v61 = vmul.f32 0.0078125, %v563_v59  ;;  %v620_v62 = vmul.f32 %v2988_v56, %v2988_v56  ;;  %v621_v63 = vmul.f32 %v2990_v57, %v2990_v57  ;;  %v1121_v59 = vld [vmem:[#allocation10 + $0xd8] sm:$0xff] }
 0x1e2   : > { %v2996_v0 = vsub.f32 %v2151_v34, %v590_v60  ;;  %v2998_v1 = vsub.f32 %v495_v37, %v591_v61  ;;  %637 = vadd.xlane.f32.xlu1 %v620_v62  ;;  %639 = vadd.xlane.f32.xlu0 %v621_v63  ;;  %v927_v60 = vld [vmem:[#allocation9 + $0xd0] sm:$0xff]  ;;  %v926_v63 = vld [vmem:[#allocation9 + $0xc8] sm:$0xff] }
 0x1e3   : > { %v565_v2 = vpop.xlane.xlu1 %564  ;;  %v567_v3 = vpop.xlane.xlu0 %566  ;;  %v1120_v61 = vld [vmem:[#allocation10 + $0xd0] sm:$0xff] }
 0x1e4   : > { %v592_v4 = vmul.f32 0.0078125, %v565_v2  ;;  %v593_v5 = vmul.f32 0.0078125, %v567_v3  ;;  %v622_v6 = vmul.f32 %v2996_v0, %v2996_v0  ;;  %v623_v7 = vmul.f32 %v2998_v1, %v2998_v1  ;;  %v1119_v2 = vld [vmem:[#allocation10 + $0xc8] sm:$0xff]  ;;  %v925_v3 = vld [vmem:[#allocation9 + $0xc0] sm:$0xff] }
 0x1e6   : > { %v3004_v8 = vsub.f32 %v2154_v36, %v592_v4  ;;  %v3006_v9 = vsub.f32 %v505_v39, %v593_v5  ;;  %641 = vadd.xlane.f32.xlu1 %v622_v6  ;;  %643 = vadd.xlane.f32.xlu0 %v623_v7  ;;  %v1118_v5 = vld [vmem:[#allocation10 + $0xc0] sm:$0xff]  ;;  %v924_v6 = vld [vmem:[#allocation9 + $0xb8] sm:$0xff] }
 0x1e7   : > { %v569_v10 = vpop.xlane.xlu1 %568  ;;  %v571_v11 = vpop.xlane.xlu0 %570  ;;  %v1117_v7 = vld [vmem:[#allocation10 + $0xb8] sm:$0xff] }
 0x1e8   : > { %v594_v12 = vmul.f32 0.0078125, %v569_v10  ;;  %v595_v13 = vmul.f32 0.0078125, %v571_v11  ;;  %v624_v14 = vmul.f32 %v3004_v8, %v3004_v8  ;;  %v625_v15 = vmul.f32 %v3006_v9, %v3006_v9  ;;  %v923_v10 = vld [vmem:[#allocation9 + $0xb0] sm:$0xff]  ;;  %v922_v11 = vld [vmem:[#allocation9 + $0xa8] sm:$0xff] }
 0x1ea   : > { %v3012_v16 = vsub.f32 %v2157_v38, %v594_v12  ;;  %v3014_v17 = vsub.f32 %v515_v41, %v595_v13  ;;  %645 = vadd.xlane.f32.xlu1 %v624_v14  ;;  %647 = vadd.xlane.f32.xlu0 %v625_v15  ;;  %v1125_v41 = vld [vmem:[#allocation10 + $0xf8] sm:$0xff]  ;;  %v1115_v12 = vld [vmem:[#allocation10 + $0xa8] sm:$0xff]  ;;  %v921_v13 = vld [vmem:[#allocation9 + $0xa0] sm:$0xff] }
 0x1eb   : > { %v573_v18 = vpop.xlane.xlu1 %572  ;;  %v575_v19 = vpop.xlane.xlu0 %574  ;;  %1126 = vmatprep.subr.mxu0 %v1125_v41  ;;  %v1114_v14 = vld [vmem:[#allocation10 + $0xa0] sm:$0xff]  ;;  %v920_v15 = vld [vmem:[#allocation9 + $0x98] sm:$0xff]  ;;  %v910_v41 = vld [vmem:[#allocation9 + $0x48] sm:$0xff] }
 0x1ec   : > { %v596_v20 = vmul.f32 0.0078125, %v573_v18  ;;  %v597_v21 = vmul.f32 0.0078125, %v575_v19  ;;  %v626_v22 = vmul.f32 %v3012_v16, %v3012_v16  ;;  %v627_v23 = vmul.f32 %v3014_v17, %v3014_v17  ;;  %v1113_v18 = vld [vmem:[#allocation10 + $0x98] sm:$0xff]  ;;  %v919_v19 = vld [vmem:[#allocation9 + $0x90] sm:$0xff] }
 0x1ee   : > { %v3021_v24 = vsub.f32 %v2966_v40, %v596_v20  ;;  %v3023_v25 = vsub.f32 %v525_v43, %v597_v21  ;;  %649 = vadd.xlane.f32.xlu1 %v626_v22  ;;  %651 = vadd.xlane.f32.xlu0 %v627_v23  ;;  %v932_v40 = vld [vmem:[#allocation9 + $0xf8] sm:$0xff]  ;;  %v1124_v43 = vld [vmem:[#allocation10 + $0xf0] sm:$0xff]  ;;  %v918_v21 = vld [vmem:[#allocation9 + $0x88] sm:$0xff] }
 0x1ef   : > { %v577_v26 = vpop.xlane.xlu1 %576  ;;  %v579_v27 = vpop.xlane.xlu0 %578  ;;  %933 = vmatprep.subr.mxu1 %v932_v40  ;;  %1127 = vmatpush1.msra.mxu0 %v1124_v43  ;;  %v1112_v20 = vld [vmem:[#allocation10 + $0x90] sm:$0xff]  ;;  %v1111_v22 = vld [vmem:[#allocation10 + $0x88] sm:$0xff]  ;;  %v917_v23 = vld [vmem:[#allocation9 + $0x80] sm:$0xff] }
 0x1f0   : > { %v598_v28 = vmul.f32 0.0078125, %v577_v26  ;;  %v599_v29 = vmul.f32 0.0078125, %v579_v27  ;;  %v628_v30 = vmul.f32 %v3021_v24, %v3021_v24  ;;  %v629_v31 = vmul.f32 %v3023_v25, %v3023_v25  ;;  %1128 = vmatprep.subr.mxu0 %v1123_v51  ;;  %v1110_v26 = vld [vmem:[#allocation10 + $0x80] sm:$0xff]  ;;  %v916_v27 = vld [vmem:[#allocation9 + $0x78] sm:$0xff]  ;;  %v1104_v40 = vld [vmem:[#allocation10 + $0x50] sm:$0xff] }
 0x1f1   : > { %1129 = vmatpush1.msra.mxu0 %v1122_v54  ;;  %v909_v43 = vld [vmem:[#allocation9 + $0x40] sm:$0xff]  ;;  %v908_v51 = vld [vmem:[#allocation9 + $0x38] sm:$0xff]  ;;  %v1100_v54 = vld [vmem:[#allocation10 + $0x30] sm:$0xff] }
 0x1f2   : > { %v3030_v32 = vsub.f32 %v2968_v42, %v598_v28  ;;  %v3033_v33 = vsub.f32 %v2973_v45, %v599_v29  ;;  %653 = vadd.xlane.f32.xlu1 %v628_v30  ;;  %655 = vadd.xlane.f32.xlu0 %v629_v31  ;;  %v931_v42 = vld [vmem:[#allocation9 + $0xf0] sm:$0xff]  ;;  %v1109_v28 = vld [vmem:[#allocation10 + $0x78] sm:$0xff]  ;;  %v914_v31 = vld [vmem:[#allocation9 + $0x68] sm:$0xff] }
 0x1f3   : > { %v581_v34 = vpop.xlane.xlu1 %580  ;;  %v583_v35 = vpop.xlane.xlu0 %582  ;;  %934 = vmatpush1.msra.mxu1 %v931_v42  ;;  %1130 = vmatprep.subr.mxu0 %v1121_v59  ;;  %v915_v29 = vld [vmem:[#allocation9 + $0x70] sm:$0xff]  ;;  %v1103_v42 = vld [vmem:[#allocation10 + $0x48] sm:$0xff]  ;;  %v904_v59 = vld [vmem:[#allocation9 + $0x18] sm:$0xff] }
 0x1f4   : > { %v600_v36 = vmul.f32 0.0078125, %v581_v34  ;;  %v601_v37 = vmul.f32 0.0078125, %v583_v35  ;;  %v630_v38 = vmul.f32 %v3030_v32, %v3030_v32  ;;  %v631_v39 = vmul.f32 %v3033_v33, %v3033_v33  ;;  %935 = vmatprep.subr.mxu1 %v930_v49  ;;  %1131 = vmatpush1.msra.mxu0 %v1120_v61  ;;  %v1108_v30 = vld [vmem:[#allocation10 + $0x70] sm:$0xff]  ;;  %v1107_v34 = vld [vmem:[#allocation10 + $0x68] sm:$0xff]  ;;  %v913_v35 = vld [vmem:[#allocation9 + $0x60] sm:$0xff] }
 0x1f5   : > { %936 = vmatpush1.msra.mxu1 %v929_v53  ;;  %1132 = vmatprep.subr.mxu0 %v1119_v2  ;;  %v1102_v49 = vld [vmem:[#allocation10 + $0x40] sm:$0xff]  ;;  %v907_v53 = vld [vmem:[#allocation9 + $0x30] sm:$0xff]  ;;  %v902_v2 = vld [vmem:[#allocation9 + $0x8] sm:$0xff] }
 0x1f6   : > { %v3040_v45 = vsub.f32 %v2971_v44, %v600_v36  ;;  %v3043_v48 = vsub.f32 %v2979_v47, %v601_v37  ;;  %657 = vadd.xlane.f32.xlu1 %v630_v38  ;;  %659 = vadd.xlane.f32.xlu0 %v631_v39  ;;  %v928_v47 = vld [vmem:[#allocation9 + $0xd8] sm:$0xff]  ;;  %v1106_v36 = vld [vmem:[#allocation10 + $0x60] sm:$0xff]  ;;  %v911_v39 = vld [vmem:[#allocation9 + $0x50] sm:$0xff] }
 0x1f7   : > { %v585_v52 = vpop.xlane.xlu1 %584  ;;  %937 = vmatprep.subr.mxu1 %v928_v47  ;;  %1133 = vmatpush1.msra.mxu0 %v1118_v5  ;;  %v912_v37 = vld [vmem:[#allocation9 + $0x58] sm:$0xff]  ;;  %v1098_v47 = vld [vmem:[#allocation10 + $0x20] sm:$0xff]  ;;  %v903_v61 = vld [vmem:[#allocation9 + $0x10] sm:$0xff] }
 0x1f8   : > { %v602_v55 = vmul.f32 0.0078125, %v585_v52  ;;  %v632_v58 = vmul.f32 %v3040_v45, %v3040_v45  ;;  %v633_v44 = vmul.f32 %v3043_v48, %v3043_v48  ;;  %938 = vmatpush1.msra.mxu1 %v927_v60  ;;  %1134 = vmatprep.subr.mxu0 %v1117_v7  ;;  %v1105_v38 = vld [vmem:[#allocation10 + $0x58] sm:$0xff]  ;;  %v1094_v5 = vld [vmem:[#allocation10] sm:$0xff] }
 0x1f9   : > { %939 = vmatprep.subr.mxu1 %v926_v63  ;;  %v1101_v52 = vld [vmem:[#allocation10 + $0x38] sm:$0xff]  ;;  %v1096_v63 = vld [vmem:[#allocation10 + $0x10] sm:$0xff] }
 0x1fa   : > { %v3050_v62 = vsub.f32 %v2977_v46, %v602_v55  ;;  %661 = vadd.xlane.f32.xlu1 %v632_v58  ;;  %663 = vadd.xlane.f32.xlu0 %v633_v44  ;;  %v1116_v46 = vld [vmem:[#allocation10 + $0xb0] sm:$0xff]  ;;  %v906_v55 = vld [vmem:[#allocation9 + $0x28] sm:$0xff]  ;;  %v905_v44 = vld [vmem:[#allocation9 + $0x20] sm:$0xff] }
 0x1fb   : > { %940 = vmatpush1.msra.mxu1 %v925_v3  ;;  %1135 = vmatpush1.msra.mxu0 %v1116_v46  ;;  %v1099_v58 = vld [vmem:[#allocation10 + $0x28] sm:$0xff]  ;;  %v1097_v60 = vld [vmem:[#allocation10 + $0x18] sm:$0xff] }
 0x1fc   : > { %v634_v4 = vmul.f32 %v3050_v62, %v3050_v62  ;;  %941 = vmatprep.subr.mxu1 %v924_v6  ;;  %1136 = vmatprep.subr.mxu0 %v1115_v12  ;;  %v1095_v3 = vld [vmem:[#allocation10 + $0x8] sm:$0xff]  ;;  %v2740_v6 = vmov 0.0   ;;  %v1590_v7 = vld [vmem:[#allocation12 + $0xf8] sm:$0xff] }
 0x1fd   : > { %942 = vmatpush1.msra.mxu1 %v923_v10  ;;  %1137 = vmatpush1.msra.mxu0 %v1114_v14 }
 0x1fe   : > { %665 = vadd.xlane.f32.xlu1 %v634_v4  ;;  %943 = vmatprep.subr.mxu1 %v922_v11  ;;  %v901_v4 = vld [vmem:[#allocation9] sm:$0xff] }
 0x1ff   : > { %944 = vmatpush1.msra.mxu1 %v921_v13  ;;  %1138 = vmatprep.subr.mxu0 %v1113_v18 }
 0x200   : > { %945 = vmatprep.subr.mxu1 %v920_v15  ;;  %1139 = vmatpush1.msra.mxu0 %v1112_v20 }
 0x201   : > { %946 = vmatpush1.msra.mxu1 %v919_v19  ;;  %1140 = vmatprep.subr.mxu0 %v1111_v22 }
 0x202   : > { %947 = vmatprep.subr.mxu1 %v918_v21  ;;  %1141 = vmatpush1.msra.mxu0 %v1110_v26 }
 0x203   : > { %948 = vmatpush1.msra.mxu1 %v917_v23  ;;  %1142 = vmatprep.subr.mxu0 %v1109_v28 }
 0x204   : > { %949 = vmatprep.subr.mxu1 %v916_v27  ;;  %1143 = vmatpush1.msra.mxu0 %v1108_v30 }
 0x205   : > { %950 = vmatpush1.msra.mxu1 %v915_v29  ;;  %1144 = vmatprep.subr.mxu0 %v1107_v34 }
 0x206   : > { %951 = vmatprep.subr.mxu1 %v914_v31  ;;  %1145 = vmatpush1.msra.mxu0 %v1106_v36 }
 0x207   : > { %952 = vmatpush1.msra.mxu1 %v913_v35  ;;  %1146 = vmatprep.subr.mxu0 %v1105_v38 }
 0x208   : > { %953 = vmatprep.subr.mxu1 %v912_v37  ;;  %1147 = vmatpush1.msra.mxu0 %v1104_v40 }
 0x209   : > { %954 = vmatpush1.msra.mxu1 %v911_v39  ;;  %1148 = vmatprep.subr.mxu0 %v1103_v42 }
 0x20a   : > { %955 = vmatprep.subr.mxu1 %v910_v41  ;;  %1149 = vmatpush1.msra.mxu0 %v1102_v49  ;;  %v3059_v41 = vld [vmem:[%s3462_s2] ss:$0 sm:$0xff] }
 0x20b   : > { %956 = vmatpush1.msra.mxu1 %v909_v43  ;;  %1150 = vmatprep.subr.mxu0 %v1101_v52 }
 0x20c   : > { %957 = vmatprep.subr.mxu1 %v908_v51  ;;  %1151 = vmatpush1.msra.mxu0 %v1100_v54 }
 0x20d   : > { %958 = vmatpush1.msra.mxu1 %v907_v53  ;;  %1152 = vmatprep.subr.mxu0 %v1099_v58  ;;  %v3065_v53 = vld [vmem:[%s3462_s2 + $0x1] ss:$0 sm:$0xff] }
 0x20e   : > { %959 = vmatprep.subr.mxu1 %v906_v55  ;;  %1153 = vmatpush1.msra.mxu0 %v1098_v47 }
 0x20f   : > { %960 = vmatpush1.msra.mxu1 %v905_v44  ;;  %1154 = vmatprep.subr.mxu0 %v1097_v60 }
 0x210   : > { %961 = vmatprep.subr.mxu1 %v904_v59  ;;  %1155 = vmatpush1.msra.mxu0 %v1096_v63 }
 0x211   : > { %962 = vmatpush1.msra.mxu1 %v903_v61  ;;  %1156 = vmatprep.subr.mxu0 %v1095_v3 }
 0x212   : > { %963 = vmatprep.subr.mxu1 %v902_v2  ;;  %997 = vmatprep.mubr.f32.mxu1 %v2740_v6 }
 0x213   : > { %964 = vmatpush1.msra.mxu1 %v901_v4  ;;  %1157 = vmatpush1.msra.mxu0 %v1094_v5 }
 0x214   : > { %1190 = vmatprep.mubr.f32.mxu0 %v2740_v6  ;;  %2170 = vmatprep.subr.mxu1 %v1590_v7 }
 0x215   : > { %2034 = vmatprep.subr.mxu0 %v1590_v7 }
 0x267   : > { %v636_v10 = vpop.xlane.xlu0 %635 }
 0x268   : > { %v667_v46 = vmul.f32 0.0078125, %v636_v10 }
 0x26a   : > { %v683_v11 = vadd.f32 1e-05, %v667_v46 }
 0x26b   : > { %v638_v12 = vpop.xlane.xlu1 %637  ;;  %v640_v13 = vpop.xlane.xlu0 %639 }
 0x26c   : > { %2313 = vrsqrt.f32 %v683_v11  ;;  %v668_v14 = vmul.f32 0.0078125, %v638_v12  ;;  %v669_v15 = vmul.f32 0.0078125, %v640_v13 }
 0x26e   : > { %v684_v18 = vadd.f32 1e-05, %v668_v14  ;;  %v685_v19 = vadd.f32 1e-05, %v669_v15 }
 0x26f   : > { %v642_v20 = vpop.xlane.xlu1 %641  ;;  %v644_v21 = vpop.xlane.xlu0 %643 }
 0x270   : > { %2315 = vrsqrt.f32 %v684_v18  ;;  %v670_v22 = vmul.f32 0.0078125, %v642_v20  ;;  %v671_v23 = vmul.f32 0.0078125, %v644_v21 }
 0x271   : > { %2317 = vrsqrt.f32 %v685_v19 }
 0x272   : > { %v686_v26 = vadd.f32 1e-05, %v670_v22  ;;  %v687_v27 = vadd.f32 1e-05, %v671_v23 }
 0x273   : > { %v646_v28 = vpop.xlane.xlu1 %645  ;;  %v648_v29 = vpop.xlane.xlu0 %647 }
 0x274   : > { %2319 = vrsqrt.f32 %v686_v26  ;;  %v672_v30 = vmul.f32 0.0078125, %v646_v28  ;;  %v673_v31 = vmul.f32 0.0078125, %v648_v29 }
 0x275   : > { %2321 = vrsqrt.f32 %v687_v27 }
 0x276   : > { %v688_v34 = vadd.f32 1e-05, %v672_v30  ;;  %v689_v35 = vadd.f32 1e-05, %v673_v31 }
 0x277   : > { %v650_v36 = vpop.xlane.xlu1 %649  ;;  %v652_v37 = vpop.xlane.xlu0 %651 }
 0x278   : > { %2323 = vrsqrt.f32 %v688_v34  ;;  %v674_v38 = vmul.f32 0.0078125, %v650_v36  ;;  %v675_v39 = vmul.f32 0.0078125, %v652_v37 }
 0x279   : > { %v2314_v40 = vpop.eup %2313  ;;  %2325 = vrsqrt.f32 %v689_v35 }
 0x27a   : > { %v690_v42 = vadd.f32 1e-05, %v674_v38  ;;  %v715_v43 = vmul.f32 %v2314_v40, %v2984_v50  ;;  %v691_v49 = vadd.f32 1e-05, %v675_v39 }
 0x27b   : > { %v654_v51 = vpop.xlane.xlu1 %653  ;;  %v656_v52 = vpop.xlane.xlu0 %655 }
 0x27c   : > { %2327 = vrsqrt.f32 %v690_v42  ;;  %v676_v54 = vmul.f32 0.0078125, %v654_v51  ;;  %v736_v55 = vmul.f32 %v3059_v41, %v715_v43  ;;  %v677_v59 = vmul.f32 0.0078125, %v656_v52 }
 0x27d   : > { %v2316_v58 = vpop.eup %2315  ;;  %2329 = vrsqrt.f32 %v691_v49 }
 0x27e   : > { %v2318_v44 = vpop.eup %2317  ;;  %v692_v47 = vadd.f32 1e-05, %v676_v54  ;;  %v757_v60 = vadd.f32 %v3065_v53, %v736_v55  ;;  %v716_v50 = vmul.f32 %v2316_v58, %v2988_v56  ;;  %v693_v46 = vadd.f32 1e-05, %v677_v59 }
 0x27f   : > { %v658_v61 = vpop.xlane.xlu1 %657  ;;  %v717_v63 = vmul.f32 %v2318_v44, %v2990_v57  ;;  %v660_v11 = vpop.xlane.xlu0 %659 }
 0x280   : > { %v678_v3 = vmul.f32 0.0078125, %v658_v61  ;;  %v789_v4 = vmul.f32 0.70710677, %v757_v60  ;;  %v737_v5 = vmul.f32 %v3059_v41, %v716_v50  ;;  %2331 = vrsqrt.f32 %v692_v47 }
 0x281   : > { %v2320_v2 = vpop.eup %2319  ;;  %v738_v7 = vmul.f32 %v3059_v41, %v717_v63  ;;  %v679_v19 = vmul.f32 0.0078125, %v660_v11  ;;  %v773_v44 = vmul.f32 0.5, %v757_v60 }
 0x282   : > { %v2322_v10 = vpop.eup %2321  ;;  %v718_v12 = vmul.f32 %v2320_v2, %v2996_v0  ;;  %2333 = verf.f32 %v789_v4  ;;  %v758_v56 = vadd.f32 %v3065_v53, %v737_v5  ;;  %v694_v18 = vadd.f32 1e-05, %v678_v3 }
 0x283   : > { %v3076_v13 = vadd.f32 %v3065_v53, %v738_v7  ;;  %v719_v57 = vmul.f32 %v2322_v10, %v2998_v1  ;;  %2335 = vrsqrt.f32 %v693_v46  ;;  %v662_v23 = vpop.xlane.xlu1 %661  ;;  %v695_v30 = vadd.f32 1e-05, %v679_v19  ;;  %v664_v36 = vpop.xlane.xlu0 %663  ;;  %v1589_v46 = vld [vmem:[#allocation12 + $0xf0] sm:$0xff] }
 0x284   : > { %v739_v14 = vmul.f32 %v3059_v41, %v718_v12  ;;  %v790_v20 = vmul.f32 0.70710677, %v758_v56  ;;  %v680_v35 = vmul.f32 0.0078125, %v662_v23  ;;  %v681_v40 = vmul.f32 0.0078125, %v664_v36 }
 0x285   : > { %v2324_v15 = vpop.eup %2323  ;;  %v791_v22 = vmul.f32 0.70710677, %v3076_v13  ;;  %v740_v26 = vmul.f32 %v3059_v41, %v719_v57  ;;  %v774_v60 = vmul.f32 0.5, %v758_v56 }
 0x286   : > { %v2326_v21 = vpop.eup %2325  ;;  %v3082_v0 = vadd.f32 %v3065_v53, %v739_v14  ;;  %2337 = verf.f32 %v790_v20  ;;  %v720_v27 = vmul.f32 %v2324_v15, %v3004_v8  ;;  %v696_v42 = vadd.f32 1e-05, %v680_v35  ;;  %v1573_v20 = vld [vmem:[#allocation12 + $0x70] sm:$0xff] }
 0x287   : > { %v721_v1 = vmul.f32 %v2326_v21, %v3006_v9  ;;  %2339 = vrsqrt.f32 %v694_v18  ;;  %v3089_v31 = vadd.f32 %v3065_v53, %v740_v26  ;;  %v666_v43 = vpop.xlane.xlu1 %665  ;;  %v697_v59 = vadd.f32 1e-05, %v681_v40  ;;  %v1588_v21 = vld [vmem:[#allocation12 + $0xe8] sm:$0xff] }
 0x288   : > { %v792_v28 = vmul.f32 0.70710677, %v3082_v0  ;;  %v741_v34 = vmul.f32 %v3059_v41, %v720_v27  ;;  %2341 = verf.f32 %v791_v22  ;;  %v682_v58 = vmul.f32 0.0078125, %v666_v43 }
 0x289   : > { %v2328_v29 = vpop.eup %2327  ;;  %v742_v37 = vmul.f32 %v3059_v41, %v721_v1  ;;  %v793_v8 = vmul.f32 0.70710677, %v3089_v31 }
 0x28a   : > { %v722_v38 = vmul.f32 %v2328_v29, %v3012_v16  ;;  %2343 = verf.f32 %v792_v28  ;;  %v3096_v9 = vadd.f32 %v3065_v53, %v741_v34  ;;  %v2330_v39 = vpop.eup %2329  ;;  %v698_v7 = vadd.f32 1e-05, %v682_v58 }
 0x28b   : > { %2345 = vrsqrt.f32 %v695_v30  ;;  %v3099_v49 = vadd.f32 %v3065_v53, %v742_v37  ;;  %v723_v54 = vmul.f32 %v2330_v39, %v3014_v17  ;;  %v1574_v17 = vld [vmem:[#allocation12 + $0x78] sm:$0xff]  ;;  %v776_v30 = vmul.f32 0.5, %v3082_v0 }
 0x28c   : > { %v743_v51 = vmul.f32 %v3059_v41, %v722_v38  ;;  %2347 = verf.f32 %v793_v8  ;;  %v794_v16 = vmul.f32 0.70710677, %v3096_v9  ;;  %v777_v0 = vmul.f32 0.5, %v3089_v31 }
 0x28d   : > { %v2332_v52 = vpop.eup %2331  ;;  %2349 = vrsqrt.f32 %v696_v42  ;;  %v795_v50 = vmul.f32 0.70710677, %v3099_v49  ;;  %v744_v3 = vmul.f32 %v3059_v41, %v723_v54  ;;  %v778_v31 = vmul.f32 0.5, %v3096_v9 }
 0x28e   : > { %v3106_v61 = vadd.f32 %v3065_v53, %v743_v51  ;;  %2351 = verf.f32 %v794_v16  ;;  %v724_v4 = vmul.f32 %v2332_v52, %v3021_v24  ;;  %v779_v9 = vmul.f32 0.5, %v3099_v49 }
 0x28f   : > { %v2334_v55 = vpop.eup %2333  ;;  %2353 = vrsqrt.f32 %v697_v59  ;;  %v3115_v15 = vadd.f32 %v3065_v53, %v744_v3 }
 0x290   : > { %v821_v47 = vadd.f32 1.0, %v2334_v55  ;;  %v2336_v63 = vpop.eup %2335  ;;  %v796_v12 = vmul.f32 0.70710677, %v3106_v61  ;;  %2355 = verf.f32 %v795_v50  ;;  %v745_v56 = vmul.f32 %v3059_v41, %v724_v4 }
 0x291   : > { %v725_v57 = vmul.f32 %v2336_v63, %v3023_v25  ;;  %2357 = vrsqrt.f32 %v698_v7  ;;  %v775_v25 = vmul.f32 0.5, %v3076_v13  ;;  %v797_v28 = vmul.f32 0.70710677, %v3115_v15 }
 0x292   : > { %v837_v2 = vmul.f32 %v821_v47, %v773_v44  ;;  %2359 = verf.f32 %v796_v12  ;;  %v3125_v29 = vadd.f32 %v3065_v53, %v745_v56  ;;  %v780_v49 = vmul.f32 0.5, %v3106_v61 }
 0x293   : > { %v2338_v5 = vpop.eup %2337  ;;  %v746_v22 = vmul.f32 %v3059_v41, %v725_v57  ;;  %2361 = verf.f32 %v797_v28  ;;  %v781_v57 = vmul.f32 0.5, %v3115_v15 }
 0x294   : > { %998 = vmatmul.mubr.f32.vlgmr.msra.gmra.mxu1 %v837_v2  ;;  %1191 = vmatmul.mubr.f32.vlgmr.msra.gmra.mxu0 %v837_v2  ;;  %v822_v10 = vadd.f32 1.0, %v2338_v5  ;;  %v2340_v11 = vpop.eup %2339  ;;  %v798_v8 = vmul.f32 0.70710677, %v3125_v29 }
 0x295   : > { %1003 = vmatprep.mubr.f32.mxu1 %v2740_v6  ;;  %1196 = vmatprep.mubr.f32.mxu0 %v2740_v6  ;;  %v2342_v14 = vpop.eup %2341  ;;  %v726_v23 = vmul.f32 %v2340_v11, %v3030_v32  ;;  %v3131_v32 = vadd.f32 %v3065_v53, %v746_v22 }
 0x296   : > { %v838_v24 = vmul.f32 %v822_v10, %v774_v60  ;;  %2186 = vmatpush3.msra.mxu1 %v1574_v17  ;;  %2035 = vmatpush3.msra.mxu0 %v1574_v17  ;;  %v823_v19 = vadd.f32 1.0, %v2342_v14  ;;  %2363 = verf.f32 %v798_v8 }
 0x297   : > { %v2344_v18 = vpop.eup %2343  ;;  %2171 = vmatprep.subr.mxu1 %v1589_v46  ;;  %2036 = vmatprep.subr.mxu0 %v1589_v46  ;;  %v747_v34 = vmul.f32 %v3059_v41, %v726_v23  ;;  %v799_v40 = vmul.f32 0.70710677, %v3131_v32 }
 0x298   : > { %1004 = vmatmul.mubr.f32.gmra.mxu1 %v838_v24  ;;  %1197 = vmatmul.mubr.f32.gmra.mxu0 %v838_v24  ;;  %v2346_v26 = vpop.eup %2345  ;;  %v839_v27 = vmul.f32 %v823_v19, %v775_v25  ;;  %v824_v1 = vadd.f32 1.0, %v2344_v18  ;;  %v782_v18 = vmul.f32 0.5, %v3125_v29 }
 0x299   : > { %1009 = vmatprep.mubr.f32.mxu1 %v2740_v6  ;;  %1202 = vmatprep.mubr.f32.mxu0 %v2740_v6  ;;  %v2348_v13 = vpop.eup %2347  ;;  %v727_v35 = vmul.f32 %v2346_v26, %v3033_v33  ;;  %v3141_v42 = vadd.f32 %v3065_v53, %v747_v34  ;;  %2365 = verf.f32 %v799_v40 }
 0x29a   : > { %2187 = vmatpush3.msra.mxu1 %v1573_v20  ;;  %2037 = vmatpush3.msra.mxu0 %v1573_v20  ;;  %v2350_v36 = vpop.eup %2349  ;;  %v840_v37 = vmul.f32 %v824_v1, %v776_v30  ;;  %v825_v38 = vadd.f32 1.0, %v2348_v13 }
 0x29b   : > { %2172 = vmatprep.subr.mxu1 %v1588_v21  ;;  %2038 = vmatprep.subr.mxu0 %v1588_v21  ;;  %v2352_v39 = vpop.eup %2351  ;;  %v748_v33 = vmul.f32 %v3059_v41, %v727_v35  ;;  %v728_v16 = vmul.f32 %v2350_v36, %v3040_v45  ;;  %v800_v58 = vmul.f32 0.70710677, %v3141_v42  ;;  %v783_v21 = vmul.f32 0.5, %v3131_v32 }
 0x29c   : > { %1010 = vmatmul.mubr.f32.gmra.mxu1 %v839_v27  ;;  %1203 = vmatmul.mubr.f32.gmra.mxu0 %v839_v27  ;;  %v2354_v43 = vpop.eup %2353  ;;  %v841_v51 = vmul.f32 %v825_v38, %v777_v0  ;;  %v826_v52 = vadd.f32 1.0, %v2352_v39  ;;  %v784_v26 = vmul.f32 0.5, %v3141_v42  ;;  %v1572_v42 = vld [vmem:[#allocation12 + $0x68] sm:$0xff] }
 0x29d   : > { %1015 = vmatprep.mubr.f32.mxu1 %v2740_v6  ;;  %1208 = vmatprep.mubr.f32.mxu0 %v2740_v6  ;;  %v2356_v54 = vpop.eup %2355  ;;  %v729_v44 = vmul.f32 %v2354_v43, %v3043_v48  ;;  %v3151_v45 = vadd.f32 %v3065_v53, %v748_v33  ;;  %v749_v63 = vmul.f32 %v3059_v41, %v728_v16  ;;  %2367 = verf.f32 %v800_v58  ;;  %v1587_v33 = vld [vmem:[#allocation12 + $0xe0] sm:$0xff]  ;;  %v1585_v16 = vld [vmem:[#allocation12 + $0xd0] sm:$0xff] }
 0x29e   : > { %v2358_v55 = vpop.eup %2357  ;;  %v842_v59 = vmul.f32 %v826_v52, %v778_v31  ;;  %v827_v50 = vadd.f32 1.0, %v2356_v54  ;;  %2188 = vmatpush3.msra.mxu1 %v1572_v42  ;;  %2039 = vmatpush3.msra.mxu0 %v1572_v42  ;;  %v1571_v43 = vld [vmem:[#allocation12 + $0x60] sm:$0xff]  ;;  %v1570_v52 = vld [vmem:[#allocation12 + $0x58] sm:$0xff]  ;;  %v1584_v54 = vld [vmem:[#allocation12 + $0xc8] sm:$0xff] }
 0x29f   : > { %v2360_v47 = vpop.eup %2359  ;;  %v750_v2 = vmul.f32 %v3059_v41, %v729_v44  ;;  %v730_v48 = vmul.f32 %v2358_v55, %v3050_v62  ;;  %v801_v5 = vmul.f32 0.70710677, %v3151_v45  ;;  %v770_v17 = vadd.f32 %v3065_v53, %v749_v63  ;;  %2173 = vmatprep.subr.mxu1 %v1587_v33  ;;  %2040 = vmatprep.subr.mxu0 %v1587_v33  ;;  %v1568_v31 = vld [vmem:[#allocation12 + $0x48] sm:$0xff]  ;;  %v1583_v55 = vld [vmem:[#allocation12 + $0xc0] sm:$0xff]  ;;  %v1582_v44 = vld [vmem:[#allocation12 + $0xb8] sm:$0xff] }
 0x2a0   : > { %1016 = vmatmul.mubr.f32.gmra.mxu1 %v840_v37  ;;  %1209 = vmatmul.mubr.f32.gmra.mxu0 %v840_v37  ;;  %v843_v3 = vmul.f32 %v827_v50, %v779_v9  ;;  %v828_v4 = vadd.f32 1.0, %v2360_v47  ;;  %v2362_v7 = vpop.eup %2361  ;;  %v785_v29 = vmul.f32 0.5, %v3151_v45  ;;  %v1567_v58 = vld [vmem:[#allocation12 + $0x40] sm:$0xff]  ;;  %v1566_v47 = vld [vmem:[#allocation12 + $0x38] sm:$0xff]  ;;  %v1565_v50 = vld [vmem:[#allocation12 + $0x30] sm:$0xff] }
 0x2a1   : > { %1021 = vmatprep.mubr.f32.mxu1 %v2740_v6  ;;  %1214 = vmatprep.mubr.f32.mxu0 %v2740_v6  ;;  %v771_v60 = vadd.f32 %v3065_v53, %v750_v2  ;;  %v751_v10 = vmul.f32 %v3059_v41, %v730_v48  ;;  %v829_v46 = vadd.f32 1.0, %v2362_v7  ;;  %2369 = verf.f32 %v801_v5  ;;  %v1580_v45 = vld [vmem:[#allocation12 + $0xa8] sm:$0xff]  ;;  %v1579_v9 = vld [vmem:[#allocation12 + $0xa0] sm:$0xff]  ;;  %v1578_v48 = vld [vmem:[#allocation12 + $0x98] sm:$0xff] }
 0x2a2   : > { %v844_v62 = vmul.f32 %v828_v4, %v780_v49  ;;  %v802_v11 = vmul.f32 0.70710677, %v770_v17  ;;  %v786_v34 = vmul.f32 0.5, %v770_v17  ;;  %2189 = vmatpush3.msra.mxu1 %v1571_v43  ;;  %2041 = vmatpush3.msra.mxu0 %v1571_v43  ;;  %v1564_v63 = vld [vmem:[#allocation12 + $0x28] sm:$0xff]  ;;  %v1563_v2 = vld [vmem:[#allocation12 + $0x20] sm:$0xff]  ;;  %v1577_v4 = vld [vmem:[#allocation12 + $0x90] sm:$0xff] }
 0x2a3   : > { %v2364_v12 = vpop.eup %2363  ;;  %v803_v61 = vmul.f32 0.70710677, %v771_v60  ;;  %v845_v24 = vmul.f32 %v829_v46, %v781_v57  ;;  %v772_v41 = vadd.f32 %v3065_v53, %v751_v10  ;;  %v787_v38 = vmul.f32 0.5, %v771_v60  ;;  %v1561_v5 = vld [vmem:[#allocation12 + $0x10] sm:$0xff]  ;;  %v1576_v17 = vld [vmem:[#allocation12 + $0x88] sm:$0xff]  ;;  %v1575_v49 = vld [vmem:[#allocation12 + $0x80] sm:$0xff] }
 0x2a4   : > { %1022 = vmatmul.mubr.f32.gmra.mxu1 %v841_v51  ;;  %1215 = vmatmul.mubr.f32.gmra.mxu0 %v841_v51  ;;  %v830_v56 = vadd.f32 1.0, %v2364_v12  ;;  %2371 = verf.f32 %v802_v11  ;;  %v1586_v51 = vld [vmem:[#allocation12 + $0xd8] sm:$0xff]  ;;  %v1560_v7 = vld [vmem:[#allocation12 + $0x8] sm:$0xff]  ;;  %v1559_v60 = vld [vmem:[#allocation12] sm:$0xff] }
 0x2a5   : > { %1027 = vmatprep.mubr.f32.mxu1 %v2740_v6  ;;  %1220 = vmatprep.mubr.f32.mxu0 %v2740_v6  ;;  %2373 = verf.f32 %v803_v61  ;;  %v804_v25 = vmul.f32 0.70710677, %v772_v41  ;;  %v788_v0 = vmul.f32 0.5, %v772_v41 }
 0x2a6   : > { %v2366_v14 = vpop.eup %2365  ;;  %v846_v19 = vmul.f32 %v830_v56, %v782_v18  ;;  %2174 = vmatprep.subr.mxu1 %v1586_v51  ;;  %2042 = vmatprep.subr.mxu0 %v1586_v51 }
 0x2a7   : > { %v831_v20 = vadd.f32 1.0, %v2366_v14  ;;  %2375 = verf.f32 %v804_v25  ;;  %2190 = vmatpush3.msra.mxu1 %v1570_v52  ;;  %2043 = vmatpush3.msra.mxu0 %v1570_v52 }
 0x2a8   : > { %1028 = vmatmul.mubr.f32.gmra.mxu1 %v842_v59  ;;  %1221 = vmatmul.mubr.f32.gmra.mxu0 %v842_v59  ;;  %v1581_v59 = vld [vmem:[#allocation12 + $0xb0] sm:$0xff] }
 0x2a9   : > { %1033 = vmatprep.mubr.f32.mxu1 %v2740_v6  ;;  %1226 = vmatprep.mubr.f32.mxu0 %v2740_v6  ;;  %v847_v53 = vmul.f32 %v831_v20, %v783_v21 }
 0x2aa   : > { %v2368_v15 = vpop.eup %2367  ;;  %2175 = vmatprep.subr.mxu1 %v1585_v16  ;;  %2044 = vmatprep.subr.mxu0 %v1585_v16 }
 0x2ab   : > { %v832_v22 = vadd.f32 1.0, %v2368_v15 }
 0x2ac   : > { %1034 = vmatmul.mubr.f32.gmra.mxu1 %v843_v3  ;;  %1227 = vmatmul.mubr.f32.gmra.mxu0 %v843_v3  ;;  %v1562_v3 = vld [vmem:[#allocation12 + $0x18] sm:$0xff] }
 0x2ad   : > { %1039 = vmatprep.mubr.f32.mxu1 %v2740_v6  ;;  %1232 = vmatprep.mubr.f32.mxu0 %v2740_v6  ;;  %v848_v27 = vmul.f32 %v832_v22, %v784_v26 }
 0x2ae   : > { %v2370_v23 = vpop.eup %2369 }
 0x2af   : > { %v833_v1 = vadd.f32 1.0, %v2370_v23 }
 0x2b0   : > { %1040 = vmatmul.mubr.f32.gmra.mxu1 %v844_v62  ;;  %1233 = vmatmul.mubr.f32.gmra.mxu0 %v844_v62 }
 0x2b1   : > { %1045 = vmatprep.mubr.f32.mxu1 %v2740_v6  ;;  %1238 = vmatprep.mubr.f32.mxu0 %v2740_v6  ;;  %v2372_v28 = vpop.eup %2371  ;;  %v849_v13 = vmul.f32 %v833_v1, %v785_v29 }
 0x2b2   : > { %v834_v30 = vadd.f32 1.0, %v2372_v28  ;;  %v2374_v32 = vpop.eup %2373 }
 0x2b3   : > { %v835_v36 = vadd.f32 1.0, %v2374_v32 }
 0x2b4   : > { %1046 = vmatmul.mubr.f32.gmra.mxu1 %v845_v24  ;;  %1239 = vmatmul.mubr.f32.gmra.mxu0 %v845_v24  ;;  %v850_v35 = vmul.f32 %v834_v30, %v786_v34  ;;  %v2376_v37 = vpop.eup %2375 }
 0x2b5   : > { %1051 = vmatprep.mubr.f32.mxu1 %v2740_v6  ;;  %1244 = vmatprep.mubr.f32.mxu0 %v2740_v6  ;;  %v851_v8 = vmul.f32 %v835_v36, %v787_v38  ;;  %v836_v39 = vadd.f32 1.0, %v2376_v37 }
 0x2b7   : > { %v852_v40 = vmul.f32 %v836_v39, %v788_v0 }
 0x2b8   : > { %1052 = vmatmul.mubr.f32.gmra.mxu1 %v846_v19  ;;  %1245 = vmatmul.mubr.f32.gmra.mxu0 %v846_v19 }
 0x2b9   : > { %1057 = vmatprep.mubr.f32.mxu1 %v2740_v6  ;;  %1250 = vmatprep.mubr.f32.mxu0 %v2740_v6 }
 0x2bc   : > { %1058 = vmatmul.mubr.f32.gmra.mxu1 %v847_v53  ;;  %1251 = vmatmul.mubr.f32.gmra.mxu0 %v847_v53 }
 0x2bd   : > { %1063 = vmatprep.mubr.f32.mxu1 %v2740_v6  ;;  %1256 = vmatprep.mubr.f32.mxu0 %v2740_v6 }
 0x2c0   : > { %1064 = vmatmul.mubr.f32.gmra.mxu1 %v848_v27  ;;  %1257 = vmatmul.mubr.f32.gmra.mxu0 %v848_v27 }
 0x2c1   : > { %1069 = vmatprep.mubr.f32.mxu1 %v2740_v6  ;;  %1262 = vmatprep.mubr.f32.mxu0 %v2740_v6 }
 0x2c4   : > { %1070 = vmatmul.mubr.f32.gmra.mxu1 %v849_v13  ;;  %1263 = vmatmul.mubr.f32.gmra.mxu0 %v849_v13 }
 0x2c5   : > { %1075 = vmatprep.mubr.f32.mxu1 %v2740_v6  ;;  %1268 = vmatprep.mubr.f32.mxu0 %v2740_v6 }
 0x2c8   : > { %1076 = vmatmul.mubr.f32.gmra.mxu1 %v850_v35  ;;  %1269 = vmatmul.mubr.f32.gmra.mxu0 %v850_v35 }
 0x2c9   : > { %1081 = vmatprep.mubr.f32.mxu1 %v2740_v6  ;;  %1274 = vmatprep.mubr.f32.mxu0 %v2740_v6 }
 0x2cc   : > { %1082 = vmatmul.mubr.f32.gmra.mxu1 %v851_v8  ;;  %1275 = vmatmul.mubr.f32.gmra.mxu0 %v851_v8 }
 0x2cd   : > { %1087 = vmatprep.mubr.f32.mxu1 %v2740_v6  ;;  %1280 = vmatprep.mubr.f32.mxu0 %v2740_v6  ;;  %v1569_v6 = vld [vmem:[#allocation12 + $0x50] sm:$0xff] }
 0x2ce   : > { %2191 = vmatpush3.msra.mxu1 %v1569_v6  ;;  %2045 = vmatpush3.msra.mxu0 %v1569_v6 }
 0x2cf   : > { %2176 = vmatprep.subr.mxu1 %v1584_v54  ;;  %2046 = vmatprep.subr.mxu0 %v1584_v54 }
 0x2d0   : > { %1088 = vmatmul.mubr.f32.gmra.mxu1 %v852_v40  ;;  %1281 = vmatmul.mubr.f32.gmra.mxu0 %v852_v40 }
 0x2d1   : > { %2192 = vmatpush3.msra.mxu1 %v1568_v31  ;;  %2047 = vmatpush3.msra.mxu0 %v1568_v31 }
 0x2d2   : > { %2177 = vmatprep.subr.mxu1 %v1583_v55  ;;  %2048 = vmatprep.subr.mxu0 %v1583_v55 }
 0x2d3   : > { %2193 = vmatpush3.msra.mxu1 %v1567_v58  ;;  %2049 = vmatpush3.msra.mxu0 %v1567_v58 }
 0x2d4   : > { %2178 = vmatprep.subr.mxu1 %v1582_v44  ;;  %2050 = vmatprep.subr.mxu0 %v1582_v44 }
 0x2d5   : > { %2194 = vmatpush3.msra.mxu1 %v1566_v47  ;;  %2051 = vmatpush3.msra.mxu0 %v1566_v47 }
 0x2d6   : > { %2052 = vmatprep.subr.mxu0 %v1581_v59  ;;  %2179 = vmatprep.subr.mxu1 %v1581_v59 }
 0x2d7   : > { %2053 = vmatpush3.msra.mxu0 %v1565_v50  ;;  %2195 = vmatpush3.msra.mxu1 %v1565_v50 }
 0x2d8   : > { %2054 = vmatprep.subr.mxu0 %v1580_v45  ;;  %2180 = vmatprep.subr.mxu1 %v1580_v45 }
 0x2d9   : > { %2055 = vmatpush3.msra.mxu0 %v1564_v63  ;;  %2196 = vmatpush3.msra.mxu1 %v1564_v63 }
 0x2da   : > { %2056 = vmatprep.subr.mxu0 %v1579_v9  ;;  %2181 = vmatprep.subr.mxu1 %v1579_v9 }
 0x2db   : > { %2057 = vmatpush3.msra.mxu0 %v1563_v2  ;;  %2197 = vmatpush3.msra.mxu1 %v1563_v2 }
 0x2dc   : > { %2058 = vmatprep.subr.mxu0 %v1578_v48  ;;  %2182 = vmatprep.subr.mxu1 %v1578_v48 }
 0x2dd   : > { %2059 = vmatpush3.msra.mxu0 %v1562_v3  ;;  %2198 = vmatpush3.msra.mxu1 %v1562_v3 }
 0x2de   : > { %2060 = vmatprep.subr.mxu0 %v1577_v4  ;;  %2183 = vmatprep.subr.mxu1 %v1577_v4 }
 0x2df   : > { %2061 = vmatpush3.msra.mxu0 %v1561_v5  ;;  %2199 = vmatpush3.msra.mxu1 %v1561_v5 }
 0x2e0   : > { %2062 = vmatprep.subr.mxu0 %v1576_v17  ;;  %2184 = vmatprep.subr.mxu1 %v1576_v17 }
 0x2e1   : > { %2063 = vmatpush3.msra.mxu0 %v1560_v7  ;;  %2200 = vmatpush3.msra.mxu1 %v1560_v7 }
 0x2e2   : > { %2064 = vmatprep.subr.mxu0 %v1575_v49  ;;  %2185 = vmatprep.subr.mxu1 %v1575_v49 }
 0x2e3   : > { %2065 = vmatpush3.msra.mxu0 %v1559_v60  ;;  %2201 = vmatpush3.msra.mxu1 %v1559_v60 }
 0x354   : > { %v3188_v10 = vpop.f32.mrf.mxu1  ;;  %v3190_v62 = vpop.f32.mrf.mxu0 }
 0x355   : > { %v1963_v46 = vmul.f32 -1.442695, %v3188_v10 }
 0x356   : > { %v3193_v11 = vpop.f32.mrf.mxu1  ;;  %v3195_v12 = vpop.f32.mrf.mxu0 }
 0x357   : > { %2377 = vpow2.f32 %v1963_v46  ;;  %v1964_v57 = vmul.f32 -1.442695, %v3193_v11 }
 0x358   : > { %v3198_v61 = vpop.f32.mrf.mxu1  ;;  %v3200_v14 = vpop.f32.mrf.mxu0 }
 0x359   : > { %2379 = vpow2.f32 %v1964_v57  ;;  %v1965_v24 = vmul.f32 -1.442695, %v3198_v61 }
 0x35a   : > { %v3203_v56 = vpop.f32.mrf.mxu1  ;;  %v3205_v41 = vpop.f32.mrf.mxu0 }
 0x35b   : > { %2381 = vpow2.f32 %v1965_v24  ;;  %v1966_v18 = vmul.f32 -1.442695, %v3203_v56 }
 0x35c   : > { %v3208_v15 = vpop.f32.mrf.mxu1  ;;  %v3210_v19 = vpop.f32.mrf.mxu0 }
 0x35d   : > { %2383 = vpow2.f32 %v1966_v18  ;;  %v1967_v20 = vmul.f32 -1.442695, %v3208_v15 }
 0x35e   : > { %v3213_v25 = vpop.f32.mrf.mxu1  ;;  %v3215_v21 = vpop.f32.mrf.mxu0 }
 0x35f   : > { %2385 = vpow2.f32 %v1967_v20  ;;  %v1968_v53 = vmul.f32 -1.442695, %v3213_v25 }
 0x360   : > { %v3218_v22 = vpop.f32.mrf.mxu1  ;;  %v3220_v23 = vpop.f32.mrf.mxu0 }
 0x361   : > { %2387 = vpow2.f32 %v1968_v53  ;;  %v1969_v26 = vmul.f32 -1.442695, %v3218_v22 }
 0x362   : > { %v3223_v27 = vpop.f32.mrf.mxu1  ;;  %v3225_v1 = vpop.f32.mrf.mxu0 }
 0x363   : > { %2389 = vpow2.f32 %v1969_v26  ;;  %v1970_v28 = vmul.f32 -1.442695, %v3223_v27 }
 0x364   : > { %v2378_v29 = vpop.eup %2377  ;;  %v3228_v13 = vpop.f32.mrf.mxu1 }
 0x365   : > { %v3230_v30 = vpop.f32.mrf.mxu0  ;;  %v1383_v32 = vadd.f32 1.0, %v2378_v29  ;;  %2391 = vpow2.f32 %v1970_v28  ;;  %v1971_v34 = vmul.f32 -1.442695, %v3228_v13 }
 0x366   : > { %v2380_v35 = vpop.eup %2379  ;;  %v3233_v36 = vpop.f32.mrf.mxu1 }
 0x367   : > { %v3235_v37 = vpop.f32.mrf.mxu0  ;;  %2393 = vrcp.f32 %v1383_v32  ;;  %v1384_v38 = vadd.f32 1.0, %v2380_v35  ;;  %v1972_v8 = vmul.f32 -1.442695, %v3233_v36 }
 0x368   : > { %v2382_v39 = vpop.eup %2381  ;;  %2395 = vpow2.f32 %v1971_v34  ;;  %v3238_v0 = vpop.f32.mrf.mxu1 }
 0x369   : > { %v3240_v40 = vpop.f32.mrf.mxu0  ;;  %2397 = vrcp.f32 %v1384_v38  ;;  %v1385_v42 = vadd.f32 1.0, %v2382_v39  ;;  %v1973_v33 = vmul.f32 -1.442695, %v3238_v0 }
 0x36a   : > { %v2384_v43 = vpop.eup %2383  ;;  %2399 = vpow2.f32 %v1972_v8  ;;  %v3243_v51 = vpop.f32.mrf.mxu1 }
 0x36b   : > { %v3245_v52 = vpop.f32.mrf.mxu0  ;;  %2401 = vrcp.f32 %v1385_v42  ;;  %v1386_v16 = vadd.f32 1.0, %v2384_v43  ;;  %v1974_v6 = vmul.f32 -1.442695, %v3243_v51 }
 0x36c   : > { %v2386_v54 = vpop.eup %2385  ;;  %2403 = vpow2.f32 %v1973_v33  ;;  %v3248_v31 = vpop.f32.mrf.mxu1 }
 0x36d   : > { %v3250_v55 = vpop.f32.mrf.mxu0  ;;  %2405 = vrcp.f32 %v1386_v16  ;;  %v1387_v58 = vadd.f32 1.0, %v2386_v54  ;;  %v1975_v44 = vmul.f32 -1.442695, %v3248_v31 }
 0x36e   : > { %v2388_v47 = vpop.eup %2387  ;;  %2407 = vpow2.f32 %v1974_v6  ;;  %v3253_v59 = vpop.f32.mrf.mxu1 }
 0x36f   : > { %v3255_v50 = vpop.f32.mrf.mxu0  ;;  %2409 = vrcp.f32 %v1387_v58  ;;  %v1388_v45 = vadd.f32 1.0, %v2388_v47  ;;  %v1976_v63 = vmul.f32 -1.442695, %v3253_v59 }
 0x370   : > { %v2390_v9 = vpop.eup %2389  ;;  %2411 = vpow2.f32 %v1975_v44  ;;  %v3258_v2 = vpop.f32.mrf.mxu1 }
 0x371   : > { %2413 = vrcp.f32 %v1388_v45  ;;  %v1389_v48 = vadd.f32 1.0, %v2390_v9  ;;  %v1977_v3 = vmul.f32 -1.442695, %v3258_v2  ;;  %v3261_v4 = vpop.f32.mrf.mxu0 }
 0x372   : > { %v2392_v5 = vpop.eup %2391  ;;  %2415 = vpow2.f32 %v1976_v63  ;;  %v3263_v17 = vpop.f32.mrf.mxu1 }
 0x373   : > { %2417 = vrcp.f32 %v1389_v48  ;;  %v1390_v7 = vadd.f32 1.0, %v2392_v5  ;;  %v1978_v49 = vmul.f32 -1.442695, %v3263_v17  ;;  %v3268_v24 = vpop.f32.mrf.mxu0 }
 0x374   : > { %v2394_v60 = vpop.eup %2393  ;;  %2419 = vpow2.f32 %v1977_v3  ;;  %v3266_v46 = vpop.f32.mrf.mxu1 }
 0x375   : > { %v2396_v57 = vpop.eup %2395  ;;  %2421 = vrcp.f32 %v1390_v7  ;;  %v1979_v18 = vmul.f32 -1.442695, %v3266_v46  ;;  %v1479_v53 = vmul.f32 %v2394_v60, %v3188_v10  ;;  %v3279_v33 = vpop.f32.mrf.mxu0 }
 0x376   : > { %v2398_v20 = vpop.eup %2397  ;;  %v1391_v26 = vadd.f32 1.0, %v2396_v57  ;;  %2423 = vpow2.f32 %v1978_v49  ;;  %v3272_v28 = vpop.f32.mrf.mxu1 }
 0x377   : > { %v2400_v29 = vpop.eup %2399  ;;  %v1480_v32 = vmul.f32 %v2398_v20, %v3193_v11  ;;  %2425 = vpow2.f32 %v1979_v18  ;;  %v1980_v34 = vmul.f32 -1.442695, %v3272_v28  ;;  %v1511_v16 = vmul.f32 %v1479_v53, %v3190_v62  ;;  %v3291_v9 = vpop.f32.mrf.mxu0 }
 0x378   : > { %v2402_v35 = vpop.eup %2401  ;;  %2427 = vrcp.f32 %v1391_v26  ;;  %v1392_v38 = vadd.f32 1.0, %v2400_v29  ;;  %v3276_v8 = vpop.f32.mrf.mxu1 }
 0x379   : > { %v2404_v39 = vpop.eup %2403  ;;  %v1512_v42 = vmul.f32 %v1480_v32, %v3195_v12  ;;  %2429 = vpow2.f32 %v1980_v34  ;;  %v1981_v10 = vmul.f32 -1.442695, %v3276_v8  ;;  %v1481_v11 = vmul.f32 %v2402_v35, %v3198_v61  ;;  %v3303_v26 = vpop.f32.mrf.mxu0 }
 0x37a   : > { %v2406_v43 = vpop.eup %2405  ;;  %2431 = vrcp.f32 %v1392_v38  ;;  %v1393_v6 = vadd.f32 1.0, %v2404_v39  ;;  %v3284_v54 = vpop.f32.mrf.mxu1 }
 0x37b   : > { %v2408_v58 = vpop.eup %2407  ;;  %v1482_v44 = vmul.f32 %v2406_v43, %v3203_v56  ;;  %2433 = vpow2.f32 %v1981_v10  ;;  %v1982_v12 = vmul.f32 -1.442695, %v3284_v54  ;;  %1655 = vmatprep.mubr.f32.mxu0 %v1512_v42  ;;  %v1513_v56 = vmul.f32 %v1481_v11, %v3200_v14 }
 0x37c   : > { %v2410_v47 = vpop.eup %2409  ;;  %2435 = vrcp.f32 %v1393_v6  ;;  %v1394_v45 = vadd.f32 1.0, %v2408_v58  ;;  %v3288_v63 = vpop.f32.mrf.mxu1  ;;  %1656 = vmatmul.mubr.f32.vlgmr.msra.gmra.mxu0 %v1511_v16 }
 0x37d   : > { %v2412_v62 = vpop.eup %2411  ;;  %v1514_v61 = vmul.f32 %v1482_v44, %v3205_v41  ;;  %2437 = vpow2.f32 %v1982_v12  ;;  %v1983_v48 = vmul.f32 -1.442695, %v3288_v63  ;;  %v1483_v5 = vmul.f32 %v2410_v47, %v3208_v15  ;;  %v3315_v6 = vpop.f32.mrf.mxu0 }
 0x37e   : > { %v2414_v3 = vpop.eup %2413  ;;  %2439 = vrcp.f32 %v1394_v45  ;;  %v1395_v7 = vadd.f32 1.0, %v2412_v62  ;;  %v3296_v49 = vpop.f32.mrf.mxu1 }
 0x37f   : > { %v2416_v60 = vpop.eup %2415  ;;  %v1484_v57 = vmul.f32 %v2414_v3, %v3213_v25  ;;  %2441 = vpow2.f32 %v1983_v48  ;;  %v1984_v41 = vmul.f32 -1.442695, %v3296_v49  ;;  %1660 = vmatprep.mubr.f32.mxu0 %v1514_v61  ;;  %v1515_v25 = vmul.f32 %v1483_v5, %v3210_v19 }
 0x380   : > { %v2418_v18 = vpop.eup %2417  ;;  %2443 = vrcp.f32 %v1395_v7  ;;  %v1396_v20 = vadd.f32 1.0, %v2416_v60  ;;  %v3300_v53 = vpop.f32.mrf.mxu1  ;;  %1661 = vmatmul.mubr.f32.gmra.mxu0 %v1513_v56 }
 0x381   : > { %v2420_v14 = vpop.eup %2419  ;;  %v1516_v15 = vmul.f32 %v1484_v57, %v3215_v21  ;;  %2445 = vpow2.f32 %v1984_v41  ;;  %v1985_v29 = vmul.f32 -1.442695, %v3300_v53  ;;  %v1485_v34 = vmul.f32 %v2418_v18, %v3218_v22 }
 0x382   : > { %v2422_v32 = vpop.eup %2421  ;;  %2447 = vrcp.f32 %v1396_v20  ;;  %v1397_v35 = vadd.f32 1.0, %v2420_v14  ;;  %v3308_v38 = vpop.f32.mrf.mxu1 }
 0x383   : > { %v2424_v39 = vpop.eup %2423  ;;  %v1486_v42 = vmul.f32 %v2422_v32, %v3223_v27  ;;  %2449 = vpow2.f32 %v1985_v29  ;;  %v1986_v21 = vmul.f32 -1.442695, %v3308_v38  ;;  %1665 = vmatprep.mubr.f32.mxu0 %v1516_v15  ;;  %v1517_v44 = vmul.f32 %v1485_v34, %v3220_v23 }
 0x384   : > { %v2426_v10 = vpop.eup %2425  ;;  %2451 = vrcp.f32 %v1397_v35  ;;  %v1398_v43 = vadd.f32 1.0, %v2424_v39  ;;  %v3312_v16 = vpop.f32.mrf.mxu1  ;;  %1666 = vmatmul.mubr.f32.gmra.mxu0 %v1515_v25 }
 0x385   : > { %v2428_v19 = vpop.eup %2427  ;;  %v1518_v22 = vmul.f32 %v1486_v42, %v3225_v1  ;;  %v1399_v11 = vadd.f32 1.0, %v2426_v10  ;;  %2453 = vpow2.f32 %v1986_v21  ;;  %v1987_v58 = vmul.f32 -1.442695, %v3312_v16 }
 0x386   : > { %v2430_v27 = vpop.eup %2429  ;;  %v1487_v12 = vmul.f32 %v2428_v19, %v3228_v13  ;;  %2455 = vrcp.f32 %v1398_v43  ;;  %v3320_v47 = vpop.f32.mrf.mxu1 }
 0x387   : > { %v2432_v45 = vpop.eup %2431  ;;  %2457 = vrcp.f32 %v1399_v11  ;;  %v1400_v62 = vadd.f32 1.0, %v2430_v27  ;;  %v1988_v61 = vmul.f32 -1.442695, %v3320_v47  ;;  %1670 = vmatprep.mubr.f32.mxu0 %v1518_v22  ;;  %v3326_v13 = vpop.f32.mrf.mxu0 }
 0x388   : > { %v2434_v1 = vpop.eup %2433  ;;  %v1488_v48 = vmul.f32 %v2432_v45, %v3233_v36  ;;  %2459 = vpow2.f32 %v1987_v58  ;;  %v3324_v3 = vpop.f32.mrf.mxu1  ;;  %1671 = vmatmul.mubr.f32.gmra.mxu0 %v1517_v44  ;;  %v1519_v60 = vmul.f32 %v1487_v12, %v3230_v30 }
 0x389   : > { %v2436_v56 = vpop.eup %2435  ;;  %2461 = vrcp.f32 %v1400_v62  ;;  %v1401_v23 = vadd.f32 1.0, %v2434_v1  ;;  %v1989_v5 = vmul.f32 -1.442695, %v3324_v3  ;;  %v3338_v25 = vpop.f32.mrf.mxu0 }
 0x38a   : > { %v2438_v7 = vpop.eup %2437  ;;  %v1520_v57 = vmul.f32 %v1488_v48, %v3235_v37  ;;  %2463 = vpow2.f32 %v1988_v61  ;;  %v3331_v41 = vpop.f32.mrf.mxu1  ;;  %v1489_v18 = vmul.f32 %v2436_v56, %v3238_v0 }
 0x38b   : > { %v2440_v36 = vpop.eup %2439  ;;  %2465 = vrcp.f32 %v1401_v23  ;;  %v1402_v20 = vadd.f32 1.0, %v2438_v7  ;;  %v1990_v14 = vmul.f32 -1.442695, %v3331_v41  ;;  %v3350_v58 = vpop.f32.mrf.mxu0 }
 0x38c   : > { %v2442_v15 = vpop.eup %2441  ;;  %v1490_v29 = vmul.f32 %v2440_v36, %v3243_v51  ;;  %2467 = vpow2.f32 %v1989_v5  ;;  %1675 = vmatprep.mubr.f32.mxu1 %v1520_v57  ;;  %v3336_v32 = vpop.f32.mrf.mxu1  ;;  %v1521_v21 = vmul.f32 %v1489_v18, %v3240_v40 }
 0x38d   : > { %v2444_v30 = vpop.eup %2443  ;;  %2469 = vrcp.f32 %v1402_v20  ;;  %v1403_v37 = vadd.f32 1.0, %v2442_v15  ;;  %v1991_v34 = vmul.f32 -1.442695, %v3336_v32  ;;  %1676 = vmatmul.mubr.f32.vlgmr.msra.gmra.mxu1 %v1519_v60 }
 0x38e   : > { %v2446_v0 = vpop.eup %2445  ;;  %v1522_v35 = vmul.f32 %v1490_v29, %v3245_v52  ;;  %v1491_v39 = vmul.f32 %v2444_v30, %v3248_v31  ;;  %2471 = vpow2.f32 %v1990_v14  ;;  %v3343_v42 = vpop.f32.mrf.mxu1 }
 0x38f   : > { %v2448_v51 = vpop.eup %2447  ;;  %2473 = vrcp.f32 %v1403_v37  ;;  %v1404_v10 = vadd.f32 1.0, %v2446_v0  ;;  %v1992_v43 = vmul.f32 -1.442695, %v3343_v42 }
 0x390   : > { %v2450_v19 = vpop.eup %2449  ;;  %v1492_v22 = vmul.f32 %v2448_v51, %v3253_v59  ;;  %2475 = vpow2.f32 %v1991_v34  ;;  %1680 = vmatprep.mubr.f32.mxu1 %v1522_v35  ;;  %v3348_v11 = vpop.f32.mrf.mxu1  ;;  %v1523_v44 = vmul.f32 %v1491_v39, %v3250_v55 }
 0x391   : > { %v2452_v52 = vpop.eup %2451  ;;  %2477 = vrcp.f32 %v1404_v10  ;;  %v1405_v31 = vadd.f32 1.0, %v2450_v19  ;;  %v1993_v27 = vmul.f32 -1.442695, %v3348_v11  ;;  %1681 = vmatmul.mubr.f32.gmra.mxu1 %v1521_v21  ;;  %v1260_v55 = vpop.f32.mrf.mxu0 }
 0x392   : > { %v2454_v40 = vpop.eup %2453  ;;  %v1524_v12 = vmul.f32 %v1492_v22, %v3255_v50  ;;  %2479 = vpow2.f32 %v1992_v43  ;;  %v3355_v45 = vpop.f32.mrf.mxu1  ;;  %v1493_v62 = vmul.f32 %v2452_v52, %v3258_v2 }
 0x393   : > { %v2456_v59 = vpop.eup %2455  ;;  %2481 = vrcp.f32 %v1405_v31  ;;  %v1406_v61 = vadd.f32 1.0, %v2454_v40  ;;  %v1994_v1 = vmul.f32 -1.442695, %v3355_v45  ;;  %v1264_v15 = vpop.f32.mrf.mxu0 }
 0x394   : > { %v2458_v48 = vpop.eup %2457  ;;  %v1494_v56 = vmul.f32 %v2456_v59, %v3263_v17  ;;  %2483 = vpow2.f32 %v1993_v27  ;;  %1685 = vmatprep.mubr.f32.mxu1 %v1524_v12  ;;  %v1525_v2 = vmul.f32 %v1493_v62, %v3261_v4 }
 0x395   : > { %v2460_v23 = vpop.eup %2459  ;;  %2485 = vrcp.f32 %v1406_v61  ;;  %1686 = vmatmul.mubr.f32.gmra.mxu1 %v1523_v44  ;;  %v1495_v57 = vmul.f32 %v2458_v48, %v3266_v46 }
 0x396   : > { %v2462_v50 = vpop.eup %2461  ;;  %v1526_v5 = vmul.f32 %v1494_v56, %v3268_v24  ;;  %v1407_v7 = vadd.f32 1.0, %v2460_v23  ;;  %2487 = vpow2.f32 %v1994_v1 }
 0x397   : > { %v2464_v60 = vpop.eup %2463  ;;  %v1496_v36 = vmul.f32 %v2462_v50, %v3272_v28  ;;  %v1527_v37 = vmul.f32 %v1495_v57, %v3279_v33 }
 0x398   : > { %v2466_v18 = vpop.eup %2465  ;;  %2489 = vrcp.f32 %v1407_v7  ;;  %v1408_v17 = vadd.f32 1.0, %v2464_v60  ;;  %1690 = vmatprep.mubr.f32.mxu1 %v1526_v5 }
 0x399   : > { %v2468_v20 = vpop.eup %2467  ;;  %v1528_v14 = vmul.f32 %v1496_v36, %v3291_v9  ;;  %1691 = vmatmul.mubr.f32.gmra.mxu1 %v1525_v2  ;;  %v1497_v4 = vmul.f32 %v2466_v18, %v3276_v8  ;;  %v1266_v9 = vpop.f32.mrf.mxu0 }
 0x39a   : > { %v2470_v29 = vpop.eup %2469  ;;  %2491 = vrcp.f32 %v1408_v17  ;;  %v1409_v24 = vadd.f32 1.0, %v2468_v20 }
 0x39b   : > { %v2472_v30 = vpop.eup %2471  ;;  %v1498_v46 = vmul.f32 %v2470_v29, %v3284_v54  ;;  %1695 = vmatprep.mubr.f32.mxu1 %v1528_v14  ;;  %v1529_v10 = vmul.f32 %v1497_v4, %v3303_v26 }
 0x39c   : > { %v2474_v28 = vpop.eup %2473  ;;  %2493 = vrcp.f32 %v1409_v24  ;;  %v1410_v34 = vadd.f32 1.0, %v2472_v30 }
 0x39d   : > { %v2476_v0 = vpop.eup %2475  ;;  %v1530_v35 = vmul.f32 %v1498_v46, %v3315_v6  ;;  %1696 = vmatmul.mubr.f32.gmra.mxu1 %v1527_v37  ;;  %v1499_v33 = vmul.f32 %v2474_v28, %v3288_v63  ;;  %v1270_v6 = vpop.f32.mrf.mxu0 }
 0x39e   : > { %v2478_v39 = vpop.eup %2477  ;;  %2495 = vrcp.f32 %v1410_v34  ;;  %v1411_v51 = vadd.f32 1.0, %v2476_v0 }
 0x39f   : > { %v2480_v21 = vpop.eup %2479  ;;  %v1500_v8 = vmul.f32 %v2478_v39, %v3296_v49  ;;  %1700 = vmatprep.mubr.f32.mxu1 %v1530_v35  ;;  %v1531_v40 = vmul.f32 %v1499_v33, %v3326_v13  ;;  %v1272_v59 = vpop.f32.mrf.mxu0 }
 0x3a0   : > { %v2482_v54 = vpop.eup %2481  ;;  %2497 = vrcp.f32 %v1411_v51  ;;  %v1412_v43 = vadd.f32 1.0, %v2480_v21 }
 0x3a1   : > { %v2484_v19 = vpop.eup %2483  ;;  %v1532_v22 = vmul.f32 %v1500_v8, %v3338_v25  ;;  %1701 = vmatmul.mubr.f32.gmra.mxu1 %v1529_v10  ;;  %v1501_v26 = vmul.f32 %v2482_v54, %v3300_v53  ;;  %v1276_v53 = vpop.f32.mrf.mxu0 }
 0x3a2   : > { %v2486_v52 = vpop.eup %2485  ;;  %2499 = vrcp.f32 %v1412_v43  ;;  %v1413_v31 = vadd.f32 1.0, %v2484_v19 }
 0x3a3   : > { %v2488_v27 = vpop.eup %2487  ;;  %v1502_v63 = vmul.f32 %v2486_v52, %v3308_v38  ;;  %1705 = vmatprep.mubr.f32.mxu1 %v1532_v22  ;;  %v1533_v62 = vmul.f32 %v1501_v26, %v3350_v58  ;;  %v1278_v5 = vpop.f32.mrf.mxu0 }
 0x3a4   : > { %2501 = vrcp.f32 %v1413_v31  ;;  %v1414_v49 = vadd.f32 1.0, %v2488_v27 }
 0x3a5   : > { %v2490_v44 = vpop.eup %2489  ;;  %v1534_v12 = vmul.f32 %v1502_v63, %v1260_v55  ;;  %1706 = vmatmul.mubr.f32.gmra.mxu1 %v1531_v40  ;;  %v1282_v57 = vpop.f32.mrf.mxu0 }
 0x3a6   : > { %2503 = vrcp.f32 %v1414_v49  ;;  %v1503_v61 = vmul.f32 %v2490_v44, %v3312_v16 }
 0x3a7   : > { %v2492_v25 = vpop.eup %2491  ;;  %1710 = vmatprep.mubr.f32.mxu1 %v1534_v12  ;;  %v1284_v20 = vpop.f32.mrf.mxu0 }
 0x3a8   : > { %v1504_v13 = vmul.f32 %v2492_v25, %v3320_v47  ;;  %v1535_v56 = vmul.f32 %v1503_v61, %v1264_v15 }
 0x3a9   : > { %v2494_v1 = vpop.eup %2493  ;;  %1711 = vmatmul.mubr.f32.gmra.mxu1 %v1533_v62 }
 0x3aa   : > { %v1536_v38 = vmul.f32 %v1504_v13, %v1266_v9  ;;  %v1505_v23 = vmul.f32 %v2494_v1, %v3324_v3 }
 0x3ab   : > { %v2496_v48 = vpop.eup %2495 }
 0x3ac   : > { %v1506_v55 = vmul.f32 %v2496_v48, %v3331_v41  ;;  %1715 = vmatprep.mubr.f32.mxu1 %v1536_v38  ;;  %v1537_v16 = vmul.f32 %v1505_v23, %v1270_v6 }
 0x3ad   : > { %v2498_v50 = vpop.eup %2497  ;;  %1716 = vmatmul.mubr.f32.gmra.mxu1 %v1535_v56 }
 0x3ae   : > { %v1538_v58 = vmul.f32 %v1506_v55, %v1272_v59  ;;  %v1507_v60 = vmul.f32 %v2498_v50, %v3336_v32 }
 0x3af   : > { %v2500_v7 = vpop.eup %2499 }
 0x3b0   : > { %v1508_v47 = vmul.f32 %v2500_v7, %v3343_v42  ;;  %1720 = vmatprep.mubr.f32.mxu1 %v1538_v58  ;;  %v1539_v18 = vmul.f32 %v1507_v60, %v1276_v53 }
 0x3b1   : > { %v2502_v2 = vpop.eup %2501  ;;  %1721 = vmatmul.mubr.f32.gmra.mxu1 %v1537_v16 }
 0x3b2   : > { %v1540_v36 = vmul.f32 %v1508_v47, %v1278_v5  ;;  %v1509_v41 = vmul.f32 %v2502_v2, %v3348_v11 }
 0x3b3   : > { %v2504_v3 = vpop.eup %2503 }
 0x3b4   : > { %v1510_v17 = vmul.f32 %v2504_v3, %v3355_v45  ;;  %1725 = vmatprep.mubr.f32.mxu1 %v1540_v36  ;;  %v1541_v15 = vmul.f32 %v1509_v41, %v1282_v57 }
 0x3b5   : > { %1726 = vmatmul.mubr.f32.gmra.mxu1 %v1539_v18 }
 0x3b6   : > { %v1542_v14 = vmul.f32 %v1510_v17, %v1284_v20 }
 0x3b8   : > { %1730 = vmatprep.mubr.f32.mxu1 %v1542_v14 }
 0x3b9   : > { %1731 = vmatmul.mubr.f32.gmra.mxu1 %v1541_v15 }
 0x43c   : > { %v2066_v32 = vpop.f32.mrf.mxu0 }
 0x43e   : > { %v2067_v42 = vpop.f32.mrf.mxu0 }
 0x43f   : > { %v2068_v29 = vadd.f32 %v2067_v42, %v2066_v32 }
 0x440   : > { %v2069_v24 = vpop.f32.mrf.mxu0 }
 0x441   : > { %1787 = vst [vmem:[%s3387_s9] sm:$0xff] %v2068_v29 }
 0x442   : > { %v2070_v11 = vpop.f32.mrf.mxu0 }
 0x443   : > { %v2071_v45 = vadd.f32 %v2070_v11, %v2069_v24 }
 0x444   : > { %v2072_v30 = vpop.f32.mrf.mxu0 }
 0x445   : > { %1788 = vst [vmem:[%s3387_s9 + $0x8] sm:$0xff] %v2071_v45 }
 0x446   : > { %v2073_v37 = vpop.f32.mrf.mxu0 }
 0x447   : > { %v2074_v4 = vadd.f32 %v2073_v37, %v2072_v30 }
 0x448   : > { %v2075_v46 = vpop.f32.mrf.mxu0 }
 0x449   : > { %1789 = vst [vmem:[%s3387_s9 + $0x10] sm:$0xff] %v2074_v4 }
 0x44a   : > { %v2076_v28 = vpop.f32.mrf.mxu0 }
 0x44b   : > { %v2077_v34 = vadd.f32 %v2076_v28, %v2075_v46 }
 0x44d   : > { %1790 = vst [vmem:[%s3387_s9 + $0x18] sm:$0xff] %v2077_v34  ;;  %v2078_v0 = vpop.f32.mrf.mxu1 }
 0x44f   : > { %v2079_v35 = vpop.f32.mrf.mxu1 }
 0x450   : > { %v2080_v9 = vadd.f32 %v2079_v35, %v2078_v0 }
 0x451   : > { %v2081_v39 = vpop.f32.mrf.mxu1 }
 0x452   : > { %1791 = vst [vmem:[%s3387_s9 + $0x20] sm:$0xff] %v2080_v9 }
 0x453   : > { %v2082_v51 = vpop.f32.mrf.mxu1 }
 0x454   : > { %v2083_v21 = vadd.f32 %v2082_v51, %v2081_v39 }
 0x455   : > { %v2084_v10 = vpop.f32.mrf.mxu1 }
 0x456   : > { %1792 = vst [vmem:[%s3387_s9 + $0x28] sm:$0xff] %v2083_v21 }
 0x457   : > { %v2085_v33 = vpop.f32.mrf.mxu1 }
 0x458   : > { %v2086_v8 = vadd.f32 %v2085_v33, %v2084_v10 }
 0x459   : > { %v2087_v54 = vpop.f32.mrf.mxu1 }
 0x45a   : > { %1793 = vst [vmem:[%s3387_s9 + $0x30] sm:$0xff] %v2086_v8 }
 0x45b   : > { %v2088_v43 = vpop.f32.mrf.mxu1 }
 0x45c   : > { %v2089_v19 = vadd.f32 %v2088_v43, %v2087_v54 }
 0x45d   : > { %v2090_v22 = vpop.f32.mrf.mxu1 }
 0x45e   : > { %1794 = vst [vmem:[%s3387_s9 + $0x38] sm:$0xff] %v2089_v19 }
 0x45f   : > { %v2091_v6 = vpop.f32.mrf.mxu1 }
 0x460   : > { %v2092_v52 = vadd.f32 %v2091_v6, %v2090_v22 }
 0x461   : > { %v2093_v31 = vpop.f32.mrf.mxu1 }
 0x462   : > { %1795 = vst [vmem:[%s3387_s9 + $0x40] sm:$0xff] %v2092_v52 }
 0x463   : > { %v2094_v27 = vpop.f32.mrf.mxu1 }
 0x464   : > { %v2095_v40 = vadd.f32 %v2094_v27, %v2093_v31 }
 0x465   : > { %v2096_v26 = vpop.f32.mrf.mxu1 }
 0x466   : > { %1796 = vst [vmem:[%s3387_s9 + $0x48] sm:$0xff] %v2095_v40 }
 0x467   : > { %v2097_v63 = vpop.f32.mrf.mxu1 }
 0x468   : > { %v2098_v49 = vadd.f32 %v2097_v63, %v2096_v26 }
 0x469   : > { %v2099_v44 = vpop.f32.mrf.mxu1 }
 0x46a   : > { %1797 = vst [vmem:[%s3387_s9 + $0x50] sm:$0xff] %v2098_v49 }
 0x46b   : > { %v2100_v12 = vpop.f32.mrf.mxu1 }
 0x46c   : > { %v2101_v59 = vadd.f32 %v2100_v12, %v2099_v44 }
 0x46d   : > { %v2102_v25 = vpop.f32.mrf.mxu1 }
 0x46e   : > { %1798 = vst [vmem:[%s3387_s9 + $0x58] sm:$0xff] %v2101_v59 }
 0x46f   : > { %v2103_v62 = vpop.f32.mrf.mxu1 }
 0x470   : > { %v2104_v61 = vadd.f32 %v2103_v62, %v2102_v25 }
 0x471   : > { %v2105_v13 = vpop.f32.mrf.mxu1 }
 0x472   : > { %1799 = vst [vmem:[%s3387_s9 + $0x60] sm:$0xff] %v2104_v61 }
 0x473   : > { %v2106_v1 = vpop.f32.mrf.mxu1 }
 0x474   : > { %v2107_v53 = vadd.f32 %v2106_v1, %v2105_v13 }
 0x475   : > { %v2108_v38 = vpop.f32.mrf.mxu1 }
 0x476   : > { %1800 = vst [vmem:[%s3387_s9 + $0x68] sm:$0xff] %v2107_v53 }
 0x477   : > { %v2109_v48 = vpop.f32.mrf.mxu1 }
 0x478   : > { %v2110_v56 = vadd.f32 %v2109_v48, %v2108_v38 }
 0x479   : > { %v2111_v23 = vpop.f32.mrf.mxu1 }
 0x47a   : > { %1801 = vst [vmem:[%s3387_s9 + $0x70] sm:$0xff] %v2110_v56 }
 0x47b   : > { %v2112_v55 = vpop.f32.mrf.mxu1 }
 0x47c   : > { %v2113_v50 = vadd.f32 %v2112_v55, %v2111_v23 }
 0x47e   : > { %1802 = vst [vmem:[%s3387_s9 + $0x78] sm:$0xff] %v2113_v50 }
 0x47f   : > { %2653 = shalt.err (!%p2650_p3)
}
 0x480   : > { %s2654_s14 = scalar_lea.hbm %s3409_s27, 2048  ;;  %s2658_s3 = scalar_lea.hbm %s3466_s6, 4096 }
 0x481   : > { %p2655_p5 = scmp.ne.s32.totalorder %s3409_s27, %s2654_s14  ;;  %p2659_p12 = scmp.lt.s32.totalorder %s3409_s27, %s3466_s6 }
 0x482   : > { %p2660_p7 = scmp.lt.s32.totalorder %s2658_s3, %s2654_s14 }
 0x483   : > { %p2656_p1 = pnand %p2655_p5, %p2900_p13 }
 0x484   : > { %p2661_p9 = por %p2660_p7, %p2659_p12 }
 0x485   : > { %p2657_p6 = pneg %p2656_p1 }
 0x487   : > { %p2662_p4 = pnand %p2661_p9, %p2657_p6 }
 0x489   : > { %2665 = shalt.err (!%p2662_p4)
}
 0x48a   : > { %s2742_s9 = smov 128   ;;  %s2743_s17 = smov 8  }
 0x48b   : > { %2220 = dma.vmem_to_hbm [thread:$0]  (%p2900_p13), %s3411_s13, 2048, %s3409_s27, %s1804_s12, %s2742_s9, %s2742_s9, %s2743_s17  }
 0x48c PF: > { %s1832_s16 = sand.u32 1, %s2708_s21   ;;  %p3489_p8 = scmp.ne.s32.totalorder %s3478_s8, 0 }
 0x48d   : > { %p3490_p10 = scmp.ge.s32.totalorder %s2728_s26, 2  ;;  %s1833_s30 = scalar_lea.sflag [#allocation6], %s1832_s16 }
 0x48f   : > { %p2240_p11 = pnand %p3490_p10, %p3489_p8 }
 0x491   : > { %p2241_p2 = pneg %p2240_p11 }
 0x493   : > { %2703 = dma.done.wait (%p2241_p2), %s1833_s30, 2048  }
 0x494   : > { %2705 = vsyncadd (%p2241_p2), %s1833_s30, 4294965248  ;;  %s24_s26 = sadd.s32 1, %s2728_s26   ;;  %s3491_s21 = smov %s2712_s22 }
 0x495   : > { %p21_p0 = scmp.ge.s32.totalorder %s24_s26, 4   ;;  %s3492_s22 = smov %s2716_s23 }
 0x496   : > { %s3493_s23 = smov %s2909_s28  ;;  %s3494_s24 = smov %s2724_s25 }
 0x497   : > { %s3495_s25 = smov %s3497_s11  ;;  %23 = sbr.rel (!%p21_p0) target bundleno = 12 (0xc), region = 116 }
 0x49c   :  { %1838 = vsyncpa [#allocation5], 1 }
 0x49d   :  { %1840 = vsyncpa [#allocation5 + $0x1], 1 }
 0x49e   :  { %1841 = vsyncpa [#allocation8], 1 }
 0x49f   :  { %1842 = vsyncpa [#allocation11], 1 }
 0x4a0   :  { %1843 = vsyncpa [#allocation6], 1 }
 0x4a1   :  { %1845 = vsyncpa [#allocation6 + $0x1], 1 }

</bundles_post_ra>
